<compile_context>
chip_gen: v5e
topology: v5e:2x2
jax: 0.10.0
libtpu: 0.0.40
codegen_flags: <defaults>
</compile_context>

<pallas_src>
import functools

import jax
import jax.numpy as jnp
from jax import lax
from jax.experimental import pallas as pl
from jax.experimental.pallas import tpu as pltpu
from jax.scipy.linalg import block_diag


# ----------------------------------------------------------------------------
# Fused Pallas kernel: whole MConvGRU cell for one batch element per grid step.
# ----------------------------------------------------------------------------
def _fused_cell_kernel(x_ref, h_ref,
                       m1_ref, b1_ref, m2_ref, b2_ref, m3_ref, b3_ref,
                       mh_ref, bh_ref, o_ref, *, H, WC, KH_in, KH_state):
    """All tensors are lane-dense 2D tiles.

    x_ref : (1, H, W*Cin)     input row-matrix (NHWC flattened over (W, C))
    h_ref : (1, H, W*C)       hidden-state row-matrix
    m*_ref: (KH, W*Ci, 3*W*C) per-kernel-row mixing matrices (Toeplitz blocks)
    b*_ref: (1, 3*W*C)        bias rows, gate-blocked as [z | r | h]
    o_ref : (1, H, W*C)       new hidden state
    """
    f32 = jnp.float32
    shift_cache = {}

    def row_shift_mat(dy):
        # (H, H) 0/1 matrix with (S @ X)[y, :] = X[y + dy, :], zero outside [0, H).
        if dy not in shift_cache:
            r = lax.broadcasted_iota(jnp.int32, (H, H), 0)
            c = lax.broadcasted_iota(jnp.int32, (H, H), 1)
            shift_cache[dy] = (c == r + dy).astype(f32)
        return shift_cache[dy]

    def conv(x, m_ref, b_ref, kh_size):
        # 'same' KxK conv:  out = sum_kh (S_kh @ x) @ M_kh + bias_row
        rh = (kh_size - 1) // 2
        acc = None
        for kh in range(kh_size):
            dy = kh - rh
            xs = x if dy == 0 else jnp.dot(row_shift_mat(dy), x,
                                           preferred_element_type=f32)
            part = jnp.dot(xs, m_ref[kh], preferred_element_type=f32)
            acc = part if acc is None else acc + part
        return acc + b_ref[...]

    x = x_ref[0].astype(f32)          # (H, W*Cin)
    h = h_ref[0].astype(f32)          # (H, W*C)

    # x branch: three chained convs, gates concatenated (z|r|h) on the lane dim.
    xs = conv(x, m1_ref, b1_ref, KH_in)           # (H, 3*W*C)
    xs = conv(xs, m2_ref, b2_ref, KH_state)
    xs = conv(xs, m3_ref, b3_ref, KH_state)
    # h branch: one conv producing all three gates (GRU gate biases pre-folded).
    hs = conv(h, mh_ref, bh_ref, KH_state)        # (H, 3*W*C)

    # 128-lane-aligned static splits into the three gates.
    xz, xr, xh = xs[:, 0:WC], xs[:, WC:2 * WC], xs[:, 2 * WC:3 * WC]
    hz, hr, hh = hs[:, 0:WC], hs[:, WC:2 * WC], hs[:, 2 * WC:3 * WC]

    z = jax.nn.sigmoid(hz + xz)
    r = jax.nn.sigmoid(hr + xr)
    pre = hh + r * xh
    h_cand = jnp.where(pre >= 0, pre, 0.2 * pre)        # leaky_relu(0.2)
    o_ref[0] = ((1.0 - z) * h_cand + z * h).astype(o_ref.dtype)


# ----------------------------------------------------------------------------
# Forward wrapper (NCHW in / NCHW out, like the PyTorch module)
# ----------------------------------------------------------------------------
def mconv_gru_cell_forward(packed, x_nchw, h_nchw):
    N, Cin, H, W = x_nchw.shape
    C = h_nchw.shape[1]
    WC, WCin = W * C, W * Cin
    WC3 = 3 * WC
    KH_in = packed['m1'].shape[0]
    KH_state = packed['m2'].shape[0]

    # Kernel-native layout: (N, H, W*C).  In a recurrent loop keep x/h in this
    # layout across timesteps and transpose once outside the scan.
    x2 = jnp.transpose(x_nchw, (0, 2, 3, 1)).reshape(N, H, WCin)
    h2 = jnp.transpose(h_nchw, (0, 2, 3, 1)).reshape(N, H, WC)

    kern = functools.partial(_fused_cell_kernel, H=H, WC=WC,
                             KH_in=KH_in, KH_state=KH_state)
    out2 = pl.pallas_call(
        kern,
        out_shape=jax.ShapeDtypeStruct((N, H, WC), x_nchw.dtype),
        grid=(N,),
        in_specs=[
            pl.BlockSpec((1, H, WCin), lambda n: (n, 0, 0)),
            pl.BlockSpec((1, H, WC), lambda n: (n, 0, 0)),
            pl.BlockSpec((KH_in, WCin, WC3), lambda n: (0, 0, 0)),
            pl.BlockSpec((1, WC3), lambda n: (0, 0)),
            pl.BlockSpec((KH_state, WC3, WC3), lambda n: (0, 0, 0)),
            pl.BlockSpec((1, WC3), lambda n: (0, 0)),
            pl.BlockSpec((KH_state, WC3, WC3), lambda n: (0, 0, 0)),
            pl.BlockSpec((1, WC3), lambda n: (0, 0)),
            pl.BlockSpec((KH_state, WC, WC3), lambda n: (0, 0, 0)),
            pl.BlockSpec((1, WC3), lambda n: (0, 0)),
        ],
        out_specs=pl.BlockSpec((1, H, WC), lambda n: (n, 0, 0)),
        compiler_params=pltpu.CompilerParams(
            dimension_semantics=("parallel",),
            vmem_limit_bytes=32 * 1024 * 1024),
        # TODO(synk): in a recurrent driver that discards the old h, pass
        # input_output_aliases={1: 0} to update the state buffer in place.
    )(x2, h2, packed['m1'], packed['b1'], packed['m2'], packed['b2'],
      packed['m3'], packed['b3'], packed['mh'], packed['bh'])
    return jnp.transpose(out2.reshape(N, H, W, C), (0, 3, 1, 2))


# ----------------------------------------------------------------------------
# One-time weight packing (plain JAX, outside the kernel)
# ----------------------------------------------------------------------------
def _mix_matrices(w_oihw, W):
    """Per-kernel-row mixing matrices M[kh] of shape (W*Ci, W*Co).

    M[kh][x'*Ci + ci, x*Co + co] = sum_kw w[co, ci, kh, kw] * [x' == x + kw - rw]
    i.e. the kw taps plus 'same' zero padding of the width axis folded into a
    Toeplitz-block matrix (matches XLA/PyTorch 'SAME' for these convs).
    """
    Co, Ci, KH, KW = w_oihw.shape
    rw = (KW - 1) // 2
    mats = []
    for kh in range(KH):
        m = jnp.zeros((W * Ci, W * Co), jnp.float32)
        for kw in range(KW):
            shift = jnp.eye(W, k=rw - kw, dtype=jnp.float32)   # [x' == x + kw - rw]
            m = m + jnp.kron(shift, w_oihw[:, :, kh, kw].T)
        mats.append(m)
    return jnp.stack(mats, axis=0)                             # (KH, W*Ci, W*Co)


def pack_mconv_gru_weights(params, W):
    def mm(name):
        return _mix_matrices(params[name][0], W)

    def bias_row(bias_list):
        return jnp.concatenate([jnp.tile(b, W) for b in bias_list]).reshape(1, -1)

    def blockdiag_gates(a, b_, c):
        return jnp.stack([block_diag(a[k], b_[k], c[k])
                          for k in range(a.shape[0])], axis=0)

    bd = {name: params[name][1] for name in
          ['w_xz1', 'w_xr1', 'w_xh1', 'w_xz2', 'w_xr2', 'w_xh2',
           'w_xz3', 'w_xr3', 'w_xh3', 'w_hz', 'w_hr', 'w_hh']}
    bz = params['b_z'].reshape(-1)
    br = params['b_r'].reshape(-1)
    bh_ = params['b_h_'].reshape(-1)

    return dict(
        # stage 1: x -> (z|r|h), gate blocks concatenated on the output side
        m1=jnp.concatenate([mm('w_xz1'), mm('w_xr1'), mm('w_xh1')], axis=2),
        b1=bias_row([bd['w_xz1'], bd['w_xr1'], bd['w_xh1']]),
        # stages 2/3: independent per-gate chains -> block-diagonal over gates
        m2=blockdiag_gates(mm('w_xz2'), mm('w_xr2'), mm('w_xh2')),
        b2=bias_row([bd['w_xz2'], bd['w_xr2'], bd['w_xh2']]),
        m3=blockdiag_gates(mm('w_xz3'), mm('w_xr3'), mm('w_xh3')),
        b3=bias_row([bd['w_xz3'], bd['w_xr3'], bd['w_xh3']]),
        # h conv -> (z|r|h); the GRU gate biases fold exactly into these biases
        mh=jnp.concatenate([mm('w_hz'), mm('w_hr'), mm('w_hh')], axis=2),
        bh=bias_row([bd['w_hz'] + bz, bd['w_hr'] + br, bd['w_hh'] + bh_]),
    )


# ----------------------------------------------------------------------------
# Parameter construction (deterministic, matches module __init__ shapes)
# ----------------------------------------------------------------------------
def make_lora_conv_params(key, cin, cout, k, r, alpha):
    """One LoRAConv2d; the LoRA branch is folded exactly into an OIHW weight."""
    k1, k2, k3, k4 = jax.random.split(key, 4)
    W0 = jax.random.normal(k1, (cout, cin, k, k), jnp.float32) * 0.1       # OIHW
    bias = jax.random.normal(k2, (cout,), jnp.float32) * 0.1
    A = jax.random.normal(k3, (cout, r), jnp.float32) * 0.01               # (O,r,1,1)
    B = jax.random.normal(k4, (r, cin, k, k), jnp.float32) * 0.01          # (r,I,k,k)
    w_eff = W0 + (alpha / r) * jnp.einsum('or,rikl->oikl', A, B)
    return w_eff, bias


def make_mconv_gru_params(key, cin, cout, k_in, k_state, r=4, alpha=8):
    names = [('w_xz1', cin, k_in), ('w_xz2', cout, k_state), ('w_xz3', cout, k_state),
             ('w_hz', cout, k_state),
             ('w_xr1', cin, k_in), ('w_xr2', cout, k_state), ('w_xr3', cout, k_state),
             ('w_hr', cout, k_state),
             ('w_xh1', cin, k_in), ('w_xh2', cout, k_state), ('w_xh3', cout, k_state),
             ('w_hh', cout, k_state)]
    keys = jax.random.split(key, len(names))
    params = {}
    for (name, c_in, k), kk in zip(names, keys):
        params[name] = make_lora_conv_params(kk, c_in, cout, k, r, alpha)
    # PyTorch initializes the extra gate biases to zeros.
    params['b_z'] = jnp.zeros((1, cout, 1, 1), jnp.float32)
    params['b_r'] = jnp.zeros((1, cout, 1, 1), jnp.float32)
    params['b_h_'] = jnp.zeros((1, cout, 1, 1), jnp.float32)
    return params


# ----------------------------------------------------------------------------
# Pure-JAX reference (NCHW, mirrors the PyTorch module)
# ----------------------------------------------------------------------------
def _conv_ref(x_nchw, w_oihw, bias):
    out = lax.conv_general_dilated(x_nchw, w_oihw, (1, 1), 'SAME',
                                   dimension_numbers=('NCHW', 'OIHW', 'NCHW'))
    return out + bias.reshape(1, -1, 1, 1)


def mconv_gru_cell_ref(params, x, h):
    def L(name, inp):
        w, b = params[name]
        return _conv_ref(inp, w, b)

    xz = L('w_xz3', L('w_xz2', L('w_xz1', x)))
    xr = L('w_xr3', L('w_xr2', L('w_xr1', x)))
    xh = L('w_xh3', L('w_xh2', L('w_xh1', x)))
    hz, hr, hh = L('w_hz', h), L('w_hr', h), L('w_hh', h)
    z = jax.nn.sigmoid(hz + xz + params['b_z'])
    r = jax.nn.sigmoid(hr + xr + params['b_r'])
    pre = hh + r * xh + params['b_h_']
    h_cand = jnp.where(pre >= 0, pre, 0.2 * pre)
    return (1.0 - z) * h_cand + z * h


# ----------------------------------------------------------------------------
if __name__ == "__main__":
    N, CIN, COUT, H, W = 2, 4, 8, 16, 16
    K_IN, K_STATE = 3, 3
    R, ALPHA = 4, 8

    key = jax.random.PRNGKey(0)
    kp, kx, kh0 = jax.random.split(key, 3)
    params = make_mconv_gru_params(kp, CIN, COUT, K_IN, K_STATE, R, ALPHA)
    packed = pack_mconv_gru_weights(params, W)        # one-time weight prep

    x = jax.random.normal(kx, (N, CIN, H, W), jnp.float32)     # NCHW like PyTorch
    h0 = jax.random.normal(kh0, (N, COUT, H, W), jnp.float32)  # NCHW hidden state

    out = jax.jit(mconv_gru_cell_forward)(packed, x, h0)
    out = jax.block_until_ready(out)

    ref = mconv_gru_cell_ref(params, x, h0)
    assert out.shape == (N, COUT, H, W)
    max_err = float(jnp.max(jnp.abs(out - ref)))
    assert jnp.allclose(out, ref, atol=1e-3, rtol=1e-3), \
        f"mismatch vs JAX reference (max abs err {max_err:.3e})"

    print("KERNEL_OK")
</pallas_src>

<mosaic_0001>
module attributes {stable_mosaic.version = 11 : i64} {
  func.func @_fused_cell_kernel(%arg0: i32, %arg1: memref<1x16x64xf32, #tpu.memory_space<vmem>>, %arg2: memref<1x16x128xf32, #tpu.memory_space<vmem>>, %arg3: memref<3x64x384xf32, #tpu.memory_space<vmem>>, %arg4: memref<1x384xf32, #tpu.memory_space<vmem>>, %arg5: memref<3x384x384xf32, #tpu.memory_space<vmem>>, %arg6: memref<1x384xf32, #tpu.memory_space<vmem>>, %arg7: memref<3x384x384xf32, #tpu.memory_space<vmem>>, %arg8: memref<1x384xf32, #tpu.memory_space<vmem>>, %arg9: memref<3x128x384xf32, #tpu.memory_space<vmem>>, %arg10: memref<1x384xf32, #tpu.memory_space<vmem>>, %arg11: memref<1x16x128xf32, #tpu.memory_space<vmem>>) attributes {dimension_semantics = [#tpu.dimension_semantics<parallel>], iteration_bounds = array<i64: 2>, scalar_prefetch = 0 : i64, scratch_operands = 0 : i64, tpu.core_type = #tpu.core_type<tc>, window_params = [{transform_indices = @transform_0, window_bounds = array<i64: 1, 16, 64>}, {transform_indices = @transform_1, window_bounds = array<i64: 1, 16, 128>}, {pipeline_mode = #tpu.pipeline_mode<synchronous>, transform_indices = @transform_2, window_bounds = array<i64: 3, 64, 384>}, {pipeline_mode = #tpu.pipeline_mode<synchronous>, transform_indices = @transform_3, window_bounds = array<i64: 1, 384>}, {pipeline_mode = #tpu.pipeline_mode<synchronous>, transform_indices = @transform_4, window_bounds = array<i64: 3, 384, 384>}, {pipeline_mode = #tpu.pipeline_mode<synchronous>, transform_indices = @transform_5, window_bounds = array<i64: 1, 384>}, {pipeline_mode = #tpu.pipeline_mode<synchronous>, transform_indices = @transform_6, window_bounds = array<i64: 3, 384, 384>}, {pipeline_mode = #tpu.pipeline_mode<synchronous>, transform_indices = @transform_7, window_bounds = array<i64: 1, 384>}, {pipeline_mode = #tpu.pipeline_mode<synchronous>, transform_indices = @transform_8, window_bounds = array<i64: 3, 128, 384>}, {pipeline_mode = #tpu.pipeline_mode<synchronous>, transform_indices = @transform_9, window_bounds = array<i64: 1, 384>}, {transform_indices = @transform_10, window_bounds = array<i64: 1, 16, 128>}]} {
    %c0 = arith.constant 0 : index
    %c0_0 = arith.constant 0 : index
    %c0_1 = arith.constant 0 : index
    %0 = vector.load %arg1[%c0, %c0_0, %c0_1] : memref<1x16x64xf32, #tpu.memory_space<vmem>>, vector<1x16x64xf32>
    %1 = vector.shape_cast %0 : vector<1x16x64xf32> to vector<16x64xf32>
    %c0_2 = arith.constant 0 : index
    %c0_3 = arith.constant 0 : index
    %c0_4 = arith.constant 0 : index
    %2 = vector.load %arg2[%c0_2, %c0_3, %c0_4] : memref<1x16x128xf32, #tpu.memory_space<vmem>>, vector<1x16x128xf32>
    %3 = vector.shape_cast %2 : vector<1x16x128xf32> to vector<16x128xf32>
    %4 = tpu.iota {dimensions = array<i32: 0>} : vector<16x16xi32>
    %5 = tpu.iota {dimensions = array<i32: 1>} : vector<16x16xi32>
    %c-1_i32 = arith.constant -1 : i32
    %6 = vector.broadcast %c-1_i32 : i32 to vector<16x16xi32>
    %7 = arith.addi %4, %6 : vector<16x16xi32>
    %8 = arith.cmpi eq, %5, %7 : vector<16x16xi32>
    %9 = arith.extui %8 : vector<16x16xi1> to vector<16x16xi32>
    %10 = arith.sitofp %9 : vector<16x16xi32> to vector<16x16xf32>
    %cst = arith.constant dense<0.000000e+00> : vector<16x64xf32>
    %11 = tpu.matmul %10, %1, %cst {dimension_numbers = #tpu.dot_dimension_numbers<[1], [0], [0], [1], [0, 0, 1, 1], [], []>} : vector<16x16xf32>, vector<16x64xf32>, vector<16x64xf32> -> vector<16x64xf32>
    %c0_5 = arith.constant 0 : index
    %c0_6 = arith.constant 0 : index
    %c0_7 = arith.constant 0 : index
    %12 = vector.load %arg3[%c0_5, %c0_6, %c0_7] : memref<3x64x384xf32, #tpu.memory_space<vmem>>, vector<1x64x384xf32>
    %13 = vector.shape_cast %12 : vector<1x64x384xf32> to vector<64x384xf32>
    %cst_8 = arith.constant dense<0.000000e+00> : vector<16x384xf32>
    %14 = tpu.matmul %11, %13, %cst_8 {dimension_numbers = #tpu.dot_dimension_numbers<[1], [0], [0], [1], [0, 0, 1, 1], [], []>} : vector<16x64xf32>, vector<64x384xf32>, vector<16x384xf32> -> vector<16x384xf32>
    %c1 = arith.constant 1 : index
    %c0_9 = arith.constant 0 : index
    %c0_10 = arith.constant 0 : index
    %15 = vector.load %arg3[%c1, %c0_9, %c0_10] : memref<3x64x384xf32, #tpu.memory_space<vmem>>, vector<1x64x384xf32>
    %16 = vector.shape_cast %15 : vector<1x64x384xf32> to vector<64x384xf32>
    %cst_11 = arith.constant dense<0.000000e+00> : vector<16x384xf32>
    %17 = tpu.matmul %1, %16, %cst_11 {dimension_numbers = #tpu.dot_dimension_numbers<[1], [0], [0], [1], [0, 0, 1, 1], [], []>} : vector<16x64xf32>, vector<64x384xf32>, vector<16x384xf32> -> vector<16x384xf32>
    %18 = arith.addf %14, %17 : vector<16x384xf32>
    %19 = tpu.iota {dimensions = array<i32: 0>} : vector<16x16xi32>
    %20 = tpu.iota {dimensions = array<i32: 1>} : vector<16x16xi32>
    %c1_i32 = arith.constant 1 : i32
    %21 = vector.broadcast %c1_i32 : i32 to vector<16x16xi32>
    %22 = arith.addi %19, %21 : vector<16x16xi32>
    %23 = arith.cmpi eq, %20, %22 : vector<16x16xi32>
    %24 = arith.extui %23 : vector<16x16xi1> to vector<16x16xi32>
    %25 = arith.sitofp %24 : vector<16x16xi32> to vector<16x16xf32>
    %cst_12 = arith.constant dense<0.000000e+00> : vector<16x64xf32>
    %26 = tpu.matmul %25, %1, %cst_12 {dimension_numbers = #tpu.dot_dimension_numbers<[1], [0], [0], [1], [0, 0, 1, 1], [], []>} : vector<16x16xf32>, vector<16x64xf32>, vector<16x64xf32> -> vector<16x64xf32>
    %c2 = arith.constant 2 : index
    %c0_13 = arith.constant 0 : index
    %c0_14 = arith.constant 0 : index
    %27 = vector.load %arg3[%c2, %c0_13, %c0_14] : memref<3x64x384xf32, #tpu.memory_space<vmem>>, vector<1x64x384xf32>
    %28 = vector.shape_cast %27 : vector<1x64x384xf32> to vector<64x384xf32>
    %cst_15 = arith.constant dense<0.000000e+00> : vector<16x384xf32>
    %29 = tpu.matmul %26, %28, %cst_15 {dimension_numbers = #tpu.dot_dimension_numbers<[1], [0], [0], [1], [0, 0, 1, 1], [], []>} : vector<16x64xf32>, vector<64x384xf32>, vector<16x384xf32> -> vector<16x384xf32>
    %30 = arith.addf %18, %29 : vector<16x384xf32>
    %c0_16 = arith.constant 0 : index
    %c0_17 = arith.constant 0 : index
    %31 = vector.load %arg4[%c0_16, %c0_17] : memref<1x384xf32, #tpu.memory_space<vmem>>, vector<1x384xf32>
    %32 = vector.broadcast %31 : vector<1x384xf32> to vector<16x384xf32>
    %33 = arith.addf %30, %32 : vector<16x384xf32>
    %cst_18 = arith.constant dense<0.000000e+00> : vector<16x384xf32>
    %34 = tpu.matmul %10, %33, %cst_18 {dimension_numbers = #tpu.dot_dimension_numbers<[1], [0], [0], [1], [0, 0, 1, 1], [], []>} : vector<16x16xf32>, vector<16x384xf32>, vector<16x384xf32> -> vector<16x384xf32>
    %c0_19 = arith.constant 0 : index
    %c0_20 = arith.constant 0 : index
    %c0_21 = arith.constant 0 : index
    %35 = vector.load %arg5[%c0_19, %c0_20, %c0_21] : memref<3x384x384xf32, #tpu.memory_space<vmem>>, vector<1x384x384xf32>
    %36 = vector.shape_cast %35 : vector<1x384x384xf32> to vector<384x384xf32>
    %cst_22 = arith.constant dense<0.000000e+00> : vector<16x384xf32>
    %37 = tpu.matmul %34, %36, %cst_22 {dimension_numbers = #tpu.dot_dimension_numbers<[1], [0], [0], [1], [0, 0, 1, 1], [], []>} : vector<16x384xf32>, vector<384x384xf32>, vector<16x384xf32> -> vector<16x384xf32>
    %c1_23 = arith.constant 1 : index
    %c0_24 = arith.constant 0 : index
    %c0_25 = arith.constant 0 : index
    %38 = vector.load %arg5[%c1_23, %c0_24, %c0_25] : memref<3x384x384xf32, #tpu.memory_space<vmem>>, vector<1x384x384xf32>
    %39 = vector.shape_cast %38 : vector<1x384x384xf32> to vector<384x384xf32>
    %cst_26 = arith.constant dense<0.000000e+00> : vector<16x384xf32>
    %40 = tpu.matmul %33, %39, %cst_26 {dimension_numbers = #tpu.dot_dimension_numbers<[1], [0], [0], [1], [0, 0, 1, 1], [], []>} : vector<16x384xf32>, vector<384x384xf32>, vector<16x384xf32> -> vector<16x384xf32>
    %41 = arith.addf %37, %40 : vector<16x384xf32>
    %cst_27 = arith.constant dense<0.000000e+00> : vector<16x384xf32>
    %42 = tpu.matmul %25, %33, %cst_27 {dimension_numbers = #tpu.dot_dimension_numbers<[1], [0], [0], [1], [0, 0, 1, 1], [], []>} : vector<16x16xf32>, vector<16x384xf32>, vector<16x384xf32> -> vector<16x384xf32>
    %c2_28 = arith.constant 2 : index
    %c0_29 = arith.constant 0 : index
    %c0_30 = arith.constant 0 : index
    %43 = vector.load %arg5[%c2_28, %c0_29, %c0_30] : memref<3x384x384xf32, #tpu.memory_space<vmem>>, vector<1x384x384xf32>
    %44 = vector.shape_cast %43 : vector<1x384x384xf32> to vector<384x384xf32>
    %cst_31 = arith.constant dense<0.000000e+00> : vector<16x384xf32>
    %45 = tpu.matmul %42, %44, %cst_31 {dimension_numbers = #tpu.dot_dimension_numbers<[1], [0], [0], [1], [0, 0, 1, 1], [], []>} : vector<16x384xf32>, vector<384x384xf32>, vector<16x384xf32> -> vector<16x384xf32>
    %46 = arith.addf %41, %45 : vector<16x384xf32>
    %c0_32 = arith.constant 0 : index
    %c0_33 = arith.constant 0 : index
    %47 = vector.load %arg6[%c0_32, %c0_33] : memref<1x384xf32, #tpu.memory_space<vmem>>, vector<1x384xf32>
    %48 = vector.broadcast %47 : vector<1x384xf32> to vector<16x384xf32>
    %49 = arith.addf %46, %48 : vector<16x384xf32>
    %cst_34 = arith.constant dense<0.000000e+00> : vector<16x384xf32>
    %50 = tpu.matmul %10, %49, %cst_34 {dimension_numbers = #tpu.dot_dimension_numbers<[1], [0], [0], [1], [0, 0, 1, 1], [], []>} : vector<16x16xf32>, vector<16x384xf32>, vector<16x384xf32> -> vector<16x384xf32>
    %c0_35 = arith.constant 0 : index
    %c0_36 = arith.constant 0 : index
    %c0_37 = arith.constant 0 : index
    %51 = vector.load %arg7[%c0_35, %c0_36, %c0_37] : memref<3x384x384xf32, #tpu.memory_space<vmem>>, vector<1x384x384xf32>
    %52 = vector.shape_cast %51 : vector<1x384x384xf32> to vector<384x384xf32>
    %cst_38 = arith.constant dense<0.000000e+00> : vector<16x384xf32>
    %53 = tpu.matmul %50, %52, %cst_38 {dimension_numbers = #tpu.dot_dimension_numbers<[1], [0], [0], [1], [0, 0, 1, 1], [], []>} : vector<16x384xf32>, vector<384x384xf32>, vector<16x384xf32> -> vector<16x384xf32>
    %c1_39 = arith.constant 1 : index
    %c0_40 = arith.constant 0 : index
    %c0_41 = arith.constant 0 : index
    %54 = vector.load %arg7[%c1_39, %c0_40, %c0_41] : memref<3x384x384xf32, #tpu.memory_space<vmem>>, vector<1x384x384xf32>
    %55 = vector.shape_cast %54 : vector<1x384x384xf32> to vector<384x384xf32>
    %cst_42 = arith.constant dense<0.000000e+00> : vector<16x384xf32>
    %56 = tpu.matmul %49, %55, %cst_42 {dimension_numbers = #tpu.dot_dimension_numbers<[1], [0], [0], [1], [0, 0, 1, 1], [], []>} : vector<16x384xf32>, vector<384x384xf32>, vector<16x384xf32> -> vector<16x384xf32>
    %57 = arith.addf %53, %56 : vector<16x384xf32>
    %cst_43 = arith.constant dense<0.000000e+00> : vector<16x384xf32>
    %58 = tpu.matmul %25, %49, %cst_43 {dimension_numbers = #tpu.dot_dimension_numbers<[1], [0], [0], [1], [0, 0, 1, 1], [], []>} : vector<16x16xf32>, vector<16x384xf32>, vector<16x384xf32> -> vector<16x384xf32>
    %c2_44 = arith.constant 2 : index
    %c0_45 = arith.constant 0 : index
    %c0_46 = arith.constant 0 : index
    %59 = vector.load %arg7[%c2_44, %c0_45, %c0_46] : memref<3x384x384xf32, #tpu.memory_space<vmem>>, vector<1x384x384xf32>
    %60 = vector.shape_cast %59 : vector<1x384x384xf32> to vector<384x384xf32>
    %cst_47 = arith.constant dense<0.000000e+00> : vector<16x384xf32>
    %61 = tpu.matmul %58, %60, %cst_47 {dimension_numbers = #tpu.dot_dimension_numbers<[1], [0], [0], [1], [0, 0, 1, 1], [], []>} : vector<16x384xf32>, vector<384x384xf32>, vector<16x384xf32> -> vector<16x384xf32>
    %62 = arith.addf %57, %61 : vector<16x384xf32>
    %c0_48 = arith.constant 0 : index
    %c0_49 = arith.constant 0 : index
    %63 = vector.load %arg8[%c0_48, %c0_49] : memref<1x384xf32, #tpu.memory_space<vmem>>, vector<1x384xf32>
    %64 = vector.broadcast %63 : vector<1x384xf32> to vector<16x384xf32>
    %65 = arith.addf %62, %64 : vector<16x384xf32>
    %cst_50 = arith.constant dense<0.000000e+00> : vector<16x128xf32>
    %66 = tpu.matmul %10, %3, %cst_50 {dimension_numbers = #tpu.dot_dimension_numbers<[1], [0], [0], [1], [0, 0, 1, 1], [], []>} : vector<16x16xf32>, vector<16x128xf32>, vector<16x128xf32> -> vector<16x128xf32>
    %c0_51 = arith.constant 0 : index
    %c0_52 = arith.constant 0 : index
    %c0_53 = arith.constant 0 : index
    %67 = vector.load %arg9[%c0_51, %c0_52, %c0_53] : memref<3x128x384xf32, #tpu.memory_space<vmem>>, vector<1x128x384xf32>
    %68 = vector.shape_cast %67 : vector<1x128x384xf32> to vector<128x384xf32>
    %cst_54 = arith.constant dense<0.000000e+00> : vector<16x384xf32>
    %69 = tpu.matmul %66, %68, %cst_54 {dimension_numbers = #tpu.dot_dimension_numbers<[1], [0], [0], [1], [0, 0, 1, 1], [], []>} : vector<16x128xf32>, vector<128x384xf32>, vector<16x384xf32> -> vector<16x384xf32>
    %c1_55 = arith.constant 1 : index
    %c0_56 = arith.constant 0 : index
    %c0_57 = arith.constant 0 : index
    %70 = vector.load %arg9[%c1_55, %c0_56, %c0_57] : memref<3x128x384xf32, #tpu.memory_space<vmem>>, vector<1x128x384xf32>
    %71 = vector.shape_cast %70 : vector<1x128x384xf32> to vector<128x384xf32>
    %cst_58 = arith.constant dense<0.000000e+00> : vector<16x384xf32>
    %72 = tpu.matmul %3, %71, %cst_58 {dimension_numbers = #tpu.dot_dimension_numbers<[1], [0], [0], [1], [0, 0, 1, 1], [], []>} : vector<16x128xf32>, vector<128x384xf32>, vector<16x384xf32> -> vector<16x384xf32>
    %73 = arith.addf %69, %72 : vector<16x384xf32>
    %cst_59 = arith.constant dense<0.000000e+00> : vector<16x128xf32>
    %74 = tpu.matmul %25, %3, %cst_59 {dimension_numbers = #tpu.dot_dimension_numbers<[1], [0], [0], [1], [0, 0, 1, 1], [], []>} : vector<16x16xf32>, vector<16x128xf32>, vector<16x128xf32> -> vector<16x128xf32>
    %c2_60 = arith.constant 2 : index
    %c0_61 = arith.constant 0 : index
    %c0_62 = arith.constant 0 : index
    %75 = vector.load %arg9[%c2_60, %c0_61, %c0_62] : memref<3x128x384xf32, #tpu.memory_space<vmem>>, vector<1x128x384xf32>
    %76 = vector.shape_cast %75 : vector<1x128x384xf32> to vector<128x384xf32>
    %cst_63 = arith.constant dense<0.000000e+00> : vector<16x384xf32>
    %77 = tpu.matmul %74, %76, %cst_63 {dimension_numbers = #tpu.dot_dimension_numbers<[1], [0], [0], [1], [0, 0, 1, 1], [], []>} : vector<16x128xf32>, vector<128x384xf32>, vector<16x384xf32> -> vector<16x384xf32>
    %78 = arith.addf %73, %77 : vector<16x384xf32>
    %c0_64 = arith.constant 0 : index
    %c0_65 = arith.constant 0 : index
    %79 = vector.load %arg10[%c0_64, %c0_65] : memref<1x384xf32, #tpu.memory_space<vmem>>, vector<1x384xf32>
    %80 = vector.broadcast %79 : vector<1x384xf32> to vector<16x384xf32>
    %81 = arith.addf %78, %80 : vector<16x384xf32>
    %82 = vector.extract_strided_slice %65 {offsets = [0, 0], sizes = [16, 128], strides = [1, 1]} : vector<16x384xf32> to vector<16x128xf32>
    %83 = vector.extract_strided_slice %65 {offsets = [0, 128], sizes = [16, 128], strides = [1, 1]} : vector<16x384xf32> to vector<16x128xf32>
    %84 = vector.extract_strided_slice %65 {offsets = [0, 256], sizes = [16, 128], strides = [1, 1]} : vector<16x384xf32> to vector<16x128xf32>
    %85 = vector.extract_strided_slice %81 {offsets = [0, 0], sizes = [16, 128], strides = [1, 1]} : vector<16x384xf32> to vector<16x128xf32>
    %86 = vector.extract_strided_slice %81 {offsets = [0, 128], sizes = [16, 128], strides = [1, 1]} : vector<16x384xf32> to vector<16x128xf32>
    %87 = vector.extract_strided_slice %81 {offsets = [0, 256], sizes = [16, 128], strides = [1, 1]} : vector<16x384xf32> to vector<16x128xf32>
    %88 = arith.addf %85, %82 : vector<16x128xf32>
    %89 = arith.negf %88 : vector<16x128xf32>
    %90 = math.exp %89 : vector<16x128xf32>
    %cst_66 = arith.constant 1.000000e+00 : f32
    %91 = vector.broadcast %cst_66 : f32 to vector<16x128xf32>
    %92 = arith.addf %91, %90 : vector<16x128xf32>
    %93 = arith.divf %91, %92 : vector<16x128xf32>
    %94 = arith.addf %86, %83 : vector<16x128xf32>
    %95 = arith.negf %94 : vector<16x128xf32>
    %96 = math.exp %95 : vector<16x128xf32>
    %cst_67 = arith.constant 1.000000e+00 : f32
    %97 = vector.broadcast %cst_67 : f32 to vector<16x128xf32>
    %98 = arith.addf %97, %96 : vector<16x128xf32>
    %99 = arith.divf %97, %98 : vector<16x128xf32>
    %100 = arith.mulf %99, %84 : vector<16x128xf32>
    %101 = arith.addf %87, %100 : vector<16x128xf32>
    %cst_68 = arith.constant 0.000000e+00 : f32
    %102 = vector.broadcast %cst_68 : f32 to vector<16x128xf32>
    %103 = arith.cmpf oge, %101, %102 : vector<16x128xf32>
    %cst_69 = arith.constant 2.000000e-01 : f32
    %104 = vector.broadcast %cst_69 : f32 to vector<16x128xf32>
    %105 = arith.mulf %104, %101 : vector<16x128xf32>
    %106 = arith.select %103, %101, %105 : vector<16x128xi1>, vector<16x128xf32>
    %cst_70 = arith.constant 1.000000e+00 : f32
    %107 = vector.broadcast %cst_70 : f32 to vector<16x128xf32>
    %108 = arith.subf %107, %93 : vector<16x128xf32>
    %109 = arith.mulf %108, %106 : vector<16x128xf32>
    %110 = arith.mulf %93, %3 : vector<16x128xf32>
    %111 = arith.addf %109, %110 : vector<16x128xf32>
    %c0_71 = arith.constant 0 : index
    %c0_72 = arith.constant 0 : index
    %c0_73 = arith.constant 0 : index
    %112 = vector.load %arg11[%c0_71, %c0_72, %c0_73] : memref<1x16x128xf32, #tpu.memory_space<vmem>>, vector<1x16x128xf32>
    %113 = vector.shape_cast %112 : vector<1x16x128xf32> to vector<16x128xf32>
    %114 = vector.shape_cast %111 : vector<16x128xf32> to vector<1x16x128xf32>
    tpu.vector_store %arg11[%c0_71, %c0_72, %c0_73], %114 {strides = array<i32>} : memref<1x16x128xf32, #tpu.memory_space<vmem>>, vector<1x16x128xf32>,
    return
  }
  func.func @transform_0(%arg0: i32) -> (i32, i32, i32) {
    %c0_i32 = arith.constant 0 : i32
    %c0_i32_0 = arith.constant 0 : i32
    %c0_i32_1 = arith.constant 0 : i32
    return %arg0, %c0_i32, %c0_i32_0 : i32, i32, i32
  }
  func.func @transform_1(%arg0: i32) -> (i32, i32, i32) {
    %c0_i32 = arith.constant 0 : i32
    %c0_i32_0 = arith.constant 0 : i32
    %c0_i32_1 = arith.constant 0 : i32
    return %arg0, %c0_i32, %c0_i32_0 : i32, i32, i32
  }
  func.func @transform_2(%arg0: i32) -> (i32, i32, i32) {
    %c0_i32 = arith.constant 0 : i32
    %c0_i32_0 = arith.constant 0 : i32
    %c0_i32_1 = arith.constant 0 : i32
    %c0_i32_2 = arith.constant 0 : i32
    return %c0_i32, %c0_i32_0, %c0_i32_1 : i32, i32, i32
  }
  func.func @transform_3(%arg0: i32) -> (i32, i32) {
    %c0_i32 = arith.constant 0 : i32
    %c0_i32_0 = arith.constant 0 : i32
    %c0_i32_1 = arith.constant 0 : i32
    return %c0_i32, %c0_i32_0 : i32, i32
  }
  func.func @transform_4(%arg0: i32) -> (i32, i32, i32) {
    %c0_i32 = arith.constant 0 : i32
    %c0_i32_0 = arith.constant 0 : i32
    %c0_i32_1 = arith.constant 0 : i32
    %c0_i32_2 = arith.constant 0 : i32
    return %c0_i32, %c0_i32_0, %c0_i32_1 : i32, i32, i32
  }
  func.func @transform_5(%arg0: i32) -> (i32, i32) {
    %c0_i32 = arith.constant 0 : i32
    %c0_i32_0 = arith.constant 0 : i32
    %c0_i32_1 = arith.constant 0 : i32
    return %c0_i32, %c0_i32_0 : i32, i32
  }
  func.func @transform_6(%arg0: i32) -> (i32, i32, i32) {
    %c0_i32 = arith.constant 0 : i32
    %c0_i32_0 = arith.constant 0 : i32
    %c0_i32_1 = arith.constant 0 : i32
    %c0_i32_2 = arith.constant 0 : i32
    return %c0_i32, %c0_i32_0, %c0_i32_1 : i32, i32, i32
  }
  func.func @transform_7(%arg0: i32) -> (i32, i32) {
    %c0_i32 = arith.constant 0 : i32
    %c0_i32_0 = arith.constant 0 : i32
    %c0_i32_1 = arith.constant 0 : i32
    return %c0_i32, %c0_i32_0 : i32, i32
  }
  func.func @transform_8(%arg0: i32) -> (i32, i32, i32) {
    %c0_i32 = arith.constant 0 : i32
    %c0_i32_0 = arith.constant 0 : i32
    %c0_i32_1 = arith.constant 0 : i32
    %c0_i32_2 = arith.constant 0 : i32
    return %c0_i32, %c0_i32_0, %c0_i32_1 : i32, i32, i32
  }
  func.func @transform_9(%arg0: i32) -> (i32, i32) {
    %c0_i32 = arith.constant 0 : i32
    %c0_i32_0 = arith.constant 0 : i32
    %c0_i32_1 = arith.constant 0 : i32
    return %c0_i32, %c0_i32_0 : i32, i32
  }
  func.func @transform_10(%arg0: i32) -> (i32, i32, i32) {
    %c0_i32 = arith.constant 0 : i32
    %c0_i32_0 = arith.constant 0 : i32
    %c0_i32_1 = arith.constant 0 : i32
    return %arg0, %c0_i32, %c0_i32_0 : i32, i32, i32
  }
}

</mosaic_0001>

<bundles_post_ra>
// kernel: mconv_gru_cell_forward.1
= control target key start
LH: loop header
LB: loop body
LE: loop exit
PB: predicated region body
PF: predicated region fallthrough
CT: control target
= control target key end

     0   :  { %15 = vsyncpa [#allocation3], 0  ;;  %s5139_s0 = inlined_call_operand.vmem [shape: f32[2,16,64], index: 0, kind: input, shape index: {}]   ;;  %s5140_s1 = inlined_call_operand.vmem [shape: f32[2,16,128], index: 1, kind: input, shape index: {}]   ;;  %s5141_s2 = inlined_call_operand.hbm [shape: f32[3,64,384], index: 2, kind: input, shape index: {}]   ;;  %s5142_s3 = inlined_call_operand.hbm [shape: f32[1,384], index: 3, kind: input, shape index: {}]   ;;  %s5143_s4 = inlined_call_operand.hbm [shape: f32[3,384,384], index: 4, kind: input, shape index: {}]   ;;  %s5144_s5 = inlined_call_operand.hbm [shape: f32[1,384], index: 5, kind: input, shape index: {}]   ;;  %s5145_s6 = inlined_call_operand.hbm [shape: f32[3,384,384], index: 6, kind: input, shape index: {}]   ;;  %s5146_s7 = inlined_call_operand.hbm [shape: f32[1,384], index: 7, kind: input, shape index: {}]   ;;  %s5147_s8 = inlined_call_operand.hbm [shape: f32[3,128,384], index: 8, kind: input, shape index: {}]   ;;  %s5148_s9 = inlined_call_operand.hbm [shape: f32[1,384], index: 9, kind: input, shape index: {}]   ;;  %s5149_s10 = inlined_call_operand.vmem [shape: f32[2,16,128], index: 10, kind: output, shape index: {}]  }
   0x1   :  { %16 = vsyncpa [#allocation5], 0 }
   0x2   :  { %17 = vsyncpa [#allocation8], 0 }
   0x3   :  { %18 = vsyncpa [#allocation11], 0 }
   0x4   :  { %19 = vsyncpa [#allocation14], 0  ;;  %s4534_s13 = smov 0  }
   0x5 LB: > { %s302_s16 = sshll.u32 %s5142_s3, 4  ;;  %s4543_s17 = sadd.s32 4294967295, %s4466_s13   ;;  %s4466_s13 = sphi %s4534_s13, %s25_s13   ;;  %s303_s16 = int_to_ptr.hbm [resolvable:$true] %s302_s16 }
   0x6   : > { %p4002_p0 = scmp.ge.s32.totalorder %s4466_s13, 1  ;;  %p276_p1 = scmp.lt.s32.totalorder %s4466_s13, 3 }
   0x7   : > { %p4147_p2 = scmp.eq.s32.totalorder %s4543_s17, 0  ;;  %s4468_s19 = smov [#allocation4]  }
   0x8   : > { %p4548_p3 = pnand %p4002_p0, %p276_p1  ;;  %s304_s20 = sshll.u32 %s4468_s19, 4  ;;  %s305_s20 = int_to_ptr.vmem [resolvable:$true] %s304_s20 }
   0x9   : > { %s328_s23 = sshll.u32 %s5144_s5, 4  ;;  %s354_s26 = sshll.u32 %s5146_s7, 4  ;;  %s329_s23 = int_to_ptr.hbm [resolvable:$true] %s328_s23  ;;  %s355_s26 = int_to_ptr.hbm [resolvable:$true] %s354_s26 }
   0xa   : > { %p4122_p4 = pneg %p4548_p3  ;;  %s4469_s28 = smov [#allocation7]  }
   0xb   : > { %s330_s29 = sshll.u32 %s4469_s28, 4  ;;  %s4470_s30 = smov [#allocation10]   ;;  %s331_s29 = int_to_ptr.vmem [resolvable:$true] %s330_s29 }
   0xc   : > { %p4562_p5 = pnand %p4147_p2, %p4122_p4  ;;  %s356_s11 = sshll.u32 %s4470_s30, 4  ;;  %s357_s11 = int_to_ptr.vmem [resolvable:$true] %s356_s11 }
   0xd   : > { %s287_s15 = sshll.u32 %s5141_s2, 4  ;;  %s4471_s19 = smov [#allocation2]   ;;  %s288_s15 = int_to_ptr.hbm [resolvable:$true] %s287_s15 }
   0xe   : > { %4128 = dma.hbm_to_vmem [thread:$0]  (!%p4562_p5), %s303_s16, 48, %s305_s20, [#allocation5]  }
   0xf   : > { %4134 = dma.hbm_to_vmem [thread:$0]  (!%p4562_p5), %s329_s23, 48, %s331_s29, [#allocation8]  }
  0x10   : > { %4140 = dma.hbm_to_vmem [thread:$0]  (!%p4562_p5), %s355_s26, 48, %s357_s11, [#allocation11]  }
  0x11   : > { %s289_s21 = sshll.u32 %s4471_s19, 4  ;;  %s313_s16 = sshll.u32 %s5143_s4, 4  ;;  %s290_s21 = int_to_ptr.vmem [resolvable:$true] %s289_s21  ;;  %s314_s16 = int_to_ptr.hbm [resolvable:$true] %s313_s16 }
  0x12   : > { %s4472_s20 = smov 384   ;;  %s4473_s23 = smov 24  }
  0x13   : > { %4125 = dma.hbm_to_vmem [thread:$0]  (!%p4562_p5), %s288_s15, 9216, %s290_s21, [#allocation3], %s4472_s20, %s4472_s20, %s4473_s23  }
  0x14   : > { %s4474_s25 = smov [#allocation6]   ;;  %s339_s26 = sshll.u32 %s5145_s6, 4  ;;  %s340_s26 = int_to_ptr.hbm [resolvable:$true] %s339_s26 }
  0x15   : > { %s315_s28 = sshll.u32 %s4474_s25, 4  ;;  %s365_s14 = sshll.u32 %s5147_s8, 4  ;;  %s316_s28 = int_to_ptr.vmem [resolvable:$true] %s315_s28  ;;  %s366_s14 = int_to_ptr.hbm [resolvable:$true] %s365_s14 }
  0x16   : > { %4131 = dma.hbm_to_vmem [thread:$0]  (!%p4562_p5), %s314_s16, 55296, %s316_s28, [#allocation5], %s4472_s20, %s4472_s20, %s4473_s23  }
  0x17   : > { %s4475_s19 = smov [#allocation9]   ;;  %s4476_s15 = smov [#allocation12]  }
  0x18   : > { %s341_s22 = sshll.u32 %s4475_s19, 4  ;;  %s367_s21 = sshll.u32 %s4476_s15, 4  ;;  %s342_s22 = int_to_ptr.vmem [resolvable:$true] %s341_s22  ;;  %s368_s21 = int_to_ptr.vmem [resolvable:$true] %s367_s21 }
  0x19   : > { %4137 = dma.hbm_to_vmem [thread:$0]  (!%p4562_p5), %s340_s26, 55296, %s342_s22, [#allocation8], %s4472_s20, %s4472_s20, %s4473_s23  }
  0x1a   : > { %s380_s29 = sshll.u32 %s5148_s9, 4  ;;  %s4477_s16 = smov [#allocation13]   ;;  %s381_s29 = int_to_ptr.hbm [resolvable:$true] %s380_s29 }
  0x1b   : > { %4143 = dma.hbm_to_vmem [thread:$0]  (!%p4562_p5), %s366_s14, 18432, %s368_s21, [#allocation11], %s4472_s20, %s4472_s20, %s4473_s23  }
  0x1c   : > { %s382_s28 = sshll.u32 %s4477_s16, 4  ;;  %411 = sbr.rel (%p4548_p3) target bundleno = 1485 (0x5cd), region = 60  ;;  %s383_s28 = int_to_ptr.vmem [resolvable:$true] %s382_s28 }
  0x1d   : > { %4146 = dma.hbm_to_vmem [thread:$0]  (!%p4562_p5), %s381_s29, 48, %s383_s28, [#allocation14]  }
  0x21   : > { %4445 = dma.done.wait (%p4147_p2), [#allocation3], 9216  }
  0x22   : > { %4447 = vsyncadd (%p4147_p2), [#allocation3], 4294958080 }
  0x23   : > { %4449 = dma.done.wait (%p4147_p2), [#allocation5], 55344  }
  0x24   : > { %4451 = vsyncadd (%p4147_p2), [#allocation5], 4294911952 }
  0x25   : > { %4453 = dma.done.wait (%p4147_p2), [#allocation8], 55344  }
  0x26   : > { %4455 = vsyncadd (%p4147_p2), [#allocation8], 4294911952 }
  0x27   : > { %4457 = dma.done.wait (%p4147_p2), [#allocation11], 18480  }
  0x28   : > { %4459 = vsyncadd (%p4147_p2), [#allocation11], 4294948816 }
  0x29   : > { %4461 = dma.done.wait (%p4147_p2), [#allocation14], 48  }
  0x2a   : > { %4463 = vsyncadd (%p4147_p2), [#allocation14], 4294967248  ;;  %p490_p6 = scmp.lt.s32.totalorder %s4543_s17, 1  ;;  %v509_v0 = vlaneseq  ;;  %v600_v6 = vld [vmem:[#allocation2 + $0x178] sm:$0xff]  ;;  %v597_v8 = vld [vmem:[#allocation2 + $0x160] sm:$0xff]  ;;  %v4478_v9 = vmov 0.0  }
  0x2b   : > { %662 = vmatpush.msra.mxu3 %v600_v6  ;;  %vm522_vm1 = vcmask 130048   ;;  %v594_v11 = vld [vmem:[#allocation2 + $0x148] sm:$0xff]  ;;  %v591_v13 = vld [vmem:[#allocation2 + $0x130] sm:$0xff]  ;;  %v588_v14 = vld [vmem:[#allocation2 + $0x118] sm:$0xff]  ;;  %vm601_vm3 = vcmask 523264  }
  0x2c   : > { %s5155_s17 = smov (!%p490_p6, %s4543_s17), 1  ;;  %v510_v1 = vshrl.u32 %v509_v0, 7  ;;  %v4621_v2 = vand.u32 127, %v509_v0  ;;  %v585_v15 = vld [vmem:[#allocation2 + $0x100] sm:$0xff]  ;;  %v599_v16 = vld [vmem:[#allocation2 + $0x170] sm:$0xff]  ;;  %v596_v17 = vld [vmem:[#allocation2 + $0x158] sm:$0xff] }
  0x2d   : > { %s4623_s18 = sshll.u32 %s5155_s17, 4  ;;  %663 = vmatpush.msra.mxu3 %v597_v8  ;;  %639 = vmatpush.msra.mxu2 %v599_v16  ;;  %v582_v19 = vld [vmem:[#allocation2 + $0xe8] sm:$0xff]  ;;  %v593_v20 = vld [vmem:[#allocation2 + $0x140] sm:$0xff]  ;;  %v579_v22 = vld [vmem:[#allocation2 + $0xd0] sm:$0xff] }
  0x2e   : > { %v514_v3 = vadd.s32 4294967295, %v510_v1  ;;  %s494_s23 = scalar_lea.vmem %s5139_s0, %s4623_s18  ;;  %v4629_v4 = vadd.s32 8, %v510_v1  ;;  %v598_v21 = vld [vmem:[#allocation2 + $0x168] sm:$0xff]  ;;  %v595_v24 = vld [vmem:[#allocation2 + $0x150] sm:$0xff]  ;;  %v592_v26 = vld [vmem:[#allocation2 + $0x138] sm:$0xff]  ;;  %v752_v32 = vadd.s32 1, %v510_v1  ;;  %s4998_s26 = scalar_lea.vmem %s5140_s1, %s4623_s18 }
  0x2f   : > { %v4632_v5 = vld [vmem:[%s494_s23 + $0x8] sm:$0xff]  ;;  %v4634_v7 = vld [vmem:[%s494_s23] sm:$0xff]  ;;  %664 = vmatpush.msra.mxu3 %v594_v11  ;;  %640 = vmatpush.msra.mxu2 %v596_v17  ;;  %v587_v25 = vld [vmem:[#allocation2 + $0x110] sm:$0xff]  ;;  %s504_s14 = scalar_lea.vmem %s5149_s10, %s4623_s18 }
  0x30   : > { %vm516_vm0 = vcmp.eq.s32.totalorder %v4621_v2, %v514_v3  ;;  %543 = vmatpush.msra.mxu0 %v4632_v5  ;;  %v515_v12 = vadd.s32 4294967295, %v4629_v4  ;;  %v590_v23 = vld [vmem:[#allocation2 + $0x128] sm:$0xff]  ;;  %v584_v27 = vld [vmem:[#allocation2 + $0xf8] sm:$0xff]  ;;  %v589_v28 = vld [vmem:[#allocation2 + $0x120] sm:$0xff]  ;;  %vm754_vm4 = vcmp.eq.s32.totalorder %v4621_v2, %v752_v32  ;;  %v753_v39 = vadd.s32 1, %v4629_v4 }
  0x31   : > { %v4638_v10 = vsel %vm516_vm0, 1.0, %v4478_v9  ;;  %665 = vmatpush.msra.mxu3 %v591_v13  ;;  %641 = vmatpush.msra.mxu2 %v593_v20  ;;  %v581_v29 = vld [vmem:[#allocation2 + $0xe0] sm:$0xff]  ;;  %v586_v30 = vld [vmem:[#allocation2 + $0x108] sm:$0xff]  ;;  %v575_v33 = vld [vmem:[#allocation2 + $0xb8] sm:$0xff]  ;;  %v4660_v38 = vsel %vm754_vm4, 1.0, %v4478_v9 }
  0x32   : > { %544 = vmatpush.msra.mxu0 %v4634_v7  ;;  %vm517_vm2 = vcmp.eq.s32.totalorder %v4621_v2, %v515_v12  ;;  %v578_v31 = vld [vmem:[#allocation2 + $0xc8] sm:$0xff]  ;;  %v583_v34 = vld [vmem:[#allocation2 + $0xf0] sm:$0xff]  ;;  %v572_v35 = vld [vmem:[#allocation2 + $0xa0] sm:$0xff]  ;;  %vm755_vm5 = vcmp.eq.s32.totalorder %v4621_v2, %v753_v39 }
  0x33   : > { %4029 = vmatmul.msk.f32.vlgmr.msra.gmra.mxu0 %vm522_vm1, %v4638_v10  ;;  %666 = vmatpush.msra.mxu3 %v588_v14  ;;  %v4646_v18 = vsel %vm517_vm2, 1.0, %v4478_v9  ;;  %v569_v36 = vld [vmem:[#allocation2 + $0x88] sm:$0xff]  ;;  %v566_v37 = vld [vmem:[#allocation2 + $0x70] sm:$0xff]  ;;  %v563_v40 = vld [vmem:[#allocation2 + $0x58] sm:$0xff]  ;;  %v4669_v43 = vsel %vm755_vm5, 1.0, %v4478_v9 }
  0x34   : > { %616 = vmatpush.msrb.mxu0 %v598_v21  ;;  %642 = vmatpush.msra.mxu2 %v590_v23  ;;  %v560_v41 = vld [vmem:[#allocation2 + $0x40] sm:$0xff]  ;;  %v557_v42 = vld [vmem:[#allocation2 + $0x28] sm:$0xff]  ;;  %v580_v44 = vld [vmem:[#allocation2 + $0xd8] sm:$0xff] }
  0x35   : > { %667 = vmatpush.msra.mxu3 %v585_v15  ;;  %v574_v45 = vld [vmem:[#allocation2 + $0xb0] sm:$0xff]  ;;  %v577_v47 = vld [vmem:[#allocation2 + $0xc0] sm:$0xff]  ;;  %v571_v48 = vld [vmem:[#allocation2 + $0x98] sm:$0xff] }
  0x36   : > { %617 = vmatpush.msrb.mxu0 %v595_v24  ;;  %643 = vmatpush.msra.mxu2 %v587_v25  ;;  %v554_v46 = vld [vmem:[#allocation2 + $0x10] sm:$0xff]  ;;  %v573_v49 = vld [vmem:[#allocation2 + $0xa8] sm:$0xff]  ;;  %v568_v50 = vld [vmem:[#allocation2 + $0x80] sm:$0xff] }
  0x37   : > { %668 = vmatpush.msra.mxu3 %v582_v19  ;;  %714 = vmatpush.msra.mxu1 %v574_v45  ;;  %v570_v51 = vld [vmem:[#allocation2 + $0x90] sm:$0xff]  ;;  %v565_v52 = vld [vmem:[#allocation2 + $0x68] sm:$0xff]  ;;  %v567_v53 = vld [vmem:[#allocation2 + $0x78] sm:$0xff] }
  0x38   : > { %618 = vmatpush.msrb.mxu0 %v592_v26  ;;  %644 = vmatpush.msra.mxu2 %v584_v27  ;;  %v562_v54 = vld [vmem:[#allocation2 + $0x50] sm:$0xff]  ;;  %v564_v55 = vld [vmem:[#allocation2 + $0x60] sm:$0xff]  ;;  %v559_v56 = vld [vmem:[#allocation2 + $0x38] sm:$0xff] }
  0x39   : > { %669 = vmatpush.msra.mxu3 %v579_v22  ;;  %715 = vmatpush.msra.mxu1 %v571_v48  ;;  %v561_v57 = vld [vmem:[#allocation2 + $0x48] sm:$0xff]  ;;  %v556_v58 = vld [vmem:[#allocation2 + $0x20] sm:$0xff]  ;;  %v558_v59 = vld [vmem:[#allocation2 + $0x30] sm:$0xff] }
  0x3a   : > { %4035 = vmatmul.msk.f32.vlgmr.msra.gmra.mxu3 %vm601_vm3, %v4634_v7  ;;  %619 = vmatpush.msrb.mxu0 %v589_v28  ;;  %v553_v60 = vld [vmem:[#allocation2 + $0x8] sm:$0xff]  ;;  %v555_v61 = vld [vmem:[#allocation2 + $0x18] sm:$0xff]  ;;  %v552_v62 = vld [vmem:[#allocation2] sm:$0xff] }
  0x3b   : > { %4030 = vmatmul.msk.f32.gmra.mxu0 %vm522_vm1, %v4646_v18  ;;  %780 = vmatpush.msrb.mxu3 %v4632_v5  ;;  %v811_v63 = vld [vmem:[#allocation2 + $0x228] sm:$0xff]  ;;  %v812_v0 = vld [vmem:[#allocation2 + $0x230] sm:$0xff]  ;;  %v813_v1 = vld [vmem:[#allocation2 + $0x238] sm:$0xff] }
  0x3c   : > { %645 = vmatpush.msra.mxu2 %v581_v29  ;;  %620 = vmatpush.msrb.mxu0 %v586_v30  ;;  %v808_v2 = vld [vmem:[#allocation2 + $0x210] sm:$0xff]  ;;  %v809_v3 = vld [vmem:[#allocation2 + $0x218] sm:$0xff]  ;;  %v810_v4 = vld [vmem:[#allocation2 + $0x220] sm:$0xff] }
  0x3d   : > { %781 = vmatpush.msrb.mxu3 %v4634_v7  ;;  %716 = vmatpush.msra.mxu1 %v568_v50  ;;  %v806_v6 = vld [vmem:[#allocation2 + $0x200] sm:$0xff]  ;;  %v803_v9 = vld [vmem:[#allocation2 + $0x1e8] sm:$0xff]  ;;  %v804_v11 = vld [vmem:[#allocation2 + $0x1f0] sm:$0xff] }
  0x3e   : > { %646 = vmatpush.msra.mxu2 %v578_v31  ;;  %621 = vmatpush.msrb.mxu0 %v583_v34  ;;  %v802_v8 = vld [vmem:[#allocation2 + $0x1e0] sm:$0xff]  ;;  %v799_v12 = vld [vmem:[#allocation2 + $0x1c8] sm:$0xff]  ;;  %v800_v13 = vld [vmem:[#allocation2 + $0x1d0] sm:$0xff] }
  0x3f   : > { %4033 = vmatmul.msk.f32.vlgmr.msra.gmra.mxu2 %vm601_vm3, %v4634_v7  ;;  %717 = vmatpush.msra.mxu1 %v565_v52  ;;  %v801_v14 = vld [vmem:[#allocation2 + $0x1d8] sm:$0xff]  ;;  %v796_v15 = vld [vmem:[#allocation2 + $0x1b0] sm:$0xff]  ;;  %v798_v17 = vld [vmem:[#allocation2 + $0x1c0] sm:$0xff] }
  0x40   : > { %737 = vmatpush.msrb.mxu2 %v575_v33  ;;  %622 = vmatpush.msrb.mxu0 %v580_v44  ;;  %v797_v16 = vld [vmem:[#allocation2 + $0x1b8] sm:$0xff]  ;;  %v794_v20 = vld [vmem:[#allocation2 + $0x1a0] sm:$0xff]  ;;  %v795_v21 = vld [vmem:[#allocation2 + $0x1a8] sm:$0xff] }
  0x41   : > { %718 = vmatpush.msra.mxu1 %v562_v54  ;;  %v793_v19 = vld [vmem:[#allocation2 + $0x198] sm:$0xff]  ;;  %v790_v23 = vld [vmem:[#allocation2 + $0x180] sm:$0xff]  ;;  %v791_v24 = vld [vmem:[#allocation2 + $0x188] sm:$0xff] }
  0x42   : > { %4036 = vmatmul.msk.f32.gmra.mxu3 %vm601_vm3, %v4632_v5  ;;  %738 = vmatpush.msrb.mxu2 %v572_v35  ;;  %v792_v25 = vld [vmem:[#allocation2 + $0x190] sm:$0xff]  ;;  %v1162_v29 = vld [vmem:[#allocation6 + $0x5b8] sm:$0xff]  ;;  %v1159_v30 = vld [vmem:[#allocation6 + $0x5a0] sm:$0xff] }
  0x43   : > { %623 = vmatpush.msrb.mxu0 %v577_v47  ;;  %719 = vmatpush.msra.mxu1 %v559_v56  ;;  %v1168_v27 = vld [vmem:[#allocation6 + $0x5e8] sm:$0xff]  ;;  %v1165_v28 = vld [vmem:[#allocation6 + $0x5d0] sm:$0xff]  ;;  %v1150_v34 = vld [vmem:[#allocation6 + $0x558] sm:$0xff] }
  0x44   : > { %739 = vmatpush.msrb.mxu2 %v569_v36  ;;  %4031 = vmatmul.msk.f32.vlgmr.msrb.gmra.mxu0 %vm601_vm3, %v4634_v7  ;;  %v807_v7 = vld [vmem:[#allocation2 + $0x208] sm:$0xff]  ;;  %v1153_v33 = vld [vmem:[#allocation6 + $0x570] sm:$0xff]  ;;  %v1126_v47 = vld [vmem:[#allocation6 + $0x498] sm:$0xff] }
  0x45   : > { %691 = vmatpush.msra.mxu0 %v573_v49  ;;  %720 = vmatpush.msra.mxu1 %v556_v58  ;;  %v1156_v32 = vld [vmem:[#allocation6 + $0x588] sm:$0xff]  ;;  %v1147_v35 = vld [vmem:[#allocation6 + $0x540] sm:$0xff]  ;;  %v1141_v39 = vld [vmem:[#allocation6 + $0x510] sm:$0xff] }
  0x46   : > { %740 = vmatpush.msrb.mxu2 %v566_v37  ;;  %v1144_v37 = vld [vmem:[#allocation6 + $0x528] sm:$0xff]  ;;  %v1123_v48 = vld [vmem:[#allocation6 + $0x480] sm:$0xff]  ;;  %v1217_v49 = vld [vmem:[#allocation6 + $0x770] sm:$0xff] }
  0x47   : > { %4034 = vmatmul.msk.f32.gmra.mxu2 %vm601_vm3, %v4632_v5  ;;  %692 = vmatpush.msra.mxu0 %v570_v51  ;;  %v1132_v45 = vld [vmem:[#allocation6 + $0x4c8] sm:$0xff]  ;;  %v1214_v50 = vld [vmem:[#allocation6 + $0x758] sm:$0xff]  ;;  %v1211_v51 = vld [vmem:[#allocation6 + $0x740] sm:$0xff] }
  0x48   : > { %741 = vmatpush.msrb.mxu2 %v563_v40  ;;  %721 = vmatpush.msra.mxu1 %v553_v60  ;;  %v1138_v40 = vld [vmem:[#allocation6 + $0x4f8] sm:$0xff]  ;;  %v1208_v52 = vld [vmem:[#allocation6 + $0x728] sm:$0xff]  ;;  %v1187_v60 = vld [vmem:[#allocation6 + $0x680] sm:$0xff] }
  0x49   : > { %693 = vmatpush.msra.mxu0 %v567_v53  ;;  %v1205_v53 = vld [vmem:[#allocation6 + $0x710] sm:$0xff]  ;;  %v1202_v54 = vld [vmem:[#allocation6 + $0x6f8] sm:$0xff]  ;;  %v1196_v56 = vld [vmem:[#allocation6 + $0x6c8] sm:$0xff] }
  0x4a   : > { %4045 = vmatmul.msk.f32.vlgmr.msrb.gmra.mxu3 %vm522_vm1, %v4660_v38  ;;  %742 = vmatpush.msrb.mxu2 %v560_v41  ;;  %v1190_v58 = vld [vmem:[#allocation6 + $0x698] sm:$0xff] }
  0x4b   : > { %694 = vmatpush.msra.mxu0 %v564_v55  ;;  %851 = vmatpush.msrb.mxu1 %v812_v0  ;;  %v1199_v55 = vld [vmem:[#allocation6 + $0x6e0] sm:$0xff]  ;;  %v1178_v0 = vld [vmem:[#allocation6 + $0x638] sm:$0xff] }
  0x4c   : > { %743 = vmatpush.msrb.mxu2 %v557_v42  ;;  %4032 = vmatmul.msk.f32.gmra.mxu0 %vm601_vm3, %v4632_v5  ;;  %v805_v5 = vld [vmem:[#allocation2 + $0x1f8] sm:$0xff]  ;;  %v1135_v42 = vld [vmem:[#allocation6 + $0x4e0] sm:$0xff] }
  0x4d   : > { %695 = vmatpush.msra.mxu0 %v561_v57  ;;  %852 = vmatpush.msrb.mxu1 %v809_v3  ;;  %v1193_v57 = vld [vmem:[#allocation6 + $0x6b0] sm:$0xff]  ;;  %v1172_v3 = vld [vmem:[#allocation6 + $0x608] sm:$0xff] }
  0x4e   : > { %744 = vmatpush.msrb.mxu2 %v554_v46  ;;  %v1129_v46 = vld [vmem:[#allocation6 + $0x4b0] sm:$0xff] }
  0x4f   : > { %696 = vmatpush.msra.mxu0 %v558_v59  ;;  %853 = vmatpush.msrb.mxu1 %v806_v6 }
  0x50   : > { %874 = vmatpush.msra.mxu2 %v813_v1 }
  0x51   : > { %697 = vmatpush.msra.mxu0 %v555_v61  ;;  %854 = vmatpush.msrb.mxu1 %v803_v9  ;;  %v1184_v61 = vld [vmem:[#allocation6 + $0x668] sm:$0xff] }
  0x52   : > { %4046 = vmatmul.msk.f32.gmra.mxu3 %vm522_vm1, %v4669_v43  ;;  %875 = vmatpush.msra.mxu2 %v810_v4 }
  0x53   : > { %698 = vmatpush.msra.mxu0 %v552_v62  ;;  %855 = vmatpush.msrb.mxu1 %v800_v13  ;;  %v1181_v62 = vld [vmem:[#allocation6 + $0x650] sm:$0xff] }
  0x54   : > { %876 = vmatpush.msra.mxu2 %v807_v7 }
  0x55   : > { %828 = vmatpush.msrb.mxu0 %v811_v63  ;;  %856 = vmatpush.msrb.mxu1 %v797_v16 }
  0x56   : > { %877 = vmatpush.msra.mxu2 %v804_v11  ;;  %v895_v11 = vld [vmem:[#allocation4] sm:$0x7] }
  0x57   : > { %829 = vmatpush.msrb.mxu0 %v808_v2  ;;  %857 = vmatpush.msrb.mxu1 %v794_v20  ;;  %v1175_v2 = vld [vmem:[#allocation6 + $0x620] sm:$0xff]  ;;  %v1266_v20 = vld [vmem:[#allocation6 + $0x8f8] sm:$0xff] }
  0x58   : > { %878 = vmatpush.msra.mxu2 %v801_v14  ;;  %v897_v14 = vperm.slane %v895_v11, 0 }
  0x59   : > { %830 = vmatpush.msrb.mxu0 %v805_v5  ;;  %858 = vmatpush.msrb.mxu1 %v791_v24 }
  0x5a   : > { %879 = vmatpush.msra.mxu2 %v798_v17 }
  0x5b   : > { %831 = vmatpush.msrb.mxu0 %v802_v8 }
  0x5c   : > { %880 = vmatpush.msra.mxu2 %v795_v21  ;;  %v1263_v21 = vld [vmem:[#allocation6 + $0x8e0] sm:$0xff] }
  0x5d   : > { %832 = vmatpush.msrb.mxu0 %v799_v12 }
  0x5e   : > { %881 = vmatpush.msra.mxu2 %v792_v25  ;;  %v1260_v25 = vld [vmem:[#allocation6 + $0x8c8] sm:$0xff] }
  0x5f   : > { %833 = vmatpush.msrb.mxu0 %v796_v15 }
  0x61   : > { %834 = vmatpush.msrb.mxu0 %v793_v19 }
  0x63   : > { %835 = vmatpush.msrb.mxu0 %v790_v23 }
  0xb0   : > { %v546_v22 = vpop.f32.mrf.mxu0 }
  0xb1   : > { %4041 = vmatmul.msk.f32.vlgmr.msrb.gmra.mxu2 %vm601_vm3, %v546_v22  ;;  %4039 = vmatmul.msk.f32.vlgmr.msra.gmra.mxu1 %vm601_vm3, %v546_v22 }
  0xb2   : > { %4037 = vmatmul.msk.f32.vlgmr.msra.gmra.mxu0 %vm601_vm3, %v546_v22  ;;  %1267 = vmatpush.msrb.mxu2 %v1168_v27 }
  0xb4   : > { %1268 = vmatpush.msrb.mxu2 %v1165_v28 }
  0xb6   : > { %1269 = vmatpush.msrb.mxu2 %v1162_v29  ;;  %v898_v29 = vperm.slane %v895_v11, 1 }
  0xb8   : > { %v549_v26 = vpop.f32.mrf.mxu0  ;;  %1270 = vmatpush.msrb.mxu2 %v1159_v30 }
  0xb9   : > { %4042 = vmatmul.msk.f32.gmra.mxu2 %vm601_vm3, %v549_v26  ;;  %4040 = vmatmul.msk.f32.gmra.mxu1 %vm601_vm3, %v549_v26 }
  0xba   : > { %4038 = vmatmul.msk.f32.gmra.mxu0 %vm601_vm3, %v549_v26  ;;  %1271 = vmatpush.msrb.mxu2 %v1156_v32 }
  0xbc   : > { %1272 = vmatpush.msrb.mxu2 %v1153_v33  ;;  %v1257_v33 = vld [vmem:[#allocation6 + $0x8b0] sm:$0xff] }
  0xbd   : > { %v4683_v31 = vpop.f32.mrf.mxu3 }
  0xbe   : > { %1273 = vmatpush.msrb.mxu2 %v1150_v34 }
  0xc0   : > { %1274 = vmatpush.msrb.mxu2 %v1147_v35 }
  0xc1   : > { %v625_v59 = vpop.f32.mrf.mxu0 }
  0xc2   : > { %1275 = vmatpush.msrb.mxu2 %v1144_v37  ;;  %v648_v63 = vpop.f32.mrf.mxu2 }
  0xc4   : > { %1276 = vmatpush.msrb.mxu2 %v1141_v39  ;;  %v1254_v39 = vld [vmem:[#allocation6 + $0x898] sm:$0xff] }
  0xc5   : > { %v4685_v36 = vpop.f32.mrf.mxu3 }
  0xc6   : > { %1277 = vmatpush.msrb.mxu2 %v1138_v40 }
  0xc8   : > { %1278 = vmatpush.msrb.mxu2 %v1135_v42  ;;  %v1216_v42 = vld [vmem:[#allocation6 + $0x768] sm:$0xff] }
  0xc9   : > { %v628_v1 = vpop.f32.mrf.mxu0 }
  0xca   : > { %1279 = vmatpush.msrb.mxu2 %v1132_v45  ;;  %v651_v4 = vpop.f32.mrf.mxu2 }
  0xcc   : > { %1280 = vmatpush.msrb.mxu2 %v1129_v46  ;;  %v1264_v46 = vld [vmem:[#allocation6 + $0x8e8] sm:$0xff] }
  0xcd   : > { %v783_v41 = vpop.f32.mrf.mxu3 }
  0xce   : > { %4047 = vmatmul.msk.f32.vlgmr.msrb.gmra.mxu0 %vm601_vm3, %v783_v41  ;;  %4049 = vmatmul.msk.f32.vlgmr.msrb.gmra.mxu1 %vm601_vm3, %v783_v41 }
  0xcf   : > { %4051 = vmatmul.msk.f32.vlgmr.msra.gmra.mxu2 %vm601_vm3, %v783_v41 }
  0xd0   : > { %1281 = vmatpush.msrb.mxu2 %v1126_v47  ;;  %v1251_v47 = vld [vmem:[#allocation6 + $0x880] sm:$0xff] }
  0xd2   : > { %1282 = vmatpush.msrb.mxu2 %v1123_v48  ;;  %v899_v48 = vperm.slane %v895_v11, 2  ;;  %v1243_v11 = vld [vmem:[#allocation6 + $0x840] sm:$0xff] }
  0xd4   : > { %1359 = vmatpush.msra.mxu2 %v1217_v49 }
  0xd5   : > { %v786_v44 = vpop.f32.mrf.mxu3 }
  0xd6   : > { %4048 = vmatmul.msk.f32.gmra.mxu0 %vm601_vm3, %v786_v44  ;;  %4050 = vmatmul.msk.f32.gmra.mxu1 %vm601_vm3, %v786_v44 }
  0xd7   : > { %4052 = vmatmul.msk.f32.gmra.mxu2 %vm601_vm3, %v786_v44 }
  0xd8   : > { %1360 = vmatpush.msra.mxu2 %v1214_v50 }
  0xda   : > { %1361 = vmatpush.msra.mxu2 %v1211_v51  ;;  %v1248_v51 = vld [vmem:[#allocation6 + $0x868] sm:$0xff] }
  0xdc   : > { %1362 = vmatpush.msra.mxu2 %v1208_v52 }
  0xde   : > { %1363 = vmatpush.msra.mxu2 %v1205_v53  ;;  %v1210_v53 = vld [vmem:[#allocation6 + $0x738] sm:$0xff] }
  0xe0   : > { %1364 = vmatpush.msra.mxu2 %v1202_v54  ;;  %v1258_v54 = vld [vmem:[#allocation6 + $0x8b8] sm:$0xff] }
  0xe2   : > { %1365 = vmatpush.msra.mxu2 %v1199_v55  ;;  %v1245_v55 = vld [vmem:[#allocation6 + $0x850] sm:$0xff] }
  0xe4   : > { %1366 = vmatpush.msra.mxu2 %v1196_v56 }
  0xe6   : > { %1367 = vmatpush.msra.mxu2 %v1193_v57  ;;  %v1207_v57 = vld [vmem:[#allocation6 + $0x720] sm:$0xff] }
  0xe8   : > { %1368 = vmatpush.msra.mxu2 %v1190_v58  ;;  %v1255_v58 = vld [vmem:[#allocation6 + $0x8a0] sm:$0xff] }
  0xea   : > { %1369 = vmatpush.msra.mxu2 %v1187_v60  ;;  %v1242_v60 = vld [vmem:[#allocation6 + $0x838] sm:$0xff] }
  0xec   : > { %1370 = vmatpush.msra.mxu2 %v1184_v61  ;;  %v1204_v61 = vld [vmem:[#allocation6 + $0x708] sm:$0xff] }
  0xee   : > { %1371 = vmatpush.msra.mxu2 %v1181_v62  ;;  %v1252_v62 = vld [vmem:[#allocation6 + $0x888] sm:$0xff] }
  0xf0   : > { %1372 = vmatpush.msra.mxu2 %v1178_v0  ;;  %v1239_v0 = vld [vmem:[#allocation6 + $0x820] sm:$0xff] }
  0xf2   : > { %1373 = vmatpush.msra.mxu2 %v1175_v2  ;;  %v1249_v2 = vld [vmem:[#allocation6 + $0x870] sm:$0xff] }
  0xf4   : > { %1374 = vmatpush.msra.mxu2 %v1172_v3  ;;  %v1163_v3 = vld [vmem:[#allocation6 + $0x5c0] sm:$0xff] }
 0x12e   : > { %v723_v6 = vpop.f32.mrf.mxu1 }
 0x12f   : > { %v700_v5 = vpop.f32.mrf.mxu0  ;;  %v724_v26 = vadd.f32 %v723_v6, %v648_v63  ;;  %v1166_v63 = vld [vmem:[#allocation6 + $0x5d8] sm:$0xff] }
 0x130   : > { %v701_v13 = vadd.f32 %v700_v5, %v625_v59  ;;  %v1169_v59 = vld [vmem:[#allocation6 + $0x5f0] sm:$0xff]  ;;  %v1198_v5 = vld [vmem:[#allocation6 + $0x6d8] sm:$0xff] }
 0x131   : > { %v1246_v6 = vld [vmem:[#allocation6 + $0x858] sm:$0xff] }
 0x134   : > { %v746_v7 = vpop.f32.mrf.mxu2 }
 0x135   : > { %v747_v44 = vadd.f32 %v746_v7, %v4683_v31  ;;  %v1261_v31 = vld [vmem:[#allocation6 + $0x8d0] sm:$0xff]  ;;  %v1160_v7 = vld [vmem:[#allocation6 + $0x5a8] sm:$0xff] }
 0x136   : > { %v726_v9 = vpop.f32.mrf.mxu1 }
 0x137   : > { %v703_v8 = vpop.f32.mrf.mxu0  ;;  %v727_v22 = vadd.f32 %v726_v9, %v651_v4  ;;  %v1236_v4 = vld [vmem:[#allocation6 + $0x808] sm:$0xff]  ;;  %v1195_v9 = vld [vmem:[#allocation6 + $0x6c0] sm:$0xff] }
 0x138   : > { %v704_v23 = vadd.f32 %v703_v8, %v628_v1  ;;  %v1201_v1 = vld [vmem:[#allocation6 + $0x6f0] sm:$0xff] }
 0x139   : > { %v1233_v8 = vld [vmem:[#allocation6 + $0x7f0] sm:$0xff] }
 0x13c   : > { %v749_v12 = vpop.f32.mrf.mxu2 }
 0x13d   : > { %v750_v40 = vadd.f32 %v749_v12, %v4685_v36  ;;  %v1213_v36 = vld [vmem:[#allocation6 + $0x750] sm:$0xff] }
 0x13e   : > { %v1157_v12 = vld [vmem:[#allocation6 + $0x590] sm:$0xff] }
 0x14b   : > { %v837_v15 = vpop.f32.mrf.mxu0  ;;  %v860_v16 = vpop.f32.mrf.mxu1 }
 0x14c   : > { %v889_v17 = vadd.f32 %v837_v15, %v701_v13  ;;  %v890_v34 = vadd.f32 %v860_v16, %v724_v26  ;;  %v1230_v13 = vld [vmem:[#allocation6 + $0x7d8] sm:$0xff]  ;;  %v1240_v15 = vld [vmem:[#allocation6 + $0x828] sm:$0xff] }
 0x14d   : > { %v1154_v16 = vld [vmem:[#allocation6 + $0x578] sm:$0xff]  ;;  %v1148_v26 = vld [vmem:[#allocation6 + $0x548] sm:$0xff] }
 0x14e   : > { %v4693_v19 = vadd.f32 %v897_v14, %v889_v17  ;;  %v4703_v41 = vadd.f32 %v898_v29, %v890_v34  ;;  %v1227_v17 = vld [vmem:[#allocation6 + $0x7c0] sm:$0xff]  ;;  %v1142_v34 = vld [vmem:[#allocation6 + $0x518] sm:$0xff] }
 0x150   : > { %1283 = vmatmul.f32.vlgmr.msrb.gmra.mxu2 %v4693_v19 }
 0x151   : > { %1451 = vmatpush.msrb.mxu2 %v1266_v20  ;;  %v1189_v20 = vld [vmem:[#allocation6 + $0x690] sm:$0xff] }
 0x152   : > { %v883_v24 = vpop.f32.mrf.mxu2 }
 0x153   : > { %v840_v27 = vpop.f32.mrf.mxu0  ;;  %v863_v28 = vpop.f32.mrf.mxu1  ;;  %1452 = vmatpush.msrb.mxu2 %v1263_v21  ;;  %v891_v50 = vadd.f32 %v883_v24, %v747_v44  ;;  %v1237_v21 = vld [vmem:[#allocation6 + $0x810] sm:$0xff]  ;;  %v1186_v24 = vld [vmem:[#allocation6 + $0x678] sm:$0xff] }
 0x154   : > { %v892_v30 = vadd.f32 %v840_v27, %v704_v23  ;;  %v893_v32 = vadd.f32 %v863_v28, %v727_v22  ;;  %v1151_v22 = vld [vmem:[#allocation6 + $0x560] sm:$0xff]  ;;  %v1224_v23 = vld [vmem:[#allocation6 + $0x7a8] sm:$0xff]  ;;  %v1221_v27 = vld [vmem:[#allocation6 + $0x790] sm:$0xff] }
 0x155   : > { %1453 = vmatpush.msrb.mxu2 %v1260_v25  ;;  %v4715_v56 = vadd.f32 %v899_v48, %v891_v50  ;;  %v1234_v25 = vld [vmem:[#allocation6 + $0x7f8] sm:$0xff]  ;;  %v1183_v28 = vld [vmem:[#allocation6 + $0x660] sm:$0xff] }
 0x156   : > { %v4696_v35 = vadd.f32 %v897_v14, %v892_v30  ;;  %v4698_v37 = vadd.f32 %v898_v29, %v893_v32  ;;  %v1192_v14 = vld [vmem:[#allocation6 + $0x6a8] sm:$0xff]  ;;  %v1231_v29 = vld [vmem:[#allocation6 + $0x7e0] sm:$0xff]  ;;  %v1145_v30 = vld [vmem:[#allocation6 + $0x530] sm:$0xff] }
 0x157   : > { %1454 = vmatpush.msrb.mxu2 %v1257_v33  ;;  %v1180_v32 = vld [vmem:[#allocation6 + $0x648] sm:$0xff]  ;;  %v1174_v44 = vld [vmem:[#allocation6 + $0x618] sm:$0xff] }
 0x158   : > { %923 = vmatpush.msra.mxu3 %v4696_v35  ;;  %946 = vmatpush.msra.mxu0 %v4698_v37  ;;  %v1228_v33 = vld [vmem:[#allocation6 + $0x7c8] sm:$0xff]  ;;  %v1170_v50 = vld [vmem:[#allocation6 + $0x5f8] sm:$0xff] }
 0x159   : > { %1286 = vmatmul.f32.gmra.mxu2 %v4696_v35 }
 0x15a   : > { %v886_v45 = vpop.f32.mrf.mxu2  ;;  %1455 = vmatpush.msrb.mxu2 %v1254_v39  ;;  %924 = vmatpush.msra.mxu3 %v4693_v19  ;;  %v1177_v39 = vld [vmem:[#allocation6 + $0x630] sm:$0xff] }
 0x15b   : > { %v894_v49 = vadd.f32 %v886_v45, %v750_v40  ;;  %947 = vmatpush.msra.mxu0 %v4703_v41  ;;  %4053 = vmatmul.msk.f32.vlgmr.msra.gmra.mxu3 %vm522_vm1, %v4638_v10  ;;  %v1225_v40 = vld [vmem:[#allocation6 + $0x7b0] sm:$0xff]  ;;  %v1222_v45 = vld [vmem:[#allocation6 + $0x798] sm:$0xff] }
 0x15c   : > { %4055 = vmatmul.msk.f32.vlgmr.msra.gmra.mxu0 %vm522_vm1, %v4638_v10  ;;  %1290 = vmatpush.msrb.mxu3 %v1216_v42  ;;  %v1139_v42 = vld [vmem:[#allocation6 + $0x500] sm:$0xff] }
 0x15d   : > { %v4713_v52 = vadd.f32 %v899_v48, %v894_v49  ;;  %1313 = vmatpush.msrb.mxu0 %v1264_v46  ;;  %1456 = vmatpush.msrb.mxu2 %v1251_v47  ;;  %v1136_v46 = vld [vmem:[#allocation6 + $0x4e8] sm:$0xff]  ;;  %v1171_v47 = vld [vmem:[#allocation6 + $0x600] sm:$0xff]  ;;  %v1133_v49 = vld [vmem:[#allocation6 + $0x4d0] sm:$0xff] }
 0x15e   : > { %1291 = vmatpush.msrb.mxu3 %v1213_v36  ;;  %v1219_v48 = vld [vmem:[#allocation6 + $0x780] sm:$0xff]  ;;  %v1265_v36 = vld [vmem:[#allocation6 + $0x8f0] sm:$0xff] }
 0x15f   : > { %1314 = vmatpush.msrb.mxu0 %v1261_v31  ;;  %1457 = vmatpush.msrb.mxu2 %v1248_v51  ;;  %v1130_v31 = vld [vmem:[#allocation6 + $0x4b8] sm:$0xff] }
 0x160   : > { %969 = vmatpush.msra.mxu1 %v4713_v52  ;;  %1292 = vmatpush.msrb.mxu3 %v1210_v53  ;;  %v1262_v51 = vld [vmem:[#allocation6 + $0x8d8] sm:$0xff]  ;;  %v1167_v53 = vld [vmem:[#allocation6 + $0x5e0] sm:$0xff] }
 0x161   : > { %1315 = vmatpush.msrb.mxu0 %v1258_v54  ;;  %1458 = vmatpush.msrb.mxu2 %v1245_v55  ;;  %v1127_v54 = vld [vmem:[#allocation6 + $0x4a0] sm:$0xff] }
 0x162   : > { %970 = vmatpush.msra.mxu1 %v4715_v56  ;;  %1375 = vmatmul.f32.vlgmr.msra.gmra.mxu2 %v4703_v41  ;;  %v1259_v55 = vld [vmem:[#allocation6 + $0x8c0] sm:$0xff] }
 0x163   : > { %4057 = vmatmul.msk.f32.vlgmr.msra.gmra.mxu1 %vm522_vm1, %v4638_v10  ;;  %1293 = vmatpush.msrb.mxu3 %v1207_v57  ;;  %v1164_v57 = vld [vmem:[#allocation6 + $0x5c8] sm:$0xff] }
 0x164   : > { %1316 = vmatpush.msrb.mxu0 %v1255_v58  ;;  %1336 = vmatpush.msrb.mxu1 %v1169_v59  ;;  %v1124_v58 = vld [vmem:[#allocation6 + $0x488] sm:$0xff] }
 0x165   : > { %1459 = vmatpush.msrb.mxu2 %v1242_v60  ;;  %4054 = vmatmul.msk.f32.gmra.mxu3 %vm522_vm1, %v4646_v18  ;;  %v1256_v59 = vld [vmem:[#allocation6 + $0x8a8] sm:$0xff]  ;;  %v1161_v60 = vld [vmem:[#allocation6 + $0x5b0] sm:$0xff] }
 0x166   : > { %4056 = vmatmul.msk.f32.gmra.mxu0 %vm522_vm1, %v4646_v18  ;;  %1294 = vmatpush.msrb.mxu3 %v1204_v61  ;;  %v1218_v61 = vld [vmem:[#allocation6 + $0x778] sm:$0xff] }
 0x167   : > { %1317 = vmatpush.msrb.mxu0 %v1252_v62  ;;  %1337 = vmatpush.msrb.mxu1 %v1166_v63  ;;  %v1253_v62 = vld [vmem:[#allocation6 + $0x890] sm:$0xff]  ;;  %v1158_v63 = vld [vmem:[#allocation6 + $0x598] sm:$0xff] }
 0x168   : > { %1460 = vmatpush.msrb.mxu2 %v1239_v0  ;;  %1295 = vmatpush.msrb.mxu3 %v1201_v1  ;;  %v1215_v0 = vld [vmem:[#allocation6 + $0x760] sm:$0xff]  ;;  %v1250_v1 = vld [vmem:[#allocation6 + $0x878] sm:$0xff] }
 0x169   : > { %1318 = vmatpush.msrb.mxu0 %v1249_v2  ;;  %1338 = vmatpush.msrb.mxu1 %v1163_v3  ;;  %v1155_v2 = vld [vmem:[#allocation6 + $0x580] sm:$0xff]  ;;  %v1212_v3 = vld [vmem:[#allocation6 + $0x748] sm:$0xff] }
 0x16a   : > { %1461 = vmatpush.msrb.mxu2 %v1236_v4  ;;  %1296 = vmatpush.msrb.mxu3 %v1198_v5  ;;  %v1247_v4 = vld [vmem:[#allocation6 + $0x860] sm:$0xff]  ;;  %v1152_v5 = vld [vmem:[#allocation6 + $0x568] sm:$0xff] }
 0x16b   : > { %1319 = vmatpush.msrb.mxu0 %v1246_v6  ;;  %1339 = vmatpush.msrb.mxu1 %v1160_v7  ;;  %v1209_v6 = vld [vmem:[#allocation6 + $0x730] sm:$0xff]  ;;  %v1244_v7 = vld [vmem:[#allocation6 + $0x848] sm:$0xff] }
 0x16c   : > { %1462 = vmatpush.msrb.mxu2 %v1233_v8  ;;  %4058 = vmatmul.msk.f32.gmra.mxu1 %vm522_vm1, %v4646_v18  ;;  %v1149_v8 = vld [vmem:[#allocation6 + $0x550] sm:$0xff] }
 0x16d   : > { %1378 = vmatmul.f32.gmra.mxu2 %v4698_v37  ;;  %1297 = vmatpush.msrb.mxu3 %v1195_v9  ;;  %v1206_v9 = vld [vmem:[#allocation6 + $0x718] sm:$0xff] }
 0x16e   : > { %1320 = vmatpush.msrb.mxu0 %v1243_v11  ;;  %1340 = vmatpush.msrb.mxu1 %v1157_v12  ;;  %v1241_v11 = vld [vmem:[#allocation6 + $0x830] sm:$0xff]  ;;  %v1146_v12 = vld [vmem:[#allocation6 + $0x538] sm:$0xff] }
 0x16f   : > { %1463 = vmatpush.msrb.mxu2 %v1230_v13  ;;  %1298 = vmatpush.msrb.mxu3 %v1192_v14  ;;  %v1203_v13 = vld [vmem:[#allocation6 + $0x700] sm:$0xff]  ;;  %v1238_v14 = vld [vmem:[#allocation6 + $0x818] sm:$0xff] }
 0x170   : > { %1321 = vmatpush.msrb.mxu0 %v1240_v15  ;;  %1341 = vmatpush.msrb.mxu1 %v1154_v16  ;;  %v1143_v15 = vld [vmem:[#allocation6 + $0x520] sm:$0xff]  ;;  %v1200_v16 = vld [vmem:[#allocation6 + $0x6e8] sm:$0xff] }
 0x171   : > { %1464 = vmatpush.msrb.mxu2 %v1227_v17  ;;  %1299 = vmatpush.msrb.mxu3 %v1189_v20  ;;  %v1235_v17 = vld [vmem:[#allocation6 + $0x800] sm:$0xff]  ;;  %v1140_v20 = vld [vmem:[#allocation6 + $0x508] sm:$0xff] }
 0x172   : > { %1322 = vmatpush.msrb.mxu0 %v1237_v21  ;;  %1342 = vmatpush.msrb.mxu1 %v1151_v22  ;;  %v1197_v21 = vld [vmem:[#allocation6 + $0x6d0] sm:$0xff]  ;;  %v1232_v22 = vld [vmem:[#allocation6 + $0x7e8] sm:$0xff] }
 0x173   : > { %1465 = vmatpush.msrb.mxu2 %v1224_v23  ;;  %1300 = vmatpush.msrb.mxu3 %v1186_v24  ;;  %v1137_v23 = vld [vmem:[#allocation6 + $0x4f0] sm:$0xff]  ;;  %v1194_v24 = vld [vmem:[#allocation6 + $0x6b8] sm:$0xff] }
 0x174   : > { %1323 = vmatpush.msrb.mxu0 %v1234_v25  ;;  %1343 = vmatpush.msrb.mxu1 %v1148_v26  ;;  %v1229_v25 = vld [vmem:[#allocation6 + $0x7d0] sm:$0xff]  ;;  %v1134_v26 = vld [vmem:[#allocation6 + $0x4d8] sm:$0xff] }
 0x175   : > { %1466 = vmatpush.msrb.mxu2 %v1221_v27  ;;  %1301 = vmatpush.msrb.mxu3 %v1183_v28  ;;  %v1191_v27 = vld [vmem:[#allocation6 + $0x6a0] sm:$0xff]  ;;  %v1226_v28 = vld [vmem:[#allocation6 + $0x7b8] sm:$0xff] }
 0x176   : > { %1467 = vmatmul.f32.vlgmr.msrb.gmra.mxu2 %v4715_v56  ;;  %1324 = vmatpush.msrb.mxu0 %v1231_v29  ;;  %v1024_v29 = vld [vmem:[#allocation6 + $0x170] sm:$0xff] }
 0x177   : > { %1344 = vmatpush.msrb.mxu1 %v1145_v30  ;;  %1302 = vmatpush.msrb.mxu3 %v1180_v32  ;;  %v1131_v30 = vld [vmem:[#allocation6 + $0x4c0] sm:$0xff]  ;;  %v1188_v32 = vld [vmem:[#allocation6 + $0x688] sm:$0xff] }
 0x178   : > { %1325 = vmatpush.msrb.mxu0 %v1228_v33  ;;  %1543 = vmatpush.msra.mxu2 %v1024_v29  ;;  %v1223_v33 = vld [vmem:[#allocation6 + $0x7a0] sm:$0xff]  ;;  %v993_v29 = vld [vmem:[#allocation6 + $0x78] sm:$0xff] }
 0x179   : > { %1345 = vmatpush.msrb.mxu1 %v1142_v34  ;;  %1303 = vmatpush.msrb.mxu3 %v1177_v39  ;;  %v1021_v34 = vld [vmem:[#allocation6 + $0x158] sm:$0xff]  ;;  %v1128_v39 = vld [vmem:[#allocation6 + $0x4a8] sm:$0xff] }
 0x17a   : > { %1326 = vmatpush.msrb.mxu0 %v1225_v40  ;;  %v1185_v40 = vld [vmem:[#allocation6 + $0x670] sm:$0xff]  ;;  %1544 = vmatpush.msra.mxu2 %v1021_v34  ;;  %v990_v34 = vld [vmem:[#allocation6 + $0x60] sm:$0xff] }
 0x17b   : > { %1346 = vmatpush.msrb.mxu1 %v1139_v42  ;;  %1304 = vmatpush.msrb.mxu3 %v1174_v44  ;;  %v1220_v42 = vld [vmem:[#allocation6 + $0x788] sm:$0xff]  ;;  %v1018_v44 = vld [vmem:[#allocation6 + $0x140] sm:$0xff] }
 0x17c   : > { %1327 = vmatpush.msrb.mxu0 %v1222_v45  ;;  %v1125_v45 = vld [vmem:[#allocation6 + $0x490] sm:$0xff]  ;;  %1545 = vmatpush.msra.mxu2 %v1018_v44  ;;  %v987_v44 = vld [vmem:[#allocation6 + $0x48] sm:$0xff] }
 0x17d   : > { %1347 = vmatpush.msrb.mxu1 %v1136_v46  ;;  %1305 = vmatpush.msrb.mxu3 %v1171_v47  ;;  %v1182_v46 = vld [vmem:[#allocation6 + $0x658] sm:$0xff]  ;;  %v1015_v47 = vld [vmem:[#allocation6 + $0x128] sm:$0xff] }
 0x17e   : > { %1470 = vmatmul.f32.gmra.mxu2 %v4713_v52  ;;  %1328 = vmatpush.msrb.mxu0 %v1219_v48  ;;  %v1179_v48 = vld [vmem:[#allocation6 + $0x640] sm:$0xff] }
 0x17f   : > { %1348 = vmatpush.msrb.mxu1 %v1133_v49  ;;  %1306 = vmatmul.f32.vlgmr.msrb.gmra.mxu3 %v4703_v41  ;;  %v1071_v49 = vld [vmem:[#allocation6 + $0x2e8] sm:$0xff] }
 0x180   : > { %1329 = vmatmul.f32.vlgmr.msrb.gmra.mxu0 %v4715_v56  ;;  %1382 = vmatpush.msra.mxu3 %v1265_v36  ;;  %v1023_v36 = vld [vmem:[#allocation6 + $0x168] sm:$0xff] }
 0x181   : > { %1405 = vmatpush.msra.mxu0 %v1170_v50  ;;  %1349 = vmatpush.msrb.mxu1 %v1130_v31  ;;  %v1012_v50 = vld [vmem:[#allocation6 + $0x110] sm:$0xff]  ;;  %v1176_v31 = vld [vmem:[#allocation6 + $0x628] sm:$0xff] }
 0x182   : > { %1383 = vmatpush.msra.mxu3 %v1262_v51  ;;  %1546 = vmatpush.msra.mxu2 %v1015_v47  ;;  %v1068_v51 = vld [vmem:[#allocation6 + $0x2d0] sm:$0xff]  ;;  %v1086_v47 = vld [vmem:[#allocation6 + $0x360] sm:$0xff] }
 0x183   : > { %1406 = vmatpush.msra.mxu0 %v1167_v53  ;;  %1350 = vmatpush.msrb.mxu1 %v1127_v54  ;;  %v1020_v53 = vld [vmem:[#allocation6 + $0x150] sm:$0xff]  ;;  %v1009_v54 = vld [vmem:[#allocation6 + $0xf8] sm:$0xff] }
 0x184   : > { %1384 = vmatpush.msra.mxu3 %v1259_v55  ;;  %v1173_v55 = vld [vmem:[#allocation6 + $0x610] sm:$0xff]  ;;  %1547 = vmatpush.msra.mxu2 %v1012_v50  ;;  %v1083_v50 = vld [vmem:[#allocation6 + $0x348] sm:$0xff] }
 0x185   : > { %1407 = vmatpush.msra.mxu0 %v1164_v57  ;;  %1351 = vmatpush.msrb.mxu1 %v1124_v58  ;;  %v1065_v57 = vld [vmem:[#allocation6 + $0x2b8] sm:$0xff] }
 0x186   : > { %1352 = vmatmul.f32.vlgmr.msrb.gmra.mxu1 %v4693_v19  ;;  %1385 = vmatpush.msra.mxu3 %v1256_v59  ;;  %v1017_v58 = vld [vmem:[#allocation6 + $0x138] sm:$0xff]  ;;  %v1062_v59 = vld [vmem:[#allocation6 + $0x2a0] sm:$0xff] }
 0x187   : > { %1408 = vmatpush.msra.mxu0 %v1161_v60  ;;  %1428 = vmatpush.msra.mxu1 %v1218_v61  ;;  %v1119_v60 = vld [vmem:[#allocation6 + $0x468] sm:$0xff] }
 0x188   : > { %1309 = vmatmul.f32.gmra.mxu3 %v4698_v37  ;;  %1332 = vmatmul.f32.gmra.mxu0 %v4713_v52  ;;  %v1059_v61 = vld [vmem:[#allocation6 + $0x288] sm:$0xff] }
 0x189   : > { %1386 = vmatpush.msra.mxu3 %v1253_v62  ;;  %1409 = vmatpush.msra.mxu0 %v1158_v63  ;;  %v1116_v62 = vld [vmem:[#allocation6 + $0x450] sm:$0xff]  ;;  %v1014_v63 = vld [vmem:[#allocation6 + $0x120] sm:$0xff] }
 0x18a   : > { %1429 = vmatpush.msra.mxu1 %v1215_v0  ;;  %1548 = vmatpush.msra.mxu2 %v1009_v54  ;;  %v1006_v0 = vld [vmem:[#allocation6 + $0xe0] sm:$0xff]  ;;  %v1073_v54 = vld [vmem:[#allocation6 + $0x2f8] sm:$0xff] }
 0x18b   : > { %1387 = vmatpush.msra.mxu3 %v1250_v1  ;;  %1410 = vmatpush.msra.mxu0 %v1155_v2  ;;  %v1056_v1 = vld [vmem:[#allocation6 + $0x270] sm:$0xff]  ;;  %v1113_v2 = vld [vmem:[#allocation6 + $0x438] sm:$0xff] }
 0x18c   : > { %1430 = vmatpush.msra.mxu1 %v1212_v3  ;;  %v1011_v3 = vld [vmem:[#allocation6 + $0x108] sm:$0xff]  ;;  %1549 = vmatpush.msra.mxu2 %v1006_v0 }
 0x18d   : > { %1388 = vmatpush.msra.mxu3 %v1247_v4  ;;  %1411 = vmatpush.msra.mxu0 %v1152_v5  ;;  %v1003_v4 = vld [vmem:[#allocation6 + $0xc8] sm:$0xff]  ;;  %v1053_v5 = vld [vmem:[#allocation6 + $0x258] sm:$0xff] }
 0x18e   : > { %1431 = vmatpush.msra.mxu1 %v1209_v6  ;;  %v1110_v6 = vld [vmem:[#allocation6 + $0x420] sm:$0xff]  ;;  %1550 = vmatpush.msra.mxu2 %v1003_v4  ;;  %v1111_v0 = vld [vmem:[#allocation6 + $0x428] sm:$0xff]  ;;  %v1108_v4 = vld [vmem:[#allocation6 + $0x410] sm:$0xff] }
 0x18f   : > { %1355 = vmatmul.f32.gmra.mxu1 %v4696_v35  ;;  %1389 = vmatpush.msra.mxu3 %v1244_v7  ;;  %v1008_v7 = vld [vmem:[#allocation6 + $0xf0] sm:$0xff] }
 0x190   : > { %1412 = vmatpush.msra.mxu0 %v1149_v8  ;;  %1432 = vmatpush.msra.mxu1 %v1206_v9  ;;  %v1050_v8 = vld [vmem:[#allocation6 + $0x240] sm:$0xff]  ;;  %v1107_v9 = vld [vmem:[#allocation6 + $0x408] sm:$0xff] }
 0x191   : > { %1390 = vmatpush.msra.mxu3 %v1241_v11  ;;  %v1005_v11 = vld [vmem:[#allocation6 + $0xd8] sm:$0xff] }
 0x192   : > { %1413 = vmatpush.msra.mxu0 %v1146_v12  ;;  %1433 = vmatpush.msra.mxu1 %v1203_v13  ;;  %v1000_v12 = vld [vmem:[#allocation6 + $0xb0] sm:$0xff]  ;;  %v1047_v13 = vld [vmem:[#allocation6 + $0x228] sm:$0xff] }
 0x193   : > { %1391 = vmatpush.msra.mxu3 %v1238_v14  ;;  %v1104_v14 = vld [vmem:[#allocation6 + $0x3f0] sm:$0xff]  ;;  %1551 = vmatpush.msra.mxu2 %v1000_v12  ;;  %v1061_v12 = vld [vmem:[#allocation6 + $0x298] sm:$0xff] }
 0x194   : > { %1414 = vmatpush.msra.mxu0 %v1143_v15  ;;  %1434 = vmatpush.msra.mxu1 %v1200_v16  ;;  %v1002_v15 = vld [vmem:[#allocation6 + $0xc0] sm:$0xff]  ;;  %v997_v16 = vld [vmem:[#allocation6 + $0x98] sm:$0xff] }
 0x195   : > { %1392 = vmatpush.msra.mxu3 %v1235_v17  ;;  %v1044_v17 = vld [vmem:[#allocation6 + $0x210] sm:$0xff]  ;;  %1552 = vmatpush.msra.mxu2 %v997_v16  ;;  %v1058_v16 = vld [vmem:[#allocation6 + $0x280] sm:$0xff] }
 0x196   : > { %1415 = vmatpush.msra.mxu0 %v1140_v20  ;;  %1435 = vmatpush.msra.mxu1 %v1197_v21  ;;  %v1101_v20 = vld [vmem:[#allocation6 + $0x3d8] sm:$0xff]  ;;  %v999_v21 = vld [vmem:[#allocation6 + $0xa8] sm:$0xff] }
 0x197   : > { %1393 = vmatpush.msra.mxu3 %v1232_v22  ;;  %v994_v22 = vld [vmem:[#allocation6 + $0x80] sm:$0xff] }
 0x198   : > { %1416 = vmatpush.msra.mxu0 %v1137_v23  ;;  %1436 = vmatpush.msra.mxu1 %v1194_v24  ;;  %v1041_v23 = vld [vmem:[#allocation6 + $0x1f8] sm:$0xff]  ;;  %v1098_v24 = vld [vmem:[#allocation6 + $0x3c0] sm:$0xff] }
 0x199   : > { %1394 = vmatpush.msra.mxu3 %v1229_v25  ;;  %v996_v25 = vld [vmem:[#allocation6 + $0x90] sm:$0xff]  ;;  %1553 = vmatpush.msra.mxu2 %v994_v22  ;;  %v1055_v22 = vld [vmem:[#allocation6 + $0x268] sm:$0xff] }
 0x19a   : > { %1417 = vmatpush.msra.mxu0 %v1134_v26  ;;  %1437 = vmatpush.msra.mxu1 %v1191_v27  ;;  %v991_v26 = vld [vmem:[#allocation6 + $0x68] sm:$0xff]  ;;  %v1038_v27 = vld [vmem:[#allocation6 + $0x1e0] sm:$0xff] }
 0x19b   : > { %1395 = vmatpush.msra.mxu3 %v1226_v28  ;;  %v1095_v28 = vld [vmem:[#allocation6 + $0x3a8] sm:$0xff]  ;;  %1554 = vmatpush.msra.mxu2 %v991_v26  ;;  %v1052_v26 = vld [vmem:[#allocation6 + $0x250] sm:$0xff] }
 0x19c   : > { %1418 = vmatpush.msra.mxu0 %v1131_v30  ;;  %1438 = vmatpush.msra.mxu1 %v1188_v32  ;;  %v988_v30 = vld [vmem:[#allocation6 + $0x50] sm:$0xff]  ;;  %v1035_v32 = vld [vmem:[#allocation6 + $0x1c8] sm:$0xff] }
 0x19d   : > { %1396 = vmatpush.msra.mxu3 %v1223_v33  ;;  %v1092_v33 = vld [vmem:[#allocation6 + $0x390] sm:$0xff]  ;;  %1555 = vmatpush.msra.mxu2 %v988_v30  ;;  %v1049_v30 = vld [vmem:[#allocation6 + $0x238] sm:$0xff] }
 0x19e   : > { %1419 = vmatpush.msra.mxu0 %v1128_v39  ;;  %1439 = vmatpush.msra.mxu1 %v1185_v40  ;;  %v985_v39 = vld [vmem:[#allocation6 + $0x38] sm:$0xff]  ;;  %v1032_v40 = vld [vmem:[#allocation6 + $0x1b0] sm:$0xff] }
 0x19f   : > { %1397 = vmatpush.msra.mxu3 %v1220_v42  ;;  %v1089_v42 = vld [vmem:[#allocation6 + $0x378] sm:$0xff]  ;;  %1556 = vmatpush.msra.mxu2 %v985_v39  ;;  %v1046_v39 = vld [vmem:[#allocation6 + $0x220] sm:$0xff] }
 0x1a0   : > { %1420 = vmatpush.msra.mxu0 %v1125_v45  ;;  %1440 = vmatpush.msra.mxu1 %v1182_v46  ;;  %v982_v45 = vld [vmem:[#allocation6 + $0x20] sm:$0xff]  ;;  %v1029_v46 = vld [vmem:[#allocation6 + $0x198] sm:$0xff] }
 0x1a1   : > { %1398 = vmatmul.f32.vlgmr.msra.gmra.mxu3 %v4715_v56  ;;  %1421 = vmatmul.f32.vlgmr.msra.gmra.mxu0 %v4693_v19 }
 0x1a2   : > { %1441 = vmatpush.msra.mxu1 %v1179_v48  ;;  %1497 = vmatpush.msrb.mxu0 %v1071_v49  ;;  %v984_v48 = vld [vmem:[#allocation6 + $0x30] sm:$0xff]  ;;  %v979_v49 = vld [vmem:[#allocation6 + $0x8] sm:$0xff] }
 0x1a3   : > { %1474 = vmatpush.msrb.mxu3 %v1023_v36  ;;  %v1026_v36 = vld [vmem:[#allocation6 + $0x180] sm:$0xff]  ;;  %1557 = vmatpush.msra.mxu2 %v982_v45  ;;  %v1043_v45 = vld [vmem:[#allocation6 + $0x208] sm:$0xff] }
 0x1a4   : > { %1442 = vmatpush.msra.mxu1 %v1176_v31  ;;  %1498 = vmatpush.msrb.mxu0 %v1068_v51  ;;  %v1120_v31 = vld [vmem:[#allocation6 + $0x470] sm:$0xff]  ;;  %v981_v51 = vld [vmem:[#allocation6 + $0x18] sm:$0xff] }
 0x1a5   : > { %1475 = vmatpush.msrb.mxu3 %v1020_v53  ;;  %v1080_v53 = vld [vmem:[#allocation6 + $0x330] sm:$0xff]  ;;  %1558 = vmatpush.msra.mxu2 %v979_v49  ;;  %v1081_v49 = vld [vmem:[#allocation6 + $0x338] sm:$0xff] }
 0x1a6   : > { %1443 = vmatpush.msra.mxu1 %v1173_v55  ;;  %1499 = vmatpush.msrb.mxu0 %v1065_v57  ;;  %v1117_v55 = vld [vmem:[#allocation6 + $0x458] sm:$0xff]  ;;  %v978_v57 = vld [vmem:[#allocation6] sm:$0xff] }
 0x1a7   : > { %1444 = vmatmul.f32.vlgmr.msra.gmra.mxu1 %v4703_v41  ;;  %1476 = vmatpush.msrb.mxu3 %v1017_v58  ;;  %v1077_v58 = vld [vmem:[#allocation6 + $0x318] sm:$0xff] }
 0x1a8   : > { %1500 = vmatpush.msrb.mxu0 %v1062_v59  ;;  %1520 = vmatpush.msrb.mxu1 %v1119_v60  ;;  %v1072_v59 = vld [vmem:[#allocation6 + $0x2f0] sm:$0xff]  ;;  %v1114_v60 = vld [vmem:[#allocation6 + $0x440] sm:$0xff] }
 0x1a9   : > { %1401 = vmatmul.f32.gmra.mxu3 %v4713_v52  ;;  %1424 = vmatmul.f32.gmra.mxu0 %v4696_v35 }
 0x1aa   : > { %1501 = vmatpush.msrb.mxu0 %v1059_v61  ;;  %1521 = vmatpush.msrb.mxu1 %v1116_v62  ;;  %v1070_v61 = vld [vmem:[#allocation6 + $0x2e0] sm:$0xff] }
 0x1ab   : > { %1477 = vmatpush.msrb.mxu3 %v1014_v63  ;;  %1635 = vmatpush.msrb.mxu2 %v1073_v54  ;;  %v1074_v62 = vld [vmem:[#allocation6 + $0x300] sm:$0xff]  ;;  %v1069_v63 = vld [vmem:[#allocation6 + $0x2d8] sm:$0xff]  ;;  %v992_v54 = vld [vmem:[#allocation6 + $0x70] sm:$0xff] }
 0x1ac   : > { %1502 = vmatpush.msrb.mxu0 %v1056_v1  ;;  %1522 = vmatpush.msrb.mxu1 %v1113_v2  ;;  %v1025_v1 = vld [vmem:[#allocation6 + $0x178] sm:$0xff]  ;;  %v1066_v2 = vld [vmem:[#allocation6 + $0x2c0] sm:$0xff] }
 0x1ad   : > { %1478 = vmatpush.msrb.mxu3 %v1011_v3  ;;  %1636 = vmatpush.msrb.mxu2 %v1070_v61  ;;  %v1067_v3 = vld [vmem:[#allocation6 + $0x2c8] sm:$0xff]  ;;  %v986_v61 = vld [vmem:[#allocation6 + $0x40] sm:$0xff] }
 0x1ae   : > { %1503 = vmatpush.msrb.mxu0 %v1053_v5  ;;  %1523 = vmatpush.msrb.mxu1 %v1110_v6  ;;  %v1022_v5 = vld [vmem:[#allocation6 + $0x160] sm:$0xff]  ;;  %v1063_v6 = vld [vmem:[#allocation6 + $0x2a8] sm:$0xff] }
 0x1af   : > { %1447 = vmatmul.f32.gmra.mxu1 %v4698_v37  ;;  %1479 = vmatpush.msrb.mxu3 %v1008_v7  ;;  %v1064_v7 = vld [vmem:[#allocation6 + $0x2b0] sm:$0xff] }
 0x1b0   : > { %1504 = vmatpush.msrb.mxu0 %v1050_v8  ;;  %1524 = vmatpush.msrb.mxu1 %v1107_v9  ;;  %v1105_v8 = vld [vmem:[#allocation6 + $0x3f8] sm:$0xff]  ;;  %v1019_v9 = vld [vmem:[#allocation6 + $0x148] sm:$0xff] }
 0x1b1   : > { %1480 = vmatpush.msrb.mxu3 %v1005_v11  ;;  %1637 = vmatpush.msrb.mxu2 %v1067_v3  ;;  %v1060_v11 = vld [vmem:[#allocation6 + $0x290] sm:$0xff]  ;;  %v1121_v3 = vld [vmem:[#allocation6 + $0x478] sm:$0xff] }
 0x1b2   : > { %1505 = vmatpush.msrb.mxu0 %v1047_v13  ;;  %1525 = vmatpush.msrb.mxu1 %v1104_v14  ;;  %v1102_v13 = vld [vmem:[#allocation6 + $0x3e0] sm:$0xff]  ;;  %v1016_v14 = vld [vmem:[#allocation6 + $0x130] sm:$0xff] }
 0x1b3   : > { %1481 = vmatpush.msrb.mxu3 %v1002_v15  ;;  %1638 = vmatpush.msrb.mxu2 %v1064_v7  ;;  %v1057_v15 = vld [vmem:[#allocation6 + $0x278] sm:$0xff]  ;;  %v1115_v7 = vld [vmem:[#allocation6 + $0x448] sm:$0xff] }
 0x1b4   : > { %1506 = vmatpush.msrb.mxu0 %v1044_v17  ;;  %1526 = vmatpush.msrb.mxu1 %v1101_v20  ;;  %v1099_v17 = vld [vmem:[#allocation6 + $0x3c8] sm:$0xff]  ;;  %v1013_v20 = vld [vmem:[#allocation6 + $0x118] sm:$0xff] }
 0x1b5   : > { %1482 = vmatpush.msrb.mxu3 %v999_v21  ;;  %1639 = vmatpush.msrb.mxu2 %v1061_v12  ;;  %v1054_v21 = vld [vmem:[#allocation6 + $0x260] sm:$0xff]  ;;  %v1109_v12 = vld [vmem:[#allocation6 + $0x418] sm:$0xff] }
 0x1b6   : > { %1507 = vmatpush.msrb.mxu0 %v1041_v23  ;;  %1527 = vmatpush.msrb.mxu1 %v1098_v24  ;;  %v1096_v23 = vld [vmem:[#allocation6 + $0x3b0] sm:$0xff]  ;;  %v1010_v24 = vld [vmem:[#allocation6 + $0x100] sm:$0xff] }
 0x1b7   : > { %1483 = vmatpush.msrb.mxu3 %v996_v25  ;;  %1640 = vmatpush.msrb.mxu2 %v1058_v16  ;;  %v1051_v25 = vld [vmem:[#allocation6 + $0x248] sm:$0xff] }
 0x1b8   : > { %1508 = vmatpush.msrb.mxu0 %v1038_v27  ;;  %1528 = vmatpush.msrb.mxu1 %v1095_v28  ;;  %v1093_v27 = vld [vmem:[#allocation6 + $0x398] sm:$0xff]  ;;  %v1007_v28 = vld [vmem:[#allocation6 + $0xe8] sm:$0xff] }
 0x1b9   : > { %1484 = vmatpush.msrb.mxu3 %v993_v29  ;;  %1641 = vmatpush.msrb.mxu2 %v1055_v22  ;;  %v1048_v29 = vld [vmem:[#allocation6 + $0x230] sm:$0xff]  ;;  %v1091_v16 = vld [vmem:[#allocation6 + $0x388] sm:$0xff] }
 0x1ba   : > { %1509 = vmatpush.msrb.mxu0 %v1035_v32  ;;  %1529 = vmatpush.msrb.mxu1 %v1092_v33  ;;  %v1090_v32 = vld [vmem:[#allocation6 + $0x380] sm:$0xff]  ;;  %v1004_v33 = vld [vmem:[#allocation6 + $0xd0] sm:$0xff]  ;;  %v1796_v22 = vld [vmem:[#allocation6 + $0xa68] sm:$0xff] }
 0x1bb   : > { %1485 = vmatpush.msrb.mxu3 %v990_v34  ;;  %1642 = vmatpush.msrb.mxu2 %v1052_v26  ;;  %v1045_v34 = vld [vmem:[#allocation6 + $0x218] sm:$0xff] }
 0x1bc   : > { %1510 = vmatpush.msrb.mxu0 %v1032_v40  ;;  %1530 = vmatpush.msrb.mxu1 %v1089_v42  ;;  %v1087_v40 = vld [vmem:[#allocation6 + $0x368] sm:$0xff]  ;;  %v1001_v42 = vld [vmem:[#allocation6 + $0xb8] sm:$0xff] }
 0x1bd   : > { %1486 = vmatpush.msrb.mxu3 %v987_v44  ;;  %1643 = vmatpush.msrb.mxu2 %v1049_v30  ;;  %v1042_v44 = vld [vmem:[#allocation6 + $0x200] sm:$0xff]  ;;  %v1794_v26 = vld [vmem:[#allocation6 + $0xa58] sm:$0xff]  ;;  %v1841_v30 = vld [vmem:[#allocation6 + $0xbd0] sm:$0xff] }
 0x1be   : > { %1511 = vmatpush.msrb.mxu0 %v1029_v46  ;;  %1531 = vmatpush.msrb.mxu1 %v1086_v47  ;;  %v1084_v46 = vld [vmem:[#allocation6 + $0x350] sm:$0xff]  ;;  %v998_v47 = vld [vmem:[#allocation6 + $0xa0] sm:$0xff] }
 0x1bf   : > { %1487 = vmatpush.msrb.mxu3 %v984_v48  ;;  %1644 = vmatpush.msrb.mxu2 %v1046_v39  ;;  %v1039_v48 = vld [vmem:[#allocation6 + $0x1e8] sm:$0xff]  ;;  %v1781_v39 = vld [vmem:[#allocation6 + $0x9f0] sm:$0xff] }
 0x1c0   : > { %1512 = vmatpush.msrb.mxu0 %v1026_v36  ;;  %1532 = vmatpush.msrb.mxu1 %v1083_v50  ;;  %v995_v36 = vld [vmem:[#allocation6 + $0x88] sm:$0xff] }
 0x1c1   : > { %1488 = vmatpush.msrb.mxu3 %v981_v51  ;;  %1645 = vmatpush.msrb.mxu2 %v1043_v45  ;;  %v1040_v51 = vld [vmem:[#allocation6 + $0x1f0] sm:$0xff]  ;;  %v1782_v45 = vld [vmem:[#allocation6 + $0x9f8] sm:$0xff] }
 0x1c2   : > { %1589 = vmatpush.msra.mxu0 %v1120_v31  ;;  %1533 = vmatpush.msrb.mxu1 %v1080_v53  ;;  %v1036_v31 = vld [vmem:[#allocation6 + $0x1d0] sm:$0xff]  ;;  %v1078_v53 = vld [vmem:[#allocation6 + $0x320] sm:$0xff] }
 0x1c3   : > { %1489 = vmatpush.msrb.mxu3 %v978_v57  ;;  %v1037_v57 = vld [vmem:[#allocation6 + $0x1d8] sm:$0xff]  ;;  %1646 = vmatpush.msrb.mxu2 %v1040_v51  ;;  %v1757_v51 = vld [vmem:[#allocation6 + $0x930] sm:$0xff] }
 0x1c4   : > { %1590 = vmatpush.msra.mxu0 %v1117_v55  ;;  %1534 = vmatpush.msrb.mxu1 %v1077_v58  ;;  %v1033_v55 = vld [vmem:[#allocation6 + $0x1b8] sm:$0xff]  ;;  %v1075_v58 = vld [vmem:[#allocation6 + $0x308] sm:$0xff] }
 0x1c5   : > { %1566 = vmatpush.msra.mxu3 %v1072_v59  ;;  %v989_v59 = vld [vmem:[#allocation6 + $0x58] sm:$0xff]  ;;  %1647 = vmatpush.msrb.mxu2 %v1037_v57  ;;  %v1776_v57 = vld [vmem:[#allocation6 + $0x9c8] sm:$0xff] }
 0x1c6   : > { %1591 = vmatpush.msra.mxu0 %v1114_v60  ;;  %1535 = vmatpush.msrb.mxu1 %v1074_v62  ;;  %v1030_v60 = vld [vmem:[#allocation6 + $0x1a0] sm:$0xff] }
 0x1c7   : > { %1567 = vmatpush.msra.mxu3 %v1069_v63  ;;  %v983_v63 = vld [vmem:[#allocation6 + $0x28] sm:$0xff] }
 0x1c8   : > { %1592 = vmatpush.msra.mxu0 %v1111_v0  ;;  %1612 = vmatpush.msra.mxu1 %v1025_v1  ;;  %v1027_v1 = vld [vmem:[#allocation6 + $0x188] sm:$0xff] }
 0x1c9   : > { %1568 = vmatpush.msra.mxu3 %v1066_v2  ;;  %v980_v2 = vld [vmem:[#allocation6 + $0x10] sm:$0xff] }
 0x1ca   : > { %1593 = vmatpush.msra.mxu0 %v1108_v4  ;;  %1613 = vmatpush.msra.mxu1 %v1022_v5  ;;  %v1034_v5 = vld [vmem:[#allocation6 + $0x1c0] sm:$0xff] }
 0x1cb   : > { %1569 = vmatpush.msra.mxu3 %v1063_v6  ;;  %v1031_v6 = vld [vmem:[#allocation6 + $0x1a8] sm:$0xff]  ;;  %1648 = vmatpush.msrb.mxu2 %v1034_v5  ;;  %v1823_v5 = vld [vmem:[#allocation6 + $0xb40] sm:$0xff] }
 0x1cc   : > { %1594 = vmatpush.msra.mxu0 %v1105_v8  ;;  %1614 = vmatpush.msra.mxu1 %v1019_v9  ;;  %v1112_v8 = vld [vmem:[#allocation6 + $0x430] sm:$0xff] }
 0x1cd   : > { %1570 = vmatpush.msra.mxu3 %v1060_v11  ;;  %1649 = vmatpush.msrb.mxu2 %v1031_v6  ;;  %v1028_v11 = vld [vmem:[#allocation6 + $0x190] sm:$0xff]  ;;  %v1767_v6 = vld [vmem:[#allocation6 + $0x980] sm:$0xff] }
 0x1ce   : > { %1595 = vmatpush.msra.mxu0 %v1102_v13  ;;  %1615 = vmatpush.msra.mxu1 %v1016_v14  ;;  %v1106_v13 = vld [vmem:[#allocation6 + $0x400] sm:$0xff]  ;;  %v1097_v14 = vld [vmem:[#allocation6 + $0x3b8] sm:$0xff] }
 0x1cf   : > { %1571 = vmatpush.msra.mxu3 %v1057_v15  ;;  %1650 = vmatpush.msrb.mxu2 %v1028_v11  ;;  %v1094_v15 = vld [vmem:[#allocation6 + $0x3a0] sm:$0xff]  ;;  %v1836_v11 = vld [vmem:[#allocation6 + $0xba8] sm:$0xff] }
 0x1d0   : > { %1596 = vmatpush.msra.mxu0 %v1099_v17  ;;  %1616 = vmatpush.msra.mxu1 %v1013_v20  ;;  %v1088_v17 = vld [vmem:[#allocation6 + $0x370] sm:$0xff]  ;;  %v1079_v20 = vld [vmem:[#allocation6 + $0x328] sm:$0xff] }
 0x1d1   : > { %1572 = vmatpush.msra.mxu3 %v1054_v21  ;;  %v1076_v21 = vld [vmem:[#allocation6 + $0x310] sm:$0xff] }
 0x1d2   : > { %1597 = vmatpush.msra.mxu0 %v1096_v23  ;;  %1617 = vmatpush.msra.mxu1 %v1010_v24  ;;  %v1793_v23 = vld [vmem:[#allocation6 + $0xa50] sm:$0xff]  ;;  %v1790_v24 = vld [vmem:[#allocation6 + $0xa38] sm:$0xff] }
 0x1d3   : > { %1573 = vmatpush.msra.mxu3 %v1051_v25  ;;  %v1797_v25 = vld [vmem:[#allocation6 + $0xa70] sm:$0xff] }
 0x1d4   : > { %1598 = vmatpush.msra.mxu0 %v1093_v27  ;;  %1618 = vmatpush.msra.mxu1 %v1007_v28  ;;  %v1787_v27 = vld [vmem:[#allocation6 + $0xa20] sm:$0xff]  ;;  %v1844_v28 = vld [vmem:[#allocation6 + $0xbe8] sm:$0xff] }
 0x1d5   : > { %1574 = vmatpush.msra.mxu3 %v1048_v29  ;;  %v1791_v29 = vld [vmem:[#allocation6 + $0xa40] sm:$0xff] }
 0x1d6   : > { %1599 = vmatpush.msra.mxu0 %v1090_v32  ;;  %1619 = vmatpush.msra.mxu1 %v1004_v33  ;;  %v1784_v32 = vld [vmem:[#allocation6 + $0xa08] sm:$0xff] }
 0x1d7   : > { %1575 = vmatpush.msra.mxu3 %v1045_v34  ;;  %v1788_v33 = vld [vmem:[#allocation6 + $0xa28] sm:$0xff]  ;;  %v1838_v34 = vld [vmem:[#allocation6 + $0xbb8] sm:$0xff] }
 0x1d8   : > { %1600 = vmatpush.msra.mxu0 %v1087_v40  ;;  %1620 = vmatpush.msra.mxu1 %v1001_v42  ;;  %v1785_v40 = vld [vmem:[#allocation6 + $0xa10] sm:$0xff]  ;;  %v1835_v42 = vld [vmem:[#allocation6 + $0xba0] sm:$0xff] }
 0x1d9   : > { %1576 = vmatpush.msra.mxu3 %v1042_v44  ;;  %v4743_v50 = vpop.f32.mrf.mxu0  ;;  %v1778_v44 = vld [vmem:[#allocation6 + $0x9d8] sm:$0xff] }
 0x1da   : > { %1601 = vmatpush.msra.mxu0 %v1084_v46  ;;  %1621 = vmatpush.msra.mxu1 %v998_v47  ;;  %v1775_v46 = vld [vmem:[#allocation6 + $0x9c0] sm:$0xff] }
 0x1db   : > { %1577 = vmatpush.msra.mxu3 %v1039_v48  ;;  %1513 = vmatmul.f32.vlgmr.msrb.gmra.mxu0 %v4743_v50  ;;  %v1779_v47 = vld [vmem:[#allocation6 + $0x9e0] sm:$0xff]  ;;  %v1772_v48 = vld [vmem:[#allocation6 + $0x9a8] sm:$0xff] }
 0x1dc   : > { %1602 = vmatpush.msra.mxu0 %v1081_v49  ;;  %1622 = vmatpush.msra.mxu1 %v995_v36  ;;  %v1769_v49 = vld [vmem:[#allocation6 + $0x990] sm:$0xff]  ;;  %v1766_v36 = vld [vmem:[#allocation6 + $0x978] sm:$0xff] }
 0x1dd   : > { %1578 = vmatpush.msra.mxu3 %v1036_v31  ;;  %v1760_v31 = vld [vmem:[#allocation6 + $0x948] sm:$0xff] }
 0x1de   : > { %1603 = vmatpush.msra.mxu0 %v1078_v53  ;;  %1623 = vmatpush.msra.mxu1 %v992_v54  ;;  %v926_v62 = vpop.f32.mrf.mxu3  ;;  %v1754_v54 = vld [vmem:[#allocation6 + $0x918] sm:$0xff] }
 0x1df   : > { %1579 = vmatpush.msra.mxu3 %v1033_v55  ;;  %1559 = vmatmul.f32.vlgmr.msra.gmra.mxu2 %v926_v62  ;;  %v1832_v55 = vld [vmem:[#allocation6 + $0xb88] sm:$0xff] }
 0x1e0   : > { %1604 = vmatpush.msra.mxu0 %v1075_v58  ;;  %1624 = vmatpush.msra.mxu1 %v989_v59  ;;  %v4747_v0 = vpop.f32.mrf.mxu1  ;;  %v1751_v58 = vld [vmem:[#allocation6 + $0x900] sm:$0xff]  ;;  %v1829_v59 = vld [vmem:[#allocation6 + $0xb70] sm:$0xff] }
 0x1e1   : > { %1580 = vmatpush.msra.mxu3 %v1030_v60  ;;  %1536 = vmatmul.f32.vlgmr.msrb.gmra.mxu1 %v4747_v0  ;;  %v1892_v60 = vld [vmem:[#allocation6 + $0xd68] sm:$0xff] }
 0x1e2   : > { %1695 = vmatpush.msrb.mxu0 %v4696_v35  ;;  %1625 = vmatpush.msra.mxu1 %v986_v61  ;;  %v1118_v35 = vld [vmem:[#allocation6 + $0x460] sm:$0xff]  ;;  %v1773_v61 = vld [vmem:[#allocation6 + $0x9b0] sm:$0xff] }
 0x1e3   : > { %1490 = vmatmul.f32.vlgmr.msrb.gmra.mxu3 %v926_v62  ;;  %v952_v4 = vpop.f32.mrf.mxu0  ;;  %1918 = vmatpush.msra.mxu2 %v1844_v28  ;;  %v1846_v28 = vld [vmem:[#allocation6 + $0xbf8] sm:$0xff] }
 0x1e4   : > { %1696 = vmatpush.msrb.mxu0 %v4693_v19  ;;  %1626 = vmatpush.msra.mxu1 %v983_v63  ;;  %v1826_v63 = vld [vmem:[#allocation6 + $0xb58] sm:$0xff] }
 0x1e5   : > { %1581 = vmatpush.msra.mxu3 %v1027_v1  ;;  %1516 = vmatmul.f32.gmra.mxu0 %v952_v4  ;;  %v1770_v1 = vld [vmem:[#allocation6 + $0x998] sm:$0xff] }
 0x1e6   : > { %1627 = vmatpush.msra.mxu1 %v980_v2  ;;  %1919 = vmatpush.msra.mxu2 %v1841_v30  ;;  %v1842_v2 = vld [vmem:[#allocation6 + $0xbd8] sm:$0xff]  ;;  %v1868_v30 = vld [vmem:[#allocation6 + $0xca8] sm:$0xff] }
 0x1e7   : > { %1658 = vmatpush.msrb.mxu3 %v1121_v3 }
 0x1e8   : > { %1718 = vmatpush.msrb.mxu1 %v4698_v37  ;;  %v929_v19 = vpop.f32.mrf.mxu3  ;;  %v1103_v37 = vld [vmem:[#allocation6 + $0x3e8] sm:$0xff]  ;;  %1920 = vmatpush.msra.mxu2 %v1838_v34 }
 0x1e9   : > { %1659 = vmatpush.msrb.mxu3 %v1118_v35  ;;  %v975_v9 = vpop.f32.mrf.mxu1  ;;  %1562 = vmatmul.f32.gmra.mxu2 %v929_v19  ;;  %v1886_v35 = vld [vmem:[#allocation6 + $0xd38] sm:$0xff] }
 0x1ea   : > { %1719 = vmatpush.msrb.mxu1 %v4703_v41  ;;  %v1100_v41 = vld [vmem:[#allocation6 + $0x3d0] sm:$0xff]  ;;  %1921 = vmatpush.msra.mxu2 %v1835_v42 }
 0x1eb   : > { %1660 = vmatpush.msrb.mxu3 %v1115_v7  ;;  %1539 = vmatmul.f32.gmra.mxu1 %v975_v9  ;;  %v1839_v7 = vld [vmem:[#allocation6 + $0xbc0] sm:$0xff]  ;;  %v1865_v42 = vld [vmem:[#allocation6 + $0xc90] sm:$0xff] }
 0x1ec   : > { %1493 = vmatmul.f32.gmra.mxu3 %v929_v19  ;;  %1922 = vmatpush.msra.mxu2 %v1832_v55  ;;  %v1856_v55 = vld [vmem:[#allocation6 + $0xc48] sm:$0xff] }
 0x1ed   : > { %1661 = vmatpush.msrb.mxu3 %v1112_v8  ;;  %1605 = vmatmul.f32.vlgmr.msra.gmra.mxu0 %v4747_v0  ;;  %v1883_v8 = vld [vmem:[#allocation6 + $0xd20] sm:$0xff] }
 0x1ee   : > { %1741 = vmatpush.msra.mxu0 %v4713_v52  ;;  %v1085_v52 = vld [vmem:[#allocation6 + $0x358] sm:$0xff]  ;;  %1923 = vmatpush.msra.mxu2 %v1829_v59 }
 0x1ef   : > { %1662 = vmatpush.msrb.mxu3 %v1109_v12  ;;  %v1817_v12 = vld [vmem:[#allocation6 + $0xb10] sm:$0xff] }
 0x1f0   : > { %1742 = vmatpush.msra.mxu0 %v4715_v56  ;;  %v1082_v56 = vld [vmem:[#allocation6 + $0x340] sm:$0xff]  ;;  %1924 = vmatpush.msra.mxu2 %v1826_v63  ;;  %v1806_v63 = vld [vmem:[#allocation6 + $0xab8] sm:$0xff] }
 0x1f1   : > { %1663 = vmatpush.msrb.mxu3 %v1106_v13  ;;  %1651 = vmatmul.f32.vlgmr.msrb.gmra.mxu2 %v4743_v50  ;;  %v1880_v13 = vld [vmem:[#allocation6 + $0xd08] sm:$0xff] }
 0x1f2   : > { %1925 = vmatpush.msra.mxu2 %v1823_v5  ;;  %v1803_v5 = vld [vmem:[#allocation6 + $0xaa0] sm:$0xff] }
 0x1f3   : > { %1664 = vmatpush.msrb.mxu3 %v1103_v37  ;;  %1628 = vmatmul.f32.vlgmr.msra.gmra.mxu1 %v926_v62  ;;  %v1845_v62 = vld [vmem:[#allocation6 + $0xbf0] sm:$0xff] }
 0x1f4   : > { %1582 = vmatmul.f32.vlgmr.msra.gmra.mxu3 %v4743_v50  ;;  %1895 = vmatpush.msra.mxu1 %v1796_v22  ;;  %v1763_v50 = vld [vmem:[#allocation6 + $0x960] sm:$0xff]  ;;  %v1761_v37 = vld [vmem:[#allocation6 + $0x950] sm:$0xff] }
 0x1f5   : > { %1665 = vmatpush.msrb.mxu3 %v1100_v41  ;;  %1608 = vmatmul.f32.gmra.mxu0 %v975_v9  ;;  %v1833_v41 = vld [vmem:[#allocation6 + $0xb90] sm:$0xff]  ;;  %v1755_v22 = vld [vmem:[#allocation6 + $0x920] sm:$0xff] }
 0x1f6   : > { %1896 = vmatpush.msra.mxu1 %v1793_v23  ;;  %v1827_v23 = vld [vmem:[#allocation6 + $0xb60] sm:$0xff] }
 0x1f7   : > { %1666 = vmatpush.msrb.mxu3 %v1097_v14 }
 0x1f8   : > { %1897 = vmatpush.msra.mxu1 %v1790_v24  ;;  %v1808_v24 = vld [vmem:[#allocation6 + $0xac8] sm:$0xff] }
 0x1f9   : > { %1667 = vmatpush.msrb.mxu3 %v1094_v15  ;;  %1654 = vmatmul.f32.gmra.mxu2 %v952_v4 }
 0x1fa   : > { %1898 = vmatpush.msra.mxu1 %v1787_v27  ;;  %v1824_v27 = vld [vmem:[#allocation6 + $0xb48] sm:$0xff] }
 0x1fb   : > { %1668 = vmatpush.msrb.mxu3 %v1091_v16  ;;  %1631 = vmatmul.f32.gmra.mxu1 %v929_v19  ;;  %v1820_v19 = vld [vmem:[#allocation6 + $0xb28] sm:$0xff]  ;;  %v1814_v16 = vld [vmem:[#allocation6 + $0xaf8] sm:$0xff] }
 0x1fc   : > { %1585 = vmatmul.f32.gmra.mxu3 %v952_v4  ;;  %1899 = vmatpush.msra.mxu1 %v1784_v32  ;;  %v1821_v32 = vld [vmem:[#allocation6 + $0xb30] sm:$0xff] }
 0x1fd   : > { %1669 = vmatpush.msrb.mxu3 %v1088_v17  ;;  %4059 = vmatmul.msk.f32.vlgmr.msrb.gmra.mxu0 %vm522_vm1, %v4660_v38  ;;  %v4771_v53 = vpop.f32.mrf.mxu0  ;;  %v1877_v17 = vld [vmem:[#allocation6 + $0xcf0] sm:$0xff] }
 0x1fe   : > { %1964 = vmatpush.msrb.mxu0 %v1797_v25  ;;  %1900 = vmatpush.msra.mxu1 %v1781_v39  ;;  %v1871_v25 = vld [vmem:[#allocation6 + $0xcc0] sm:$0xff] }
 0x1ff   : > { %1670 = vmatpush.msrb.mxu3 %v1085_v52  ;;  %1926 = vmatpush.msra.mxu2 %v1820_v19  ;;  %v1758_v52 = vld [vmem:[#allocation6 + $0x938] sm:$0xff]  ;;  %v1843_v39 = vld [vmem:[#allocation6 + $0xbe0] sm:$0xff]  ;;  %v1800_v19 = vld [vmem:[#allocation6 + $0xa88] sm:$0xff] }
 0x200   : > { %1965 = vmatpush.msrb.mxu0 %v1794_v26  ;;  %1901 = vmatpush.msra.mxu1 %v1778_v44  ;;  %v1752_v26 = vld [vmem:[#allocation6 + $0x908] sm:$0xff]  ;;  %v1818_v44 = vld [vmem:[#allocation6 + $0xb18] sm:$0xff] }
 0x201   : > { %1671 = vmatpush.msrb.mxu3 %v1082_v56  ;;  %1927 = vmatpush.msra.mxu2 %v1817_v12  ;;  %v1830_v56 = vld [vmem:[#allocation6 + $0xb78] sm:$0xff] }
 0x202   : > { %1966 = vmatpush.msrb.mxu0 %v1791_v29  ;;  %1902 = vmatpush.msra.mxu1 %v1775_v46  ;;  %v1805_v29 = vld [vmem:[#allocation6 + $0xab0] sm:$0xff]  ;;  %v1799_v46 = vld [vmem:[#allocation6 + $0xa80] sm:$0xff] }
 0x203   : > { %1672 = vmatpush.msrb.mxu3 %v1079_v20  ;;  %4061 = vmatmul.msk.f32.vlgmr.msrb.gmra.mxu1 %vm522_vm1, %v4660_v38  ;;  %v4773_v3 = vpop.f32.mrf.mxu1  ;;  %v1811_v20 = vld [vmem:[#allocation6 + $0xae0] sm:$0xff] }
 0x204   : > { %1967 = vmatpush.msrb.mxu0 %v1788_v33  ;;  %1903 = vmatpush.msra.mxu1 %v1772_v48  ;;  %v1815_v48 = vld [vmem:[#allocation6 + $0xb00] sm:$0xff] }
 0x205   : > { %1673 = vmatpush.msrb.mxu3 %v1076_v21  ;;  %4060 = vmatmul.msk.f32.gmra.mxu0 %vm522_vm1, %v4669_v43  ;;  %v4775_v4 = vpop.f32.mrf.mxu0  ;;  %v1874_v21 = vld [vmem:[#allocation6 + $0xcd8] sm:$0xff] }
 0x206   : > { %1674 = vmatmul.f32.vlgmr.msrb.gmra.mxu3 %v4747_v0  ;;  %1968 = vmatpush.msrb.mxu0 %v1785_v40  ;;  %v1889_v0 = vld [vmem:[#allocation6 + $0xd50] sm:$0xff]  ;;  %v1802_v40 = vld [vmem:[#allocation6 + $0xa98] sm:$0xff] }
 0x207   : > { %1904 = vmatpush.msra.mxu1 %v1769_v49  ;;  %1941 = vmatpush.msra.mxu3 %v1892_v60  ;;  %v1893_v49 = vld [vmem:[#allocation6 + $0xd70] sm:$0xff]  ;;  %v1887_v60 = vld [vmem:[#allocation6 + $0xd40] sm:$0xff] }
 0x208   : > { %1969 = vmatpush.msrb.mxu0 %v1782_v45  ;;  %1928 = vmatpush.msra.mxu2 %v1814_v16  ;;  %v1840_v45 = vld [vmem:[#allocation6 + $0xbc8] sm:$0xff] }
 0x209   : > { %1905 = vmatpush.msra.mxu1 %v1766_v36  ;;  %1942 = vmatpush.msra.mxu3 %v1889_v0  ;;  %v1837_v36 = vld [vmem:[#allocation6 + $0xbb0] sm:$0xff]  ;;  %v1884_v0 = vld [vmem:[#allocation6 + $0xd28] sm:$0xff] }
 0x20a   : > { %1970 = vmatpush.msrb.mxu0 %v1779_v47  ;;  %1929 = vmatpush.msra.mxu2 %v1811_v20  ;;  %v1862_v47 = vld [vmem:[#allocation6 + $0xc78] sm:$0xff]  ;;  %v1869_v20 = vld [vmem:[#allocation6 + $0xcb0] sm:$0xff] }
 0x20b   : > { %4062 = vmatmul.msk.f32.gmra.mxu1 %vm522_vm1, %v4669_v43  ;;  %1943 = vmatpush.msra.mxu3 %v1886_v35  ;;  %v1881_v35 = vld [vmem:[#allocation6 + $0xd10] sm:$0xff] }
 0x20c   : > { %1906 = vmatpush.msra.mxu1 %v1763_v50  ;;  %1971 = vmatpush.msrb.mxu0 %v1776_v57  ;;  %v4777_v14 = vpop.f32.mrf.mxu1  ;;  %v1859_v50 = vld [vmem:[#allocation6 + $0xc60] sm:$0xff]  ;;  %v1809_v57 = vld [vmem:[#allocation6 + $0xad0] sm:$0xff] }
 0x20d   : > { %4063 = vmatmul.msk.f32.vlgmr.msra.gmra.mxu0 %vm522_vm1, %v4660_v38  ;;  %1944 = vmatpush.msra.mxu3 %v1883_v8  ;;  %v1878_v8 = vld [vmem:[#allocation6 + $0xcf8] sm:$0xff] }
 0x20e   : > { %1677 = vmatmul.f32.gmra.mxu3 %v975_v9  ;;  %1907 = vmatpush.msra.mxu1 %v1760_v31  ;;  %v1764_v9 = vld [vmem:[#allocation6 + $0x968] sm:$0xff] }
 0x20f   : > { %1972 = vmatpush.msrb.mxu0 %v1773_v61  ;;  %1945 = vmatpush.msra.mxu3 %v1880_v13  ;;  %v1812_v31 = vld [vmem:[#allocation6 + $0xae8] sm:$0xff]  ;;  %v1831_v61 = vld [vmem:[#allocation6 + $0xb80] sm:$0xff] }
 0x210   : > { %1908 = vmatpush.msra.mxu1 %v1757_v51  ;;  %1930 = vmatpush.msra.mxu2 %v1808_v24  ;;  %v1890_v51 = vld [vmem:[#allocation6 + $0xd58] sm:$0xff]  ;;  %v1875_v13 = vld [vmem:[#allocation6 + $0xce0] sm:$0xff] }
 0x211   : > { %1973 = vmatpush.msrb.mxu0 %v1770_v1  ;;  %1946 = vmatpush.msra.mxu3 %v1877_v17  ;;  %v1828_v1 = vld [vmem:[#allocation6 + $0xb68] sm:$0xff]  ;;  %v1786_v24 = vld [vmem:[#allocation6 + $0xa18] sm:$0xff] }
 0x212   : > { %1909 = vmatpush.msra.mxu1 %v1754_v54  ;;  %1931 = vmatpush.msra.mxu2 %v1805_v29  ;;  %v1834_v54 = vld [vmem:[#allocation6 + $0xb98] sm:$0xff]  ;;  %v1872_v17 = vld [vmem:[#allocation6 + $0xcc8] sm:$0xff]  ;;  %v1807_v29 = vld [vmem:[#allocation6 + $0xac0] sm:$0xff] }
 0x213   : > { %1974 = vmatpush.msrb.mxu0 %v1767_v6  ;;  %1947 = vmatpush.msra.mxu3 %v1874_v21  ;;  %v1825_v6 = vld [vmem:[#allocation6 + $0xb50] sm:$0xff] }
 0x214   : > { %1910 = vmatpush.msra.mxu1 %v1751_v58  ;;  %1932 = vmatpush.msra.mxu2 %v1802_v40  ;;  %v1789_v21 = vld [vmem:[#allocation6 + $0xa30] sm:$0xff]  ;;  %v1804_v40 = vld [vmem:[#allocation6 + $0xaa8] sm:$0xff] }
 0x215   : > { %4064 = vmatmul.msk.f32.gmra.mxu0 %vm522_vm1, %v4669_v43  ;;  %1948 = vmatpush.msra.mxu3 %v1871_v25  ;;  %v1810_v25 = vld [vmem:[#allocation6 + $0xad8] sm:$0xff] }
 0x216   : > { %1987 = vmatpush.msrb.mxu1 %v1845_v62  ;;  %1975 = vmatpush.msrb.mxu0 %v1764_v9  ;;  %v1853_v62 = vld [vmem:[#allocation6 + $0xc30] sm:$0xff]  ;;  %v1798_v9 = vld [vmem:[#allocation6 + $0xa78] sm:$0xff] }
 0x217   : > { %1949 = vmatpush.msra.mxu3 %v1868_v30  ;;  %1933 = vmatpush.msra.mxu2 %v1799_v46  ;;  %v1854_v46 = vld [vmem:[#allocation6 + $0xc38] sm:$0xff] }
 0x218   : > { %1988 = vmatpush.msrb.mxu1 %v1842_v2  ;;  %1976 = vmatpush.msrb.mxu0 %v1761_v37  ;;  %v1850_v2 = vld [vmem:[#allocation6 + $0xc18] sm:$0xff]  ;;  %v1795_v37 = vld [vmem:[#allocation6 + $0xa60] sm:$0xff] }
 0x219   : > { %1950 = vmatpush.msra.mxu3 %v1865_v42  ;;  %2010 = vmatpush.msrb.mxu2 %v1893_v49  ;;  %v1857_v42 = vld [vmem:[#allocation6 + $0xc50] sm:$0xff]  ;;  %v1851_v49 = vld [vmem:[#allocation6 + $0xc20] sm:$0xff] }
 0x21a   : > { %1989 = vmatpush.msrb.mxu1 %v1839_v7  ;;  %1977 = vmatpush.msrb.mxu0 %v1758_v52  ;;  %v1847_v7 = vld [vmem:[#allocation6 + $0xc00] sm:$0xff]  ;;  %v1792_v52 = vld [vmem:[#allocation6 + $0xa48] sm:$0xff] }
 0x21b   : > { %1951 = vmatpush.msra.mxu3 %v1862_v47  ;;  %2011 = vmatpush.msrb.mxu2 %v1890_v51  ;;  %v1774_v47 = vld [vmem:[#allocation6 + $0x9b8] sm:$0xff]  ;;  %v1768_v51 = vld [vmem:[#allocation6 + $0x988] sm:$0xff] }
 0x21c   : > { %1990 = vmatpush.msrb.mxu1 %v1836_v11  ;;  %1978 = vmatpush.msrb.mxu0 %v1755_v22  ;;  %v1822_v11 = vld [vmem:[#allocation6 + $0xb38] sm:$0xff]  ;;  %v1813_v22 = vld [vmem:[#allocation6 + $0xaf0] sm:$0xff] }
 0x21d   : > { %1952 = vmatpush.msra.mxu3 %v1859_v50  ;;  %2012 = vmatpush.msrb.mxu2 %v1887_v60 }
 0x21e   : > { %v4779_v15 = vpop.f32.mrf.mxu0  ;;  %1991 = vmatpush.msrb.mxu1 %v1833_v41  ;;  %1979 = vmatpush.msrb.mxu0 %v1752_v26  ;;  %v1819_v41 = vld [vmem:[#allocation6 + $0xb20] sm:$0xff] }
 0x21f   : > { %1953 = vmatpush.msra.mxu3 %v1856_v55  ;;  %2013 = vmatpush.msrb.mxu2 %v1884_v0  ;;  %v1762_v55 = vld [vmem:[#allocation6 + $0x958] sm:$0xff]  ;;  %v1891_v0 = vld [vmem:[#allocation6 + $0xd60] sm:$0xff] }
 0x220   : > { %1992 = vmatpush.msrb.mxu1 %v1830_v56  ;;  %2056 = vmatpush.msra.mxu0 %v1846_v28  ;;  %v1816_v56 = vld [vmem:[#allocation6 + $0xb08] sm:$0xff]  ;;  %v1783_v28 = vld [vmem:[#allocation6 + $0xa00] sm:$0xff] }
 0x221   : > { %1954 = vmatpush.msra.mxu3 %v1853_v62  ;;  %2014 = vmatpush.msrb.mxu2 %v1881_v35  ;;  %v1756_v62 = vld [vmem:[#allocation6 + $0x928] sm:$0xff] }
 0x222   : > { %1993 = vmatpush.msrb.mxu1 %v1827_v23  ;;  %2057 = vmatpush.msra.mxu0 %v1843_v39  ;;  %v1866_v23 = vld [vmem:[#allocation6 + $0xc98] sm:$0xff]  ;;  %v1780_v39 = vld [vmem:[#allocation6 + $0x9e8] sm:$0xff] }
 0x223   : > { %1955 = vmatpush.msra.mxu3 %v1850_v2  ;;  %2015 = vmatpush.msrb.mxu2 %v1878_v8  ;;  %v1888_v2 = vld [vmem:[#allocation6 + $0xd48] sm:$0xff] }
 0x224   : > { %v4781_v33 = vpop.f32.mrf.mxu1  ;;  %1994 = vmatpush.msrb.mxu1 %v1824_v27  ;;  %2058 = vmatpush.msra.mxu0 %v1840_v45  ;;  %v1863_v27 = vld [vmem:[#allocation6 + $0xc80] sm:$0xff]  ;;  %v1801_v45 = vld [vmem:[#allocation6 + $0xa90] sm:$0xff]  ;;  %v1876_v8 = vld [vmem:[#allocation6 + $0xce8] sm:$0xff] }
 0x225   : > { %1956 = vmatpush.msra.mxu3 %v1847_v7  ;;  %2016 = vmatpush.msrb.mxu2 %v1875_v13  ;;  %v1870_v13 = vld [vmem:[#allocation6 + $0xcb8] sm:$0xff] }
 0x226   : > { %v4783_v34 = vpop.f32.mrf.mxu0  ;;  %1995 = vmatpush.msrb.mxu1 %v1821_v32  ;;  %2059 = vmatpush.msra.mxu0 %v1837_v36  ;;  %v1860_v32 = vld [vmem:[#allocation6 + $0xc68] sm:$0xff]  ;;  %v1771_v36 = vld [vmem:[#allocation6 + $0x9a0] sm:$0xff] }
 0x227   : > { %2033 = vmatpush.msrb.mxu3 %v1798_v9  ;;  %2017 = vmatpush.msrb.mxu2 %v1872_v17  ;;  %v1873_v9 = vld [vmem:[#allocation6 + $0xcd0] sm:$0xff]  ;;  %v1864_v17 = vld [vmem:[#allocation6 + $0xc88] sm:$0xff] }
 0x228   : > { %1996 = vmatpush.msrb.mxu1 %v1818_v44  ;;  %2060 = vmatpush.msra.mxu0 %v1834_v54  ;;  %v1777_v44 = vld [vmem:[#allocation6 + $0x9d0] sm:$0xff] }
 0x229   : > { %2034 = vmatpush.msrb.mxu3 %v1795_v37  ;;  %2018 = vmatpush.msrb.mxu2 %v1869_v20  ;;  %v1765_v54 = vld [vmem:[#allocation6 + $0x970] sm:$0xff] }
 0x22a   : > { %1997 = vmatpush.msrb.mxu1 %v1815_v48  ;;  %2061 = vmatpush.msra.mxu0 %v1831_v61  ;;  %v1894_v61 = vld [vmem:[#allocation6 + $0xd78] sm:$0xff] }
 0x22b   : > { %2035 = vmatpush.msrb.mxu3 %v1792_v52  ;;  %2019 = vmatpush.msrb.mxu2 %v1866_v23  ;;  %v1861_v52 = vld [vmem:[#allocation6 + $0xc70] sm:$0xff] }
 0x22c   : > { %1998 = vmatpush.msrb.mxu1 %v1812_v31  ;;  %v4785_v58 = vpop.f32.mrf.mxu1  ;;  %2062 = vmatpush.msra.mxu0 %v1828_v1  ;;  %v1848_v31 = vld [vmem:[#allocation6 + $0xc08] sm:$0xff]  ;;  %v1753_v1 = vld [vmem:[#allocation6 + $0x910] sm:$0xff] }
 0x22d   : > { %2036 = vmatpush.msrb.mxu3 %v1789_v21  ;;  %2020 = vmatpush.msrb.mxu2 %v1863_v27  ;;  %v1855_v21 = vld [vmem:[#allocation6 + $0xc40] sm:$0xff]  ;;  %v1849_v23 = vld [vmem:[#allocation6 + $0xc10] sm:$0xff] }
 0x22e   : > { %1999 = vmatpush.msrb.mxu1 %v1809_v57  ;;  %2063 = vmatpush.msra.mxu0 %v1825_v6  ;;  %v1759_v57 = vld [vmem:[#allocation6 + $0x940] sm:$0xff]  ;;  %v1882_v6 = vld [vmem:[#allocation6 + $0xd18] sm:$0xff] }
 0x22f   : > { %2037 = vmatpush.msrb.mxu3 %v1786_v24  ;;  %2021 = vmatpush.msrb.mxu2 %v1860_v32  ;;  %v2382_v24 = vld [vmem:[#allocation9 + $0x5f0] sm:$0xff]  ;;  %v2376_v27 = vld [vmem:[#allocation9 + $0x5c0] sm:$0xff]  ;;  %v2367_v32 = vld [vmem:[#allocation9 + $0x578] sm:$0xff] }
 0x230   : > { %2000 = vmatpush.msrb.mxu1 %v1806_v63  ;;  %2064 = vmatpush.msra.mxu0 %v1822_v11 }
 0x231   : > { %2038 = vmatpush.msrb.mxu3 %v1783_v28  ;;  %2022 = vmatpush.msrb.mxu2 %v1857_v42  ;;  %v2373_v28 = vld [vmem:[#allocation9 + $0x5a8] sm:$0xff] }
 0x232   : > { %2001 = vmatpush.msrb.mxu1 %v1803_v5  ;;  %2065 = vmatpush.msra.mxu0 %v1819_v41  ;;  %v1885_v5 = vld [vmem:[#allocation6 + $0xd30] sm:$0xff]  ;;  %v1867_v41 = vld [vmem:[#allocation6 + $0xca0] sm:$0xff] }
 0x233   : > { %2039 = vmatpush.msrb.mxu3 %v1780_v39  ;;  %2023 = vmatpush.msrb.mxu2 %v1854_v46  ;;  %v4803_v39 = vpop.f32.mrf.mxu2  ;;  %v2361_v42 = vld [vmem:[#allocation9 + $0x548] sm:$0xff]  ;;  %v1307_v46 = vpop.f32.mrf.mxu3 }
 0x234   : > { %2002 = vmatpush.msrb.mxu1 %v1800_v19  ;;  %2066 = vmatpush.msra.mxu0 %v1816_v56  ;;  %v1879_v19 = vld [vmem:[#allocation6 + $0xd00] sm:$0xff]  ;;  %v1858_v56 = vld [vmem:[#allocation6 + $0xc58] sm:$0xff] }
 0x235   : > { %2040 = vmatpush.msrb.mxu3 %v1777_v44  ;;  %2024 = vmatpush.msrb.mxu2 %v1851_v49  ;;  %v2358_v44 = vld [vmem:[#allocation9 + $0x530] sm:$0xff] }
 0x236   : > { %2067 = vmatpush.msra.mxu0 %v1813_v22  ;;  %v1852_v22 = vld [vmem:[#allocation6 + $0xc28] sm:$0xff] }
 0x237   : > { %2041 = vmatpush.msrb.mxu3 %v1774_v47  ;;  %2025 = vmatpush.msrb.mxu2 %v1848_v31 }
 0x238   : > { %2068 = vmatpush.msra.mxu0 %v1810_v25  ;;  %v2379_v25 = vld [vmem:[#allocation9 + $0x5d8] sm:$0xff] }
 0x239   : > { %2042 = vmatpush.msrb.mxu3 %v1771_v36 }
 0x23a   : > { %2069 = vmatpush.msra.mxu0 %v1807_v29  ;;  %v2370_v29 = vld [vmem:[#allocation9 + $0x590] sm:$0xff] }
 0x23b   : > { %2043 = vmatpush.msrb.mxu3 %v1768_v51  ;;  %v4809_v49 = vpop.f32.mrf.mxu3 }
 0x23c   : > { %2070 = vmatpush.msra.mxu0 %v1804_v40  ;;  %v2364_v40 = vld [vmem:[#allocation9 + $0x560] sm:$0xff] }
 0x23d   : > { %2044 = vmatpush.msrb.mxu3 %v1765_v54 }
 0x23e   : > { %2071 = vmatpush.msra.mxu0 %v1801_v45  ;;  %v4805_v45 = vpop.f32.mrf.mxu2 }
 0x23f   : > { %2045 = vmatpush.msrb.mxu3 %v1762_v55 }
 0x241   : > { %2046 = vmatpush.msrb.mxu3 %v1759_v57 }
 0x243   : > { %2047 = vmatpush.msrb.mxu3 %v1756_v62  ;;  %v4813_v31 = vpop.f32.mrf.mxu3  ;;  %v2352_v62 = vld [vmem:[#allocation9 + $0x500] sm:$0xff] }
 0x245   : > { %2048 = vmatpush.msrb.mxu3 %v1753_v1 }
 0x246   : > { %v4807_v47 = vpop.f32.mrf.mxu2 }
 0x24b   : > { %v4817_v54 = vpop.f32.mrf.mxu3 }
 0x24e   : > { %v4811_v36 = vpop.f32.mrf.mxu2 }
 0x256   : > { %v4815_v51 = vpop.f32.mrf.mxu2 }
 0x258   : > { %v4787_v59 = vpop.f32.mrf.mxu0 }
 0x25e   : > { %v4789_v12 = vpop.f32.mrf.mxu1  ;;  %v4819_v57 = vpop.f32.mrf.mxu2 }
 0x262   : > { %v4791_v16 = vpop.f32.mrf.mxu0 }
 0x266   : > { %v1491_v55 = vpop.f32.mrf.mxu3  ;;  %v4821_v1 = vpop.f32.mrf.mxu2 }
 0x268   : > { %v4793_v26 = vpop.f32.mrf.mxu1 }
 0x26a   : > { %v4795_v30 = vpop.f32.mrf.mxu0 }
 0x270   : > { %v4797_v48 = vpop.f32.mrf.mxu1 }
 0x272   : > { %v4799_v50 = vpop.f32.mrf.mxu0 }
 0x278   : > { %v4801_v60 = vpop.f32.mrf.mxu1 }
 0x27a   : > { %v1698_v63 = vpop.f32.mrf.mxu0 }
 0x27b   : > { %1911 = vmatmul.f32.vlgmr.msra.gmra.mxu1 %v1698_v63  ;;  %1980 = vmatmul.f32.vlgmr.msrb.gmra.mxu0 %v1698_v63 }
 0x27c   : > { %2079 = vmatpush.msra.mxu1 %v1894_v61  ;;  %v2355_v61 = vld [vmem:[#allocation9 + $0x518] sm:$0xff] }
 0x27e   : > { %2080 = vmatpush.msra.mxu1 %v1891_v0  ;;  %v2346_v0 = vld [vmem:[#allocation9 + $0x4d0] sm:$0xff] }
 0x280   : > { %v1721_v35 = vpop.f32.mrf.mxu1  ;;  %2081 = vmatpush.msra.mxu1 %v1888_v2  ;;  %v1494_v2 = vpop.f32.mrf.mxu3 }
 0x281   : > { %1934 = vmatmul.f32.vlgmr.msra.gmra.mxu2 %v1721_v35 }
 0x282   : > { %v1701_v7 = vpop.f32.mrf.mxu0  ;;  %2082 = vmatpush.msra.mxu1 %v1885_v5  ;;  %v2343_v5 = vld [vmem:[#allocation9 + $0x4b8] sm:$0xff] }
 0x283   : > { %1914 = vmatmul.f32.gmra.mxu1 %v1701_v7  ;;  %1983 = vmatmul.f32.gmra.mxu0 %v1701_v7 }
 0x284   : > { %2083 = vmatpush.msra.mxu1 %v1882_v6  ;;  %v2337_v6 = vld [vmem:[#allocation9 + $0x488] sm:$0xff] }
 0x286   : > { %2084 = vmatpush.msra.mxu1 %v1879_v19  ;;  %v4823_v19 = vpop.f32.mrf.mxu2 }
 0x288   : > { %v1724_v11 = vpop.f32.mrf.mxu1  ;;  %2085 = vmatpush.msra.mxu1 %v1876_v8  ;;  %v4825_v8 = vpop.f32.mrf.mxu3 }
 0x289   : > { %1937 = vmatmul.f32.gmra.mxu2 %v1724_v11 }
 0x28a   : > { %v1744_v37 = vpop.f32.mrf.mxu0  ;;  %2086 = vmatpush.msra.mxu1 %v1873_v9  ;;  %v2428_v9 = vld [vmem:[#allocation9 + $0x760] sm:$0xff] }
 0x28b   : > { %1957 = vmatmul.f32.vlgmr.msra.gmra.mxu3 %v1744_v37  ;;  %2003 = vmatmul.f32.vlgmr.msrb.gmra.mxu1 %v1721_v35 }
 0x28c   : > { %2072 = vmatmul.f32.vlgmr.msra.gmra.mxu0 %v1721_v35  ;;  %2087 = vmatpush.msra.mxu1 %v1870_v13  ;;  %v2340_v35 = vld [vmem:[#allocation9 + $0x4a0] sm:$0xff]  ;;  %v2422_v13 = vld [vmem:[#allocation9 + $0x730] sm:$0xff] }
 0x28e   : > { %2088 = vmatpush.msra.mxu1 %v1867_v41 }
 0x290   : > { %2089 = vmatpush.msra.mxu1 %v1864_v17  ;;  %v4829_v41 = vpop.f32.mrf.mxu3  ;;  %v2419_v17 = vld [vmem:[#allocation9 + $0x718] sm:$0xff] }
 0x291   : > { %2026 = vmatmul.f32.vlgmr.msrb.gmra.mxu2 %v1744_v37 }
 0x292   : > { %v1747_v20 = vpop.f32.mrf.mxu0  ;;  %2090 = vmatpush.msra.mxu1 %v1861_v52  ;;  %v2416_v52 = vld [vmem:[#allocation9 + $0x700] sm:$0xff] }
 0x293   : > { %1960 = vmatmul.f32.gmra.mxu3 %v1747_v20  ;;  %2006 = vmatmul.f32.gmra.mxu1 %v1724_v11 }
 0x294   : > { %2075 = vmatmul.f32.gmra.mxu0 %v1724_v11  ;;  %2091 = vmatpush.msra.mxu1 %v1858_v56  ;;  %v2425_v11 = vld [vmem:[#allocation9 + $0x748] sm:$0xff] }
 0x295   : > { %v2413_v56 = vld [vmem:[#allocation9 + $0x6e8] sm:$0xff] }
 0x296   : > { %2092 = vmatpush.msra.mxu1 %v1855_v21  ;;  %v2410_v21 = vld [vmem:[#allocation9 + $0x6d0] sm:$0xff] }
 0x298   : > { %2093 = vmatpush.msra.mxu1 %v1852_v22  ;;  %v2407_v22 = vld [vmem:[#allocation9 + $0x6b8] sm:$0xff] }
 0x299   : > { %2029 = vmatmul.f32.gmra.mxu2 %v1747_v20 }
 0x29a   : > { %2094 = vmatpush.msra.mxu1 %v1849_v23  ;;  %v2404_v23 = vld [vmem:[#allocation9 + $0x6a0] sm:$0xff] }
 0x29b   : > { %2049 = vmatmul.f32.vlgmr.msrb.gmra.mxu3 %v1698_v63  ;;  %2095 = vmatmul.f32.vlgmr.msra.gmra.mxu1 %v1744_v37  ;;  %v2349_v63 = vld [vmem:[#allocation9 + $0x4e8] sm:$0xff]  ;;  %v4827_v37 = vpop.f32.mrf.mxu2 }
 0x29c   : > { %2549 = vmatpush.msrb.mxu1 %v2382_v24 }
 0x29e   : > { %2550 = vmatpush.msrb.mxu1 %v2379_v25  ;;  %v4833_v25 = vpop.f32.mrf.mxu3 }
 0x2a0   : > { %2551 = vmatpush.msrb.mxu1 %v2376_v27  ;;  %v2401_v27 = vld [vmem:[#allocation9 + $0x688] sm:$0xff] }
 0x2a2   : > { %2552 = vmatpush.msrb.mxu1 %v2373_v28 }
 0x2a3   : > { %2052 = vmatmul.f32.gmra.mxu3 %v1701_v7  ;;  %2098 = vmatmul.f32.gmra.mxu1 %v1747_v20  ;;  %v2431_v7 = vld [vmem:[#allocation9 + $0x778] sm:$0xff]  ;;  %v4831_v24 = vpop.f32.mrf.mxu2 }
 0x2a4   : > { %2553 = vmatpush.msrb.mxu1 %v2370_v29  ;;  %v2398_v29 = vld [vmem:[#allocation9 + $0x670] sm:$0xff] }
 0x2a6   : > { %2554 = vmatpush.msrb.mxu1 %v2367_v32  ;;  %v1308_v32 = vadd.f32 %v1307_v46, %v4803_v39 }
 0x2a8   : > { %2555 = vmatpush.msrb.mxu1 %v2364_v40  ;;  %v2395_v40 = vld [vmem:[#allocation9 + $0x658] sm:$0xff] }
 0x2aa   : > { %2556 = vmatpush.msrb.mxu1 %v2361_v42 }
 0x2ac   : > { %2557 = vmatpush.msrb.mxu1 %v2358_v44  ;;  %v2392_v44 = vld [vmem:[#allocation9 + $0x640] sm:$0xff] }
 0x2ae   : > { %2558 = vmatpush.msrb.mxu1 %v2355_v61  ;;  %v1331_v61 = vadd.f32 %v4771_v53, %v1308_v32 }
 0x2b0   : > { %2559 = vmatpush.msrb.mxu1 %v2352_v62  ;;  %v2389_v62 = vld [vmem:[#allocation9 + $0x628] sm:$0xff] }
 0x2b2   : > { %2560 = vmatpush.msrb.mxu1 %v2349_v63  ;;  %v4837_v63 = vpop.f32.mrf.mxu3 }
 0x2b4   : > { %2561 = vmatpush.msrb.mxu1 %v2346_v0  ;;  %v2386_v0 = vld [vmem:[#allocation9 + $0x610] sm:$0xff] }
 0x2b6   : > { %2562 = vmatpush.msrb.mxu1 %v2343_v5  ;;  %v1492_v5 = vadd.f32 %v1491_v55, %v1331_v61 }
 0x2b8   : > { %2563 = vmatpush.msrb.mxu1 %v2340_v35  ;;  %v1515_v46 = vadd.f32 %v4787_v59, %v1492_v5  ;;  %v1380_v59 = vadd.f32 %v4811_v36, %v4777_v14 }
 0x2ba   : > { %2564 = vmatpush.msrb.mxu1 %v2337_v6  ;;  %v1311_v6 = vadd.f32 %v4809_v49, %v4805_v45  ;;  %v1377_v45 = vadd.f32 %v4807_v47, %v4773_v3 }
 0x2bc   : > { %2641 = vmatpush.msra.mxu1 %v2431_v7  ;;  %v1334_v53 = vadd.f32 %v4775_v4, %v1311_v6 }
 0x2be   : > { %2642 = vmatpush.msra.mxu1 %v2428_v9  ;;  %v4842_v9 = vld [vmem:[#allocation7] sm:$0x7] }
 0x2c0   : > { %2643 = vmatpush.msra.mxu1 %v2425_v11 }
 0x2c2   : > { %2644 = vmatpush.msra.mxu1 %v2422_v13 }
 0x2c4   : > { %2645 = vmatpush.msra.mxu1 %v2419_v17  ;;  %v1495_v17 = vadd.f32 %v1494_v2, %v1334_v53  ;;  %v1400_v2 = vadd.f32 %v4813_v31, %v1377_v45  ;;  %v2423_v45 = vld [vmem:[#allocation9 + $0x738] sm:$0xff] }
 0x2c6   : > { %2646 = vmatpush.msra.mxu1 %v2416_v52  ;;  %v1538_v52 = vadd.f32 %v4789_v12, %v1515_v46  ;;  %v1518_v49 = vadd.f32 %v4791_v16, %v1495_v17  ;;  %v1403_v12 = vadd.f32 %v4817_v54, %v1380_v59  ;;  %v1561_v32 = vadd.f32 %v4821_v1, %v1400_v2  ;;  %v2375_v46 = vld [vmem:[#allocation9 + $0x5b8] sm:$0xff] }
 0x2c7   : > { %v2112_v2 = vperm.slane %v4842_v9, 2 }
 0x2c8   : > { %2647 = vmatpush.msra.mxu1 %v2413_v56  ;;  %v2110_v56 = vperm.slane %v4842_v9, 0  ;;  %v1564_v3 = vadd.f32 %v4823_v19, %v1403_v12  ;;  %v1541_v14 = vadd.f32 %v4793_v26, %v1518_v49  ;;  %v1584_v16 = vadd.f32 %v4825_v8, %v1561_v32 }
 0x2ca   : > { %2648 = vmatpush.msra.mxu1 %v2410_v21  ;;  %v1587_v36 = vadd.f32 %v4829_v41, %v1564_v3  ;;  %v2381_v41 = vld [vmem:[#allocation9 + $0x5e8] sm:$0xff]  ;;  %v2354_v3 = vld [vmem:[#allocation9 + $0x510] sm:$0xff] }
 0x2cc   : > { %2649 = vmatpush.msra.mxu1 %v2407_v22  ;;  %v1610_v1 = vadd.f32 %v4799_v50, %v1587_v36  ;;  %v2378_v50 = vld [vmem:[#allocation9 + $0x5d0] sm:$0xff]  ;;  %v2408_v36 = vld [vmem:[#allocation9 + $0x6c0] sm:$0xff] }
 0x2ce   : > { %2650 = vmatpush.msra.mxu1 %v2404_v23 }
 0x2d0   : > { %2651 = vmatpush.msra.mxu1 %v2401_v27 }
 0x2d2   : > { %2652 = vmatpush.msra.mxu1 %v2398_v29 }
 0x2d4   : > { %2653 = vmatpush.msra.mxu1 %v2395_v40 }
 0x2d6   : > { %2654 = vmatpush.msra.mxu1 %v2392_v44 }
 0x2d8   : > { %2655 = vmatpush.msra.mxu1 %v2389_v62  ;;  %v1607_v62 = vadd.f32 %v4795_v30, %v1584_v16  ;;  %v1446_v30 = vadd.f32 %v4781_v33, %v4779_v15  ;;  %v2429_v15 = vld [vmem:[#allocation9 + $0x768] sm:$0xff]  ;;  %v2351_v16 = vld [vmem:[#allocation9 + $0x4f8] sm:$0xff] }
 0x2da   : > { %2656 = vmatpush.msra.mxu1 %v2386_v0  ;;  %v1449_v0 = vadd.f32 %v4785_v58, %v4783_v34  ;;  %v1469_v58 = vadd.f32 %v4815_v51, %v1446_v30  ;;  %v2430_v30 = vld [vmem:[#allocation9 + $0x770] sm:$0xff] }
 0x2f8   : > { %v1912_v20 = vpop.f32.mrf.mxu1  ;;  %v1981_v35 = vpop.f32.mrf.mxu0 }
 0x300   : > { %v1915_v28 = vpop.f32.mrf.mxu1  ;;  %v1984_v22 = vpop.f32.mrf.mxu0 }
 0x304   : > { %v1935_v42 = vpop.f32.mrf.mxu2 }
 0x305   : > { %v1936_v11 = vadd.f32 %v1935_v42, %v1912_v20 }
 0x308   : > { %v2004_v39 = vpop.f32.mrf.mxu1 }
 0x309   : > { %v2005_v40 = vadd.f32 %v2004_v39, %v1981_v35  ;;  %v2111_v35 = vperm.slane %v4842_v9, 1 }
 0x30c   : > { %v1938_v7 = vpop.f32.mrf.mxu2 }
 0x30d   : > { %v1939_v27 = vadd.f32 %v1938_v7, %v1915_v28  ;;  %v2073_v28 = vpop.f32.mrf.mxu0  ;;  %v1472_v7 = vadd.f32 %v4819_v57, %v1449_v0  ;;  %v2462_v0 = vld [vmem:[#allocation9 + $0x870] sm:$0xff] }
 0x30e   : > { %v1958_v13 = vpop.f32.mrf.mxu3 }
 0x30f   : > { %v1959_v55 = vadd.f32 %v1958_v13, %v1936_v11  ;;  %v2372_v11 = vld [vmem:[#allocation9 + $0x5a0] sm:$0xff]  ;;  %v1633_v33 = vadd.f32 %v4801_v60, %v1472_v7  ;;  %v1630_v13 = vadd.f32 %v4797_v48, %v1469_v58  ;;  %v2366_v48 = vld [vmem:[#allocation9 + $0x570] sm:$0xff]  ;;  %v2427_v7 = vld [vmem:[#allocation9 + $0x758] sm:$0xff] }
 0x310   : > { %v2007_v4 = vpop.f32.mrf.mxu1  ;;  %v2387_v58 = vld [vmem:[#allocation9 + $0x618] sm:$0xff] }
 0x311   : > { %v2102_v21 = vadd.f32 %v1959_v55, %v1538_v52  ;;  %v2008_v31 = vadd.f32 %v2007_v4, %v1984_v22  ;;  %v2369_v52 = vld [vmem:[#allocation9 + $0x588] sm:$0xff]  ;;  %v2426_v55 = vld [vmem:[#allocation9 + $0x750] sm:$0xff]  ;;  %v1656_v51 = vadd.f32 %v4831_v24, %v1633_v33  ;;  %v1653_v60 = vadd.f32 %v4827_v37, %v1630_v13  ;;  %v2363_v24 = vld [vmem:[#allocation9 + $0x558] sm:$0xff] }
 0x312   : > { %v2450_v33 = vld [vmem:[#allocation9 + $0x810] sm:$0xff]  ;;  %v2421_v13 = vld [vmem:[#allocation9 + $0x728] sm:$0xff] }
 0x313   : > { %v4852_v23 = vadd.f32 %v2110_v56, %v2102_v21  ;;  %v1679_v59 = vadd.f32 %v4837_v63, %v1656_v51  ;;  %v1676_v4 = vadd.f32 %v4833_v25, %v1653_v60  ;;  %v2357_v25 = vld [vmem:[#allocation9 + $0x528] sm:$0xff]  ;;  %v2414_v63 = vld [vmem:[#allocation9 + $0x6f0] sm:$0xff]  ;;  %v2444_v51 = vld [vmem:[#allocation9 + $0x7e0] sm:$0xff] }
 0x314   : > { %v2027_v20 = vpop.f32.mrf.mxu2  ;;  %v2472_v60 = vld [vmem:[#allocation9 + $0x8c0] sm:$0xff] }
 0x315   : > { %2565 = vmatmul.f32.vlgmr.msrb.gmra.mxu1 %v4852_v23  ;;  %v2028_v44 = vadd.f32 %v2027_v20, %v2005_v40  ;;  %v2076_v17 = vpop.f32.mrf.mxu0  ;;  %v2420_v20 = vld [vmem:[#allocation9 + $0x720] sm:$0xff]  ;;  %v2474_v40 = vld [vmem:[#allocation9 + $0x8d0] sm:$0xff] }
 0x316   : > { %v1961_v29 = vpop.f32.mrf.mxu3 }
 0x317   : > { %v1962_v47 = vadd.f32 %v1961_v29, %v1939_v27  ;;  %v2103_v5 = vadd.f32 %v2028_v44, %v1607_v62  ;;  %v2360_v27 = vld [vmem:[#allocation9 + $0x540] sm:$0xff]  ;;  %v2417_v29 = vld [vmem:[#allocation9 + $0x708] sm:$0xff]  ;;  %v2471_v44 = vld [vmem:[#allocation9 + $0x8b8] sm:$0xff] }
 0x318   : > { %v2096_v26 = vpop.f32.mrf.mxu1  ;;  %v2468_v62 = vld [vmem:[#allocation9 + $0x8a0] sm:$0xff] }
 0x319   : > { %v2105_v42 = vadd.f32 %v1962_v47, %v1541_v14  ;;  %v4879_v34 = vadd.f32 %v2111_v35, %v2103_v5  ;;  %v2411_v14 = vld [vmem:[#allocation9 + $0x6d8] sm:$0xff]  ;;  %v2477_v47 = vld [vmem:[#allocation9 + $0x8e8] sm:$0xff]  ;;  %v2336_v5 = vld [vmem:[#allocation9 + $0x480] sm:$0xff] }
 0x31b   : > { %v4862_v54 = vadd.f32 %v2110_v56, %v2105_v42  ;;  %v2348_v42 = vld [vmem:[#allocation9 + $0x4e0] sm:$0xff] }
 0x31c   : > { %v2030_v61 = vpop.f32.mrf.mxu2 }
 0x31d   : > { %v2031_v19 = vadd.f32 %v2030_v61, %v2008_v31  ;;  %2136 = vmatpush.msra.mxu2 %v4862_v54  ;;  %2568 = vmatmul.f32.gmra.mxu1 %v4862_v54  ;;  %v2405_v31 = vld [vmem:[#allocation9 + $0x6a8] sm:$0xff]  ;;  %v2402_v61 = vld [vmem:[#allocation9 + $0x690] sm:$0xff] }
 0x31e   : > { %v2050_v8 = vpop.f32.mrf.mxu3 }
 0x31f   : > { %v2106_v6 = vadd.f32 %v2031_v19, %v1610_v1  ;;  %2137 = vmatpush.msra.mxu2 %v4852_v23  ;;  %v2074_v53 = vadd.f32 %v2073_v28, %v2050_v8  ;;  %v2345_v28 = vld [vmem:[#allocation9 + $0x4c8] sm:$0xff]  ;;  %v2342_v1 = vld [vmem:[#allocation9 + $0x4b0] sm:$0xff]  ;;  %v2399_v19 = vld [vmem:[#allocation9 + $0x678] sm:$0xff] }
 0x320   : > { %4065 = vmatmul.msk.f32.vlgmr.msra.gmra.mxu2 %vm522_vm1, %v4638_v10  ;;  %v2099_v22 = vpop.f32.mrf.mxu1  ;;  %v2339_v8 = vld [vmem:[#allocation9 + $0x498] sm:$0xff] }
 0x321   : > { %v4876_v39 = vadd.f32 %v2111_v35, %v2106_v6  ;;  %2480 = vmatpush.msrb.mxu2 %v2381_v41  ;;  %v2097_v21 = vadd.f32 %v2096_v26, %v2074_v53  ;;  %v2465_v26 = vld [vmem:[#allocation9 + $0x888] sm:$0xff]  ;;  %v2396_v41 = vld [vmem:[#allocation9 + $0x660] sm:$0xff]  ;;  %v2459_v6 = vld [vmem:[#allocation9 + $0x858] sm:$0xff] }
 0x322   : > { %v2393_v35 = vld [vmem:[#allocation9 + $0x648] sm:$0xff] }
 0x323   : > { %2481 = vmatpush.msrb.mxu2 %v2378_v50  ;;  %2159 = vmatpush.msra.mxu3 %v4876_v39  ;;  %v2104_v37 = vadd.f32 %v2097_v21, %v1676_v4  ;;  %v2390_v50 = vld [vmem:[#allocation9 + $0x630] sm:$0xff]  ;;  %v2453_v53 = vld [vmem:[#allocation9 + $0x828] sm:$0xff]  ;;  %v2435_v4 = vld [vmem:[#allocation9 + $0x798] sm:$0xff] }
 0x324   : > { %v2441_v21 = vld [vmem:[#allocation9 + $0x7c8] sm:$0xff] }
 0x325   : > { %2482 = vmatpush.msrb.mxu2 %v2375_v46  ;;  %2160 = vmatpush.msra.mxu3 %v4879_v34  ;;  %v4901_v9 = vadd.f32 %v2112_v2, %v2104_v37  ;;  %v2456_v46 = vld [vmem:[#allocation9 + $0x840] sm:$0xff] }
 0x326   : > { %2657 = vmatmul.f32.vlgmr.msra.gmra.mxu1 %v4879_v34  ;;  %v2053_v57 = vpop.f32.mrf.mxu3  ;;  %4067 = vmatmul.msk.f32.vlgmr.msra.gmra.mxu3 %vm522_vm1, %v4638_v10  ;;  %v2460_v37 = vld [vmem:[#allocation9 + $0x860] sm:$0xff] }
 0x327   : > { %v2077_v56 = vadd.f32 %v2076_v17, %v2053_v57  ;;  %2483 = vmatpush.msrb.mxu2 %v2372_v11  ;;  %2503 = vmatpush.msrb.mxu3 %v2429_v15  ;;  %v2424_v11 = vld [vmem:[#allocation9 + $0x740] sm:$0xff]  ;;  %v2478_v17 = vld [vmem:[#allocation9 + $0x8f0] sm:$0xff]  ;;  %v2447_v57 = vld [vmem:[#allocation9 + $0x7f8] sm:$0xff] }
 0x328   : > { %4066 = vmatmul.msk.f32.gmra.mxu2 %vm522_vm1, %v4646_v18  ;;  %v2384_v15 = vld [vmem:[#allocation9 + $0x600] sm:$0xff] }
 0x329   : > { %v2100_v49 = vadd.f32 %v2099_v22, %v2077_v56  ;;  %2484 = vmatpush.msrb.mxu2 %v2369_v52  ;;  %2504 = vmatpush.msrb.mxu3 %v2426_v55  ;;  %v2418_v52 = vld [vmem:[#allocation9 + $0x710] sm:$0xff]  ;;  %v2475_v55 = vld [vmem:[#allocation9 + $0x8d8] sm:$0xff]  ;;  %v2412_v22 = vld [vmem:[#allocation9 + $0x6e0] sm:$0xff] }
 0x32a   : > { %v2415_v56 = vld [vmem:[#allocation9 + $0x6f8] sm:$0xff] }
 0x32b   : > { %v2107_v12 = vadd.f32 %v2100_v49, %v1679_v59  ;;  %2485 = vmatpush.msrb.mxu2 %v2366_v48  ;;  %2505 = vmatpush.msrb.mxu3 %v2423_v45  ;;  %v2469_v48 = vld [vmem:[#allocation9 + $0x8a8] sm:$0xff]  ;;  %v2438_v45 = vld [vmem:[#allocation9 + $0x7b0] sm:$0xff] }
 0x32c   : > { %v2409_v59 = vld [vmem:[#allocation9 + $0x6c8] sm:$0xff]  ;;  %v2466_v49 = vld [vmem:[#allocation9 + $0x890] sm:$0xff] }
 0x32d   : > { %v4896_v32 = vadd.f32 %v2112_v2, %v2107_v12  ;;  %2486 = vmatpush.msrb.mxu2 %v2363_v24  ;;  %2506 = vmatpush.msrb.mxu3 %v2420_v20  ;;  %v2406_v24 = vld [vmem:[#allocation9 + $0x6b0] sm:$0xff]  ;;  %v2463_v20 = vld [vmem:[#allocation9 + $0x878] sm:$0xff]  ;;  %v2432_v2 = vld [vmem:[#allocation9 + $0x780] sm:$0xff] }
 0x32e   : > { %2660 = vmatmul.f32.gmra.mxu1 %v4876_v39  ;;  %4068 = vmatmul.msk.f32.gmra.mxu3 %vm522_vm1, %v4646_v18  ;;  %v2403_v12 = vld [vmem:[#allocation9 + $0x698] sm:$0xff] }
 0x32f   : > { %2487 = vmatpush.msrb.mxu2 %v2360_v27  ;;  %2507 = vmatpush.msrb.mxu3 %v2417_v29  ;;  %v2383_v27 = vld [vmem:[#allocation9 + $0x5f8] sm:$0xff]  ;;  %v2400_v29 = vld [vmem:[#allocation9 + $0x680] sm:$0xff] }
 0x330   : > { %2182 = vmatpush.msrb.mxu0 %v4896_v32 }
 0x331   : > { %2488 = vmatpush.msrb.mxu2 %v2357_v25  ;;  %2508 = vmatpush.msrb.mxu3 %v2414_v63  ;;  %v2457_v25 = vld [vmem:[#allocation9 + $0x848] sm:$0xff]  ;;  %v2380_v63 = vld [vmem:[#allocation9 + $0x5e0] sm:$0xff] }
 0x332   : > { %2183 = vmatpush.msrb.mxu0 %v4901_v9 }
 0x333   : > { %4069 = vmatmul.msk.f32.vlgmr.msrb.gmra.mxu0 %vm522_vm1, %v4638_v10  ;;  %2489 = vmatpush.msrb.mxu2 %v2354_v3  ;;  %v2397_v3 = vld [vmem:[#allocation9 + $0x668] sm:$0xff] }
 0x334   : > { %2509 = vmatpush.msrb.mxu3 %v2411_v14  ;;  %2526 = vmatpush.msra.mxu0 %v2477_v47  ;;  %v2454_v14 = vld [vmem:[#allocation9 + $0x830] sm:$0xff]  ;;  %v2377_v47 = vld [vmem:[#allocation9 + $0x5c8] sm:$0xff] }
 0x335   : > { %2490 = vmatpush.msrb.mxu2 %v2351_v16  ;;  %v2394_v16 = vld [vmem:[#allocation9 + $0x650] sm:$0xff] }
 0x336   : > { %2510 = vmatpush.msrb.mxu3 %v2408_v36  ;;  %2527 = vmatpush.msra.mxu0 %v2474_v40  ;;  %v2332_v36 = vld [vmem:[#allocation9 + $0x468] sm:$0xff]  ;;  %v2451_v40 = vld [vmem:[#allocation9 + $0x818] sm:$0xff] }
 0x337   : > { %2491 = vmatpush.msrb.mxu2 %v2348_v42  ;;  %v2374_v42 = vld [vmem:[#allocation9 + $0x5b0] sm:$0xff]  ;;  %2733 = vmatpush.msrb.mxu1 %v2332_v36 }
 0x338   : > { %2511 = vmatpush.msrb.mxu3 %v2405_v31  ;;  %2528 = vmatpush.msra.mxu0 %v2471_v44  ;;  %v2391_v31 = vld [vmem:[#allocation9 + $0x638] sm:$0xff]  ;;  %v2329_v44 = vld [vmem:[#allocation9 + $0x450] sm:$0xff] }
 0x339   : > { %2492 = vmatpush.msrb.mxu2 %v2345_v28  ;;  %v2448_v28 = vld [vmem:[#allocation9 + $0x800] sm:$0xff]  ;;  %2734 = vmatpush.msrb.mxu1 %v2329_v44  ;;  %v2281_v36 = vld [vmem:[#allocation9 + $0x2d0] sm:$0xff]  ;;  %v2278_v44 = vld [vmem:[#allocation9 + $0x2b8] sm:$0xff] }
 0x33a   : > { %2512 = vmatpush.msrb.mxu3 %v2402_v61  ;;  %2529 = vmatpush.msra.mxu0 %v2468_v62  ;;  %v2371_v61 = vld [vmem:[#allocation9 + $0x598] sm:$0xff]  ;;  %v2388_v62 = vld [vmem:[#allocation9 + $0x620] sm:$0xff] }
 0x33b   : > { %4070 = vmatmul.msk.f32.gmra.mxu0 %vm522_vm1, %v4646_v18  ;;  %2493 = vmatpush.msrb.mxu2 %v2342_v1  ;;  %v2326_v1 = vld [vmem:[#allocation9 + $0x438] sm:$0xff] }
 0x33c   : > { %2513 = vmatpush.msrb.mxu3 %v2399_v19  ;;  %2530 = vmatpush.msra.mxu0 %v2465_v26  ;;  %v2445_v19 = vld [vmem:[#allocation9 + $0x7e8] sm:$0xff]  ;;  %v2368_v26 = vld [vmem:[#allocation9 + $0x580] sm:$0xff] }
 0x33d   : > { %2494 = vmatpush.msrb.mxu2 %v2339_v8  ;;  %v2385_v8 = vld [vmem:[#allocation9 + $0x608] sm:$0xff]  ;;  %2735 = vmatpush.msrb.mxu1 %v2326_v1  ;;  %v2275_v1 = vld [vmem:[#allocation9 + $0x2a0] sm:$0xff] }
 0x33e   : > { %2514 = vmatpush.msrb.mxu3 %v2396_v41  ;;  %2531 = vmatpush.msra.mxu0 %v2462_v0  ;;  %v2323_v41 = vld [vmem:[#allocation9 + $0x420] sm:$0xff]  ;;  %v2442_v0 = vld [vmem:[#allocation9 + $0x7d0] sm:$0xff] }
 0x33f   : > { %2495 = vmatpush.msrb.mxu2 %v2336_v5  ;;  %v2365_v5 = vld [vmem:[#allocation9 + $0x568] sm:$0xff]  ;;  %2736 = vmatpush.msrb.mxu1 %v2323_v41  ;;  %v2206_v41 = vld [vmem:[#allocation9 + $0x78] sm:$0xff] }
 0x340   : > { %2515 = vmatpush.msrb.mxu3 %v2393_v35  ;;  %2532 = vmatpush.msra.mxu0 %v2459_v6  ;;  %v2320_v35 = vld [vmem:[#allocation9 + $0x408] sm:$0xff]  ;;  %v2479_v6 = vld [vmem:[#allocation9 + $0x8f8] sm:$0xff] }
 0x341   : > { %2496 = vmatmul.f32.vlgmr.msrb.gmra.mxu2 %v4852_v23  ;;  %2737 = vmatpush.msrb.mxu1 %v2320_v35  ;;  %v2269_v35 = vld [vmem:[#allocation9 + $0x270] sm:$0xff] }
 0x342   : > { %2572 = vmatpush.msra.mxu2 %v2430_v30  ;;  %2516 = vmatpush.msrb.mxu3 %v2390_v50  ;;  %v2439_v30 = vld [vmem:[#allocation9 + $0x7b8] sm:$0xff]  ;;  %v2362_v50 = vld [vmem:[#allocation9 + $0x550] sm:$0xff] }
 0x343   : > { %2533 = vmatpush.msra.mxu0 %v2456_v46  ;;  %v2317_v46 = vld [vmem:[#allocation9 + $0x3f0] sm:$0xff] }
 0x344   : > { %2573 = vmatpush.msra.mxu2 %v2427_v7  ;;  %2517 = vmatpush.msrb.mxu3 %v2387_v58  ;;  %v2476_v7 = vld [vmem:[#allocation9 + $0x8e0] sm:$0xff] }
 0x345   : > { %2534 = vmatpush.msra.mxu0 %v2453_v53  ;;  %v2436_v58 = vld [vmem:[#allocation9 + $0x7a0] sm:$0xff]  ;;  %v2359_v53 = vld [vmem:[#allocation9 + $0x538] sm:$0xff]  ;;  %2738 = vmatpush.msrb.mxu1 %v2317_v46 }
 0x346   : > { %2574 = vmatpush.msra.mxu2 %v2424_v11  ;;  %2518 = vmatpush.msrb.mxu3 %v2384_v15  ;;  %v2314_v11 = vld [vmem:[#allocation9 + $0x3d8] sm:$0xff]  ;;  %v2473_v15 = vld [vmem:[#allocation9 + $0x8c8] sm:$0xff] }
 0x347   : > { %2535 = vmatpush.msra.mxu0 %v2450_v33  ;;  %2519 = vmatmul.f32.vlgmr.msrb.gmra.mxu3 %v4879_v34  ;;  %v2433_v33 = vld [vmem:[#allocation9 + $0x788] sm:$0xff]  ;;  %v2266_v46 = vld [vmem:[#allocation9 + $0x258] sm:$0xff] }
 0x348   : > { %2575 = vmatpush.msra.mxu2 %v2421_v13  ;;  %2595 = vmatpush.msra.mxu3 %v2478_v17  ;;  %v2356_v13 = vld [vmem:[#allocation9 + $0x520] sm:$0xff]  ;;  %v2470_v17 = vld [vmem:[#allocation9 + $0x8b0] sm:$0xff] }
 0x349   : > { %2536 = vmatpush.msra.mxu0 %v2447_v57  ;;  %2499 = vmatmul.f32.gmra.mxu2 %v4862_v54  ;;  %v2236_v57 = vld [vmem:[#allocation9 + $0x168] sm:$0xff] }
 0x34a   : > { %2576 = vmatpush.msra.mxu2 %v2418_v52  ;;  %2596 = vmatpush.msra.mxu3 %v2475_v55  ;;  %v2353_v52 = vld [vmem:[#allocation9 + $0x508] sm:$0xff]  ;;  %v2467_v55 = vld [vmem:[#allocation9 + $0x898] sm:$0xff] }
 0x34b   : > { %2537 = vmatpush.msra.mxu0 %v2444_v51  ;;  %2739 = vmatpush.msrb.mxu1 %v2314_v11  ;;  %v2233_v51 = vld [vmem:[#allocation9 + $0x150] sm:$0xff]  ;;  %v2238_v11 = vld [vmem:[#allocation9 + $0x178] sm:$0xff] }
 0x34c   : > { %2577 = vmatpush.msra.mxu2 %v2415_v56  ;;  %2597 = vmatpush.msra.mxu3 %v2472_v60  ;;  %v2350_v56 = vld [vmem:[#allocation9 + $0x4f0] sm:$0xff]  ;;  %v2311_v60 = vld [vmem:[#allocation9 + $0x3c0] sm:$0xff] }
 0x34d   : > { %2538 = vmatpush.msra.mxu0 %v2441_v21  ;;  %v2464_v21 = vld [vmem:[#allocation9 + $0x880] sm:$0xff]  ;;  %2740 = vmatpush.msrb.mxu1 %v2311_v60 }
 0x34e   : > { %2578 = vmatpush.msra.mxu2 %v2412_v22  ;;  %2598 = vmatpush.msra.mxu3 %v2469_v48  ;;  %v2230_v22 = vld [vmem:[#allocation9 + $0x138] sm:$0xff]  ;;  %v2191_v60 = vld [vmem:[#allocation9] sm:$0xff] }
 0x34f   : > { %2539 = vmatpush.msra.mxu0 %v2438_v45  ;;  %2522 = vmatmul.f32.gmra.mxu3 %v4876_v39  ;;  %v2347_v48 = vld [vmem:[#allocation9 + $0x4d8] sm:$0xff]  ;;  %v2308_v45 = vld [vmem:[#allocation9 + $0x3a8] sm:$0xff] }
 0x350   : > { %2579 = vmatpush.msra.mxu2 %v2409_v59  ;;  %2599 = vmatpush.msra.mxu3 %v2466_v49  ;;  %v2461_v59 = vld [vmem:[#allocation9 + $0x868] sm:$0xff]  ;;  %v2227_v49 = vld [vmem:[#allocation9 + $0x120] sm:$0xff] }
 0x351   : > { %2540 = vmatpush.msra.mxu0 %v2435_v4  ;;  %v2344_v4 = vld [vmem:[#allocation9 + $0x4c0] sm:$0xff]  ;;  %2741 = vmatpush.msrb.mxu1 %v2308_v45 }
 0x352   : > { %2580 = vmatpush.msra.mxu2 %v2406_v24  ;;  %2600 = vmatpush.msra.mxu3 %v2463_v20  ;;  %v2458_v24 = vld [vmem:[#allocation9 + $0x850] sm:$0xff]  ;;  %v2224_v20 = vld [vmem:[#allocation9 + $0x108] sm:$0xff]  ;;  %v2251_v45 = vld [vmem:[#allocation9 + $0x1e0] sm:$0xff] }
 0x353   : > { %2541 = vmatpush.msra.mxu0 %v2432_v2  ;;  %v2341_v2 = vld [vmem:[#allocation9 + $0x4a8] sm:$0xff] }
 0x354   : > { %2542 = vmatmul.f32.vlgmr.msra.gmra.mxu0 %v4901_v9  ;;  %2581 = vmatpush.msra.mxu2 %v2403_v12  ;;  %v2305_v12 = vld [vmem:[#allocation9 + $0x390] sm:$0xff] }
 0x355   : > { %2601 = vmatpush.msra.mxu3 %v2460_v37  ;;  %2618 = vmatpush.msrb.mxu0 %v2383_v27  ;;  %v2455_v37 = vld [vmem:[#allocation9 + $0x838] sm:$0xff]  ;;  %v2221_v27 = vld [vmem:[#allocation9 + $0xf0] sm:$0xff] }
 0x356   : > { %2582 = vmatpush.msra.mxu2 %v2400_v29  ;;  %v2338_v29 = vld [vmem:[#allocation9 + $0x490] sm:$0xff]  ;;  %2742 = vmatpush.msrb.mxu1 %v2305_v12  ;;  %v2279_v12 = vld [vmem:[#allocation9 + $0x2c0] sm:$0xff] }
 0x357   : > { %2602 = vmatpush.msra.mxu3 %v2457_v25  ;;  %2619 = vmatpush.msrb.mxu0 %v2380_v63  ;;  %v2302_v25 = vld [vmem:[#allocation9 + $0x378] sm:$0xff]  ;;  %v2452_v63 = vld [vmem:[#allocation9 + $0x820] sm:$0xff] }
 0x358   : > { %2583 = vmatpush.msra.mxu2 %v2397_v3  ;;  %v2284_v3 = vld [vmem:[#allocation9 + $0x2e8] sm:$0xff]  ;;  %2743 = vmatpush.msrb.mxu1 %v2302_v25 }
 0x359   : > { %2603 = vmatpush.msra.mxu3 %v2454_v14  ;;  %2620 = vmatpush.msrb.mxu0 %v2377_v47  ;;  %v2218_v14 = vld [vmem:[#allocation9 + $0xd8] sm:$0xff]  ;;  %v2449_v47 = vld [vmem:[#allocation9 + $0x808] sm:$0xff] }
 0x35a   : > { %2584 = vmatpush.msra.mxu2 %v2394_v16  ;;  %v2299_v16 = vld [vmem:[#allocation9 + $0x360] sm:$0xff]  ;;  %v2276_v25 = vld [vmem:[#allocation9 + $0x2a8] sm:$0xff] }
 0x35b   : > { %2604 = vmatpush.msra.mxu3 %v2451_v40  ;;  %2621 = vmatpush.msrb.mxu0 %v2374_v42  ;;  %v2215_v40 = vld [vmem:[#allocation9 + $0xc0] sm:$0xff]  ;;  %v2446_v42 = vld [vmem:[#allocation9 + $0x7f0] sm:$0xff] }
 0x35c   : > { %2545 = vmatmul.f32.gmra.mxu0 %v4896_v32  ;;  %2585 = vmatpush.msra.mxu2 %v2391_v31  ;;  %v2296_v31 = vld [vmem:[#allocation9 + $0x348] sm:$0xff] }
 0x35d   : > { %2605 = vmatpush.msra.mxu3 %v2448_v28  ;;  %2622 = vmatpush.msrb.mxu0 %v2371_v61  ;;  %v2212_v28 = vld [vmem:[#allocation9 + $0xa8] sm:$0xff]  ;;  %v2443_v61 = vld [vmem:[#allocation9 + $0x7d8] sm:$0xff] }
 0x35e   : > { %2586 = vmatpush.msra.mxu2 %v2388_v62  ;;  %2744 = vmatpush.msrb.mxu1 %v2299_v16  ;;  %v2293_v62 = vld [vmem:[#allocation9 + $0x330] sm:$0xff]  ;;  %v2239_v16 = vld [vmem:[#allocation9 + $0x180] sm:$0xff] }
 0x35f   : > { %2606 = vmatpush.msra.mxu3 %v2445_v19  ;;  %2623 = vmatpush.msrb.mxu0 %v2368_v26  ;;  %v2209_v19 = vld [vmem:[#allocation9 + $0x90] sm:$0xff]  ;;  %v2440_v26 = vld [vmem:[#allocation9 + $0x7c0] sm:$0xff] }
 0x360   : > { %2587 = vmatpush.msra.mxu2 %v2385_v8  ;;  %2745 = vmatpush.msrb.mxu1 %v2296_v31  ;;  %v2272_v8 = vld [vmem:[#allocation9 + $0x288] sm:$0xff]  ;;  %v2270_v31 = vld [vmem:[#allocation9 + $0x278] sm:$0xff] }
 0x361   : > { %2607 = vmatpush.msra.mxu3 %v2442_v0  ;;  %2624 = vmatpush.msrb.mxu0 %v2365_v5  ;;  %v2437_v0 = vld [vmem:[#allocation9 + $0x7a8] sm:$0xff]  ;;  %v2290_v5 = vld [vmem:[#allocation9 + $0x318] sm:$0xff] }
 0x362   : > { %2588 = vmatmul.f32.vlgmr.msra.gmra.mxu2 %v4879_v34  ;;  %2746 = vmatpush.msrb.mxu1 %v2293_v62  ;;  %v2267_v62 = vld [vmem:[#allocation9 + $0x260] sm:$0xff] }
 0x363   : > { %2664 = vmatpush.msrb.mxu2 %v2479_v6  ;;  %2608 = vmatpush.msra.mxu3 %v2439_v30  ;;  %v2203_v6 = vld [vmem:[#allocation9 + $0x60] sm:$0xff]  ;;  %v2434_v30 = vld [vmem:[#allocation9 + $0x790] sm:$0xff] }
 0x364   : > { %2625 = vmatpush.msrb.mxu0 %v2362_v50  ;;  %v2287_v50 = vld [vmem:[#allocation9 + $0x300] sm:$0xff]  ;;  %2747 = vmatpush.msrb.mxu1 %v2290_v5  ;;  %v2201_v5 = vld [vmem:[#allocation9 + $0x50] sm:$0xff] }
 0x365   : > { %2665 = vmatpush.msrb.mxu2 %v2476_v7  ;;  %2609 = vmatpush.msra.mxu3 %v2436_v58  ;;  %v2237_v7 = vld [vmem:[#allocation9 + $0x170] sm:$0xff]  ;;  %v2200_v58 = vld [vmem:[#allocation9 + $0x48] sm:$0xff] }
 0x366   : > { %2626 = vmatpush.msrb.mxu0 %v2359_v53  ;;  %v2263_v53 = vld [vmem:[#allocation9 + $0x240] sm:$0xff]  ;;  %2748 = vmatpush.msrb.mxu1 %v2287_v50  ;;  %v2198_v50 = vld [vmem:[#allocation9 + $0x38] sm:$0xff] }
 0x367   : > { %2666 = vmatpush.msrb.mxu2 %v2473_v15  ;;  %2610 = vmatpush.msra.mxu3 %v2433_v33  ;;  %v2234_v15 = vld [vmem:[#allocation9 + $0x158] sm:$0xff]  ;;  %v2197_v33 = vld [vmem:[#allocation9 + $0x30] sm:$0xff] }
 0x368   : > { %2627 = vmatpush.msrb.mxu0 %v2356_v13  ;;  %2611 = vmatmul.f32.vlgmr.msra.gmra.mxu3 %v4901_v9  ;;  %v2260_v13 = vld [vmem:[#allocation9 + $0x228] sm:$0xff] }
 0x369   : > { %2667 = vmatpush.msrb.mxu2 %v2470_v17  ;;  %2687 = vmatpush.msrb.mxu3 %v2236_v57  ;;  %v2235_v17 = vld [vmem:[#allocation9 + $0x160] sm:$0xff] }
 0x36a   : > { %2628 = vmatpush.msrb.mxu0 %v2353_v52  ;;  %2591 = vmatmul.f32.gmra.mxu2 %v4876_v39  ;;  %v2231_v57 = vld [vmem:[#allocation9 + $0x140] sm:$0xff]  ;;  %v2194_v52 = vld [vmem:[#allocation9 + $0x18] sm:$0xff] }
 0x36b   : > { %2668 = vmatpush.msrb.mxu2 %v2467_v55  ;;  %2688 = vmatpush.msrb.mxu3 %v2233_v51  ;;  %v2257_v55 = vld [vmem:[#allocation9 + $0x210] sm:$0xff]  ;;  %v2232_v51 = vld [vmem:[#allocation9 + $0x148] sm:$0xff] }
 0x36c   : > { %2629 = vmatpush.msrb.mxu0 %v2350_v56  ;;  %2825 = vmatpush.msra.mxu1 %v2238_v11  ;;  %v2228_v56 = vld [vmem:[#allocation9 + $0x128] sm:$0xff]  ;;  %v2255_v11 = vld [vmem:[#allocation9 + $0x200] sm:$0xff] }
 0x36d   : > { %2669 = vmatpush.msrb.mxu2 %v2464_v21  ;;  %2689 = vmatpush.msrb.mxu3 %v2230_v22  ;;  %v2254_v21 = vld [vmem:[#allocation9 + $0x1f8] sm:$0xff]  ;;  %v2225_v22 = vld [vmem:[#allocation9 + $0x110] sm:$0xff] }
 0x36e   : > { %2630 = vmatpush.msrb.mxu0 %v2347_v48  ;;  %2826 = vmatpush.msra.mxu1 %v2235_v17  ;;  %v2285_v48 = vld [vmem:[#allocation9 + $0x2f0] sm:$0xff]  ;;  %v2252_v17 = vld [vmem:[#allocation9 + $0x1e8] sm:$0xff] }
 0x36f   : > { %2670 = vmatpush.msrb.mxu2 %v2461_v59  ;;  %2690 = vmatpush.msrb.mxu3 %v2227_v49  ;;  %v2229_v59 = vld [vmem:[#allocation9 + $0x130] sm:$0xff]  ;;  %v2222_v49 = vld [vmem:[#allocation9 + $0xf8] sm:$0xff] }
 0x370   : > { %2631 = vmatpush.msrb.mxu0 %v2344_v4  ;;  %2614 = vmatmul.f32.gmra.mxu3 %v4896_v32  ;;  %v2282_v4 = vld [vmem:[#allocation9 + $0x2d8] sm:$0xff] }
 0x371   : > { %2671 = vmatpush.msrb.mxu2 %v2458_v24  ;;  %2691 = vmatpush.msrb.mxu3 %v2224_v20  ;;  %v2248_v24 = vld [vmem:[#allocation9 + $0x1c8] sm:$0xff]  ;;  %v2226_v20 = vld [vmem:[#allocation9 + $0x118] sm:$0xff] }
 0x372   : > { %2632 = vmatpush.msrb.mxu0 %v2341_v2  ;;  %2827 = vmatpush.msra.mxu1 %v2232_v51  ;;  %v2219_v2 = vld [vmem:[#allocation9 + $0xe0] sm:$0xff]  ;;  %v2249_v51 = vld [vmem:[#allocation9 + $0x1d0] sm:$0xff] }
 0x373   : > { %2672 = vmatpush.msrb.mxu2 %v2455_v37  ;;  %2692 = vmatpush.msrb.mxu3 %v2221_v27  ;;  %v2245_v37 = vld [vmem:[#allocation9 + $0x1b0] sm:$0xff]  ;;  %v2223_v27 = vld [vmem:[#allocation9 + $0x100] sm:$0xff] }
 0x374   : > { %2633 = vmatpush.msrb.mxu0 %v2338_v29  ;;  %2828 = vmatpush.msra.mxu1 %v2229_v59  ;;  %v2216_v29 = vld [vmem:[#allocation9 + $0xc8] sm:$0xff]  ;;  %v2243_v59 = vld [vmem:[#allocation9 + $0x1a0] sm:$0xff] }
 0x375   : > { %2634 = vmatmul.f32.vlgmr.msrb.gmra.mxu0 %v4852_v23  ;;  %2673 = vmatpush.msrb.mxu2 %v2452_v63  ;;  %v2242_v63 = vld [vmem:[#allocation9 + $0x198] sm:$0xff] }
 0x376   : > { %2710 = vmatpush.msra.mxu0 %v2284_v3  ;;  %2693 = vmatpush.msrb.mxu3 %v2218_v14  ;;  %v2220_v3 = vld [vmem:[#allocation9 + $0xe8] sm:$0xff]  ;;  %v2213_v14 = vld [vmem:[#allocation9 + $0xb0] sm:$0xff] }
 0x377   : > { %2674 = vmatpush.msrb.mxu2 %v2449_v47  ;;  %2829 = vmatpush.msra.mxu1 %v2226_v20  ;;  %v2273_v47 = vld [vmem:[#allocation9 + $0x290] sm:$0xff]  ;;  %v2240_v20 = vld [vmem:[#allocation9 + $0x188] sm:$0xff] }
 0x378   : > { %2711 = vmatpush.msra.mxu0 %v2281_v36  ;;  %2694 = vmatpush.msrb.mxu3 %v2215_v40  ;;  %v2217_v36 = vld [vmem:[#allocation9 + $0xd0] sm:$0xff] }
 0x379   : > { %2675 = vmatpush.msrb.mxu2 %v2446_v42  ;;  %2830 = vmatpush.msra.mxu1 %v2223_v27  ;;  %v2333_v40 = vld [vmem:[#allocation9 + $0x470] sm:$0xff]  ;;  %v2210_v42 = vld [vmem:[#allocation9 + $0x98] sm:$0xff]  ;;  %v2271_v27 = vld [vmem:[#allocation9 + $0x280] sm:$0xff] }
 0x37a   : > { %2712 = vmatpush.msra.mxu0 %v2278_v44  ;;  %2695 = vmatpush.msrb.mxu3 %v2212_v28  ;;  %v2214_v44 = vld [vmem:[#allocation9 + $0xb8] sm:$0xff] }
 0x37b   : > { %2676 = vmatpush.msrb.mxu2 %v2443_v61  ;;  %2831 = vmatpush.msra.mxu1 %v2220_v3  ;;  %v2330_v28 = vld [vmem:[#allocation9 + $0x458] sm:$0xff]  ;;  %v2207_v61 = vld [vmem:[#allocation9 + $0x80] sm:$0xff]  ;;  %v2268_v3 = vld [vmem:[#allocation9 + $0x268] sm:$0xff] }
 0x37c   : > { %2713 = vmatpush.msra.mxu0 %v2275_v1  ;;  %2696 = vmatpush.msrb.mxu3 %v2209_v19  ;;  %v2211_v1 = vld [vmem:[#allocation9 + $0xa0] sm:$0xff] }
 0x37d   : > { %2637 = vmatmul.f32.gmra.mxu0 %v4862_v54  ;;  %2677 = vmatpush.msrb.mxu2 %v2440_v26  ;;  %v2327_v19 = vld [vmem:[#allocation9 + $0x440] sm:$0xff]  ;;  %v2204_v26 = vld [vmem:[#allocation9 + $0x68] sm:$0xff] }
 0x37e   : > { %2714 = vmatpush.msra.mxu0 %v2272_v8  ;;  %2697 = vmatpush.msrb.mxu3 %v2206_v41  ;;  %v2264_v8 = vld [vmem:[#allocation9 + $0x248] sm:$0xff] }
 0x37f   : > { %2678 = vmatpush.msrb.mxu2 %v2437_v0  ;;  %2832 = vmatpush.msra.mxu1 %v2217_v36  ;;  %v2208_v41 = vld [vmem:[#allocation9 + $0x88] sm:$0xff]  ;;  %v2265_v36 = vld [vmem:[#allocation9 + $0x250] sm:$0xff] }
 0x380   : > { %2715 = vmatpush.msra.mxu0 %v2269_v35  ;;  %2698 = vmatpush.msrb.mxu3 %v2203_v6  ;;  %v2324_v0 = vld [vmem:[#allocation9 + $0x428] sm:$0xff]  ;;  %v2261_v35 = vld [vmem:[#allocation9 + $0x230] sm:$0xff] }
 0x381   : > { %2679 = vmatpush.msrb.mxu2 %v2434_v30  ;;  %2833 = vmatpush.msra.mxu1 %v2214_v44  ;;  %v2205_v6 = vld [vmem:[#allocation9 + $0x70] sm:$0xff]  ;;  %v2262_v44 = vld [vmem:[#allocation9 + $0x238] sm:$0xff] }
 0x382   : > { %2716 = vmatpush.msra.mxu0 %v2266_v46  ;;  %2680 = vmatmul.f32.vlgmr.msrb.gmra.mxu2 %v4901_v9  ;;  %v2321_v30 = vld [vmem:[#allocation9 + $0x410] sm:$0xff]  ;;  %v2258_v46 = vld [vmem:[#allocation9 + $0x218] sm:$0xff] }
 0x383   : > { %2756 = vmatpush.msra.mxu2 %v2237_v7  ;;  %2699 = vmatpush.msrb.mxu3 %v2200_v58  ;;  %v2202_v7 = vld [vmem:[#allocation9 + $0x58] sm:$0xff] }
 0x384   : > { %2717 = vmatpush.msra.mxu0 %v2263_v53  ;;  %2834 = vmatpush.msra.mxu1 %v2211_v1  ;;  %v2318_v58 = vld [vmem:[#allocation9 + $0x3f8] sm:$0xff]  ;;  %v2195_v53 = vld [vmem:[#allocation9 + $0x20] sm:$0xff] }
 0x385   : > { %2757 = vmatpush.msra.mxu2 %v2234_v15  ;;  %2700 = vmatpush.msrb.mxu3 %v2197_v33  ;;  %v2199_v15 = vld [vmem:[#allocation9 + $0x40] sm:$0xff] }
 0x386   : > { %2718 = vmatpush.msra.mxu0 %v2260_v13  ;;  %2835 = vmatpush.msra.mxu1 %v2208_v41  ;;  %v2315_v33 = vld [vmem:[#allocation9 + $0x3e0] sm:$0xff]  ;;  %v2192_v13 = vld [vmem:[#allocation9 + $0x8] sm:$0xff]  ;;  %v2253_v41 = vld [vmem:[#allocation9 + $0x1f0] sm:$0xff] }
 0x387   : > { %2758 = vmatpush.msra.mxu2 %v2231_v57  ;;  %2701 = vmatpush.msrb.mxu3 %v2194_v52  ;;  %v2286_v57 = vld [vmem:[#allocation9 + $0x2f8] sm:$0xff]  ;;  %v2312_v52 = vld [vmem:[#allocation9 + $0x3c8] sm:$0xff]  ;;  %v2319_v1 = vld [vmem:[#allocation9 + $0x400] sm:$0xff] }
 0x388   : > { %2719 = vmatpush.msra.mxu0 %v2257_v55  ;;  %2836 = vmatpush.msra.mxu1 %v2205_v6  ;;  %v2196_v55 = vld [vmem:[#allocation9 + $0x28] sm:$0xff]  ;;  %v2247_v6 = vld [vmem:[#allocation9 + $0x1c0] sm:$0xff] }
 0x389   : > { %2759 = vmatpush.msra.mxu2 %v2228_v56  ;;  %2702 = vmatpush.msrb.mxu3 %v2191_v60  ;;  %v2283_v56 = vld [vmem:[#allocation9 + $0x2e0] sm:$0xff]  ;;  %v2309_v60 = vld [vmem:[#allocation9 + $0x3b0] sm:$0xff] }
 0x38a   : > { %2720 = vmatpush.msra.mxu0 %v2254_v21  ;;  %2683 = vmatmul.f32.gmra.mxu2 %v4896_v32  ;;  %v2246_v21 = vld [vmem:[#allocation9 + $0x1b8] sm:$0xff] }
 0x38b   : > { %2760 = vmatpush.msra.mxu2 %v2225_v22  ;;  %2779 = vmatpush.msra.mxu3 %v2285_v48  ;;  %v2280_v22 = vld [vmem:[#allocation9 + $0x2c8] sm:$0xff] }
 0x38c   : > { %2721 = vmatpush.msra.mxu0 %v2251_v45  ;;  %2837 = vmatpush.msra.mxu1 %v2202_v7  ;;  %v2306_v45 = vld [vmem:[#allocation9 + $0x398] sm:$0xff]  ;;  %v2295_v7 = vld [vmem:[#allocation9 + $0x340] sm:$0xff] }
 0x38d   : > { %2761 = vmatpush.msra.mxu2 %v2222_v49  ;;  %2780 = vmatpush.msra.mxu3 %v2282_v4  ;;  %v2277_v49 = vld [vmem:[#allocation9 + $0x2b0] sm:$0xff]  ;;  %v2303_v4 = vld [vmem:[#allocation9 + $0x380] sm:$0xff] }
 0x38e   : > { %2722 = vmatpush.msra.mxu0 %v2248_v24  ;;  %2838 = vmatpush.msra.mxu1 %v2199_v15  ;;  %v2193_v24 = vld [vmem:[#allocation9 + $0x10] sm:$0xff] }
 0x38f   : > { %2762 = vmatpush.msra.mxu2 %v2219_v2  ;;  %2781 = vmatpush.msra.mxu3 %v2279_v12  ;;  %v2274_v2 = vld [vmem:[#allocation9 + $0x298] sm:$0xff]  ;;  %v2300_v12 = vld [vmem:[#allocation9 + $0x368] sm:$0xff] }
 0x390   : > { %2723 = vmatpush.msra.mxu0 %v2245_v37  ;;  %2839 = vmatpush.msra.mxu1 %v2196_v55  ;;  %v2334_v37 = vld [vmem:[#allocation9 + $0x478] sm:$0xff] }
 0x391   : > { %2763 = vmatpush.msra.mxu2 %v2216_v29  ;;  %2782 = vmatpush.msra.mxu3 %v2276_v25  ;;  %v2297_v25 = vld [vmem:[#allocation9 + $0x350] sm:$0xff] }
 0x392   : > { %2724 = vmatpush.msra.mxu0 %v2242_v63  ;;  %2840 = vmatpush.msra.mxu1 %v2193_v24  ;;  %v2331_v63 = vld [vmem:[#allocation9 + $0x460] sm:$0xff]  ;;  %v3003_v24 = vld [vmem:[#allocation9 + $0xa38] sm:$0xff] }
 0x393   : > { %2764 = vmatpush.msra.mxu2 %v2213_v14  ;;  %2783 = vmatpush.msra.mxu3 %v2273_v47  ;;  %v2294_v47 = vld [vmem:[#allocation9 + $0x338] sm:$0xff] }
 0x394   : > { %2725 = vmatpush.msra.mxu0 %v2239_v16  ;;  %v2328_v16 = vld [vmem:[#allocation9 + $0x448] sm:$0xff] }
 0x395   : > { %2765 = vmatpush.msra.mxu2 %v2210_v42  ;;  %2784 = vmatpush.msra.mxu3 %v2270_v31  ;;  %v2325_v42 = vld [vmem:[#allocation9 + $0x430] sm:$0xff]  ;;  %v2288_v31 = vld [vmem:[#allocation9 + $0x308] sm:$0xff] }
 0x396   : > { %2802 = vmatpush.msrb.mxu0 %v2333_v40  ;;  %v2291_v40 = vld [vmem:[#allocation9 + $0x320] sm:$0xff] }
 0x397   : > { %2766 = vmatpush.msra.mxu2 %v2207_v61  ;;  %2785 = vmatpush.msra.mxu3 %v2267_v62  ;;  %v2322_v61 = vld [vmem:[#allocation9 + $0x418] sm:$0xff]  ;;  %v2259_v62 = vld [vmem:[#allocation9 + $0x220] sm:$0xff] }
 0x398   : > { %2803 = vmatpush.msrb.mxu0 %v2330_v28 }
 0x399   : > { %2767 = vmatpush.msra.mxu2 %v2204_v26  ;;  %2786 = vmatpush.msra.mxu3 %v2264_v8  ;;  %v2256_v26 = vld [vmem:[#allocation9 + $0x208] sm:$0xff] }
 0x39a   : > { %2804 = vmatpush.msrb.mxu0 %v2327_v19  ;;  %v2316_v8 = vld [vmem:[#allocation9 + $0x3e8] sm:$0xff] }
 0x39b   : > { %2768 = vmatpush.msra.mxu2 %v2201_v5  ;;  %2787 = vmatpush.msra.mxu3 %v2261_v35  ;;  %v2250_v5 = vld [vmem:[#allocation9 + $0x1d8] sm:$0xff] }
 0x39c   : > { %2805 = vmatpush.msrb.mxu0 %v2324_v0  ;;  %v2313_v0 = vld [vmem:[#allocation9 + $0x3d0] sm:$0xff] }
 0x39d   : > { %2769 = vmatpush.msra.mxu2 %v2198_v50  ;;  %2788 = vmatpush.msra.mxu3 %v2258_v46  ;;  %v2241_v50 = vld [vmem:[#allocation9 + $0x190] sm:$0xff]  ;;  %v2298_v46 = vld [vmem:[#allocation9 + $0x358] sm:$0xff] }
 0x39e   : > { %2806 = vmatpush.msrb.mxu0 %v2321_v30  ;;  %v2304_v30 = vld [vmem:[#allocation9 + $0x388] sm:$0xff] }
 0x39f   : > { %2770 = vmatpush.msra.mxu2 %v2195_v53  ;;  %2789 = vmatpush.msra.mxu3 %v2255_v11  ;;  %v2289_v53 = vld [vmem:[#allocation9 + $0x310] sm:$0xff] }
 0x3a0   : > { %2807 = vmatpush.msrb.mxu0 %v2318_v58  ;;  %v2292_v58 = vld [vmem:[#allocation9 + $0x328] sm:$0xff] }
 0x3a1   : > { %2771 = vmatpush.msra.mxu2 %v2192_v13  ;;  %2790 = vmatpush.msra.mxu3 %v2252_v17 }
 0x3a2   : > { %2808 = vmatpush.msrb.mxu0 %v2315_v33 }
 0x3a3   : > { %2848 = vmatpush.msrb.mxu2 %v2286_v57  ;;  %v4923_v48 = vpop.f32.mrf.mxu2  ;;  %2791 = vmatpush.msra.mxu3 %v2249_v51  ;;  %v2566_v51 = vpop.f32.mrf.mxu1 }
 0x3a4   : > { %2809 = vmatpush.msrb.mxu0 %v2312_v52  ;;  %2703 = vmatmul.f32.vlgmr.msrb.gmra.mxu3 %v4923_v48 }
 0x3a5   : > { %2849 = vmatpush.msrb.mxu2 %v2283_v56  ;;  %2792 = vmatpush.msra.mxu3 %v2246_v21 }
 0x3a6   : > { %2810 = vmatpush.msrb.mxu0 %v2309_v60  ;;  %2772 = vmatmul.f32.vlgmr.msra.gmra.mxu2 %v4923_v48 }
 0x3a7   : > { %2850 = vmatpush.msrb.mxu2 %v2280_v22  ;;  %2793 = vmatpush.msra.mxu3 %v2243_v59  ;;  %v3006_v59 = vld [vmem:[#allocation9 + $0xa50] sm:$0xff] }
 0x3a8   : > { %2811 = vmatpush.msrb.mxu0 %v2306_v45  ;;  %v3009_v45 = vld [vmem:[#allocation9 + $0xa68] sm:$0xff] }
 0x3a9   : > { %2851 = vmatpush.msrb.mxu2 %v2277_v49  ;;  %v4927_v29 = vpop.f32.mrf.mxu3  ;;  %2794 = vmatpush.msra.mxu3 %v2240_v20  ;;  %v3010_v20 = vld [vmem:[#allocation9 + $0xa70] sm:$0xff] }
 0x3aa   : > { %2812 = vmatpush.msrb.mxu0 %v2303_v4 }
 0x3ab   : > { %2852 = vmatpush.msrb.mxu2 %v2274_v2  ;;  %2871 = vmatpush.msrb.mxu3 %v2334_v37  ;;  %v4929_v14 = vpop.f32.mrf.mxu2  ;;  %v2569_v60 = vpop.f32.mrf.mxu1  ;;  %v3057_v2 = vld [vmem:[#allocation9 + $0xbe8] sm:$0xff] }
 0x3ac   : > { %2813 = vmatpush.msrb.mxu0 %v2300_v12  ;;  %2706 = vmatmul.f32.gmra.mxu3 %v4929_v14  ;;  %v3007_v12 = vld [vmem:[#allocation9 + $0xa58] sm:$0xff] }
 0x3ad   : > { %2853 = vmatpush.msrb.mxu2 %v2271_v27  ;;  %2726 = vmatmul.f32.vlgmr.msra.gmra.mxu0 %v4927_v29 }
 0x3ae   : > { %2814 = vmatpush.msrb.mxu0 %v2297_v25  ;;  %2872 = vmatpush.msrb.mxu3 %v2331_v63  ;;  %v3054_v25 = vld [vmem:[#allocation9 + $0xbd0] sm:$0xff]  ;;  %v3004_v63 = vld [vmem:[#allocation9 + $0xa40] sm:$0xff] }
 0x3af   : > { %2854 = vmatpush.msrb.mxu2 %v2268_v3 }
 0x3b0   : > { %2815 = vmatpush.msrb.mxu0 %v2294_v47  ;;  %2873 = vmatpush.msrb.mxu3 %v2328_v16  ;;  %v4933_v28 = vpop.f32.mrf.mxu0  ;;  %v2997_v16 = vld [vmem:[#allocation9 + $0xa08] sm:$0xff] }
 0x3b1   : > { %2855 = vmatpush.msrb.mxu2 %v2265_v36  ;;  %2749 = vmatmul.f32.vlgmr.msrb.gmra.mxu1 %v4933_v28  ;;  %v2165_v19 = vpop.f32.mrf.mxu3  ;;  %v3001_v36 = vld [vmem:[#allocation9 + $0xa28] sm:$0xff] }
 0x3b2   : > { %2816 = vmatpush.msrb.mxu0 %v2291_v40  ;;  %2874 = vmatpush.msrb.mxu3 %v2325_v42  ;;  %v3048_v40 = vld [vmem:[#allocation9 + $0xba0] sm:$0xff]  ;;  %v2994_v42 = vld [vmem:[#allocation9 + $0x9f0] sm:$0xff] }
 0x3b3   : > { %2775 = vmatmul.f32.gmra.mxu2 %v4929_v14  ;;  %2931 = vmatpush.msrb.mxu1 %v4876_v39  ;;  %v2307_v39 = vld [vmem:[#allocation9 + $0x3a0] sm:$0xff]  ;;  %v2658_v4 = vpop.f32.mrf.mxu1 }
 0x3b4   : > { %2817 = vmatpush.msrb.mxu0 %v2288_v31  ;;  %2856 = vmatpush.msrb.mxu2 %v2262_v44  ;;  %v2998_v31 = vld [vmem:[#allocation9 + $0xa10] sm:$0xff]  ;;  %v3045_v44 = vld [vmem:[#allocation9 + $0xb88] sm:$0xff] }
 0x3b5   : > { %2875 = vmatpush.msrb.mxu3 %v2322_v61  ;;  %2729 = vmatmul.f32.gmra.mxu0 %v2165_v19 }
 0x3b6   : > { %2908 = vmatpush.msra.mxu0 %v4862_v54  ;;  %2857 = vmatpush.msrb.mxu2 %v2259_v62  ;;  %v2310_v54 = vld [vmem:[#allocation9 + $0x3b8] sm:$0xff] }
 0x3b7   : > { %2876 = vmatpush.msrb.mxu3 %v2319_v1  ;;  %2932 = vmatpush.msrb.mxu1 %v4879_v34  ;;  %v2301_v34 = vld [vmem:[#allocation9 + $0x370] sm:$0xff]  ;;  %v2988_v1 = vld [vmem:[#allocation9 + $0x9c0] sm:$0xff] }
 0x3b8   : > { %2909 = vmatpush.msra.mxu0 %v4852_v23  ;;  %2858 = vmatpush.msrb.mxu2 %v2256_v26  ;;  %v2188_v35 = vpop.f32.mrf.mxu0  ;;  %v2244_v23 = vld [vmem:[#allocation9 + $0x1a8] sm:$0xff] }
 0x3b9   : > { %2877 = vmatpush.msrb.mxu3 %v2316_v8  ;;  %2752 = vmatmul.f32.gmra.mxu1 %v2188_v35  ;;  %v2985_v26 = vld [vmem:[#allocation9 + $0x9a8] sm:$0xff]  ;;  %v2982_v8 = vld [vmem:[#allocation9 + $0x990] sm:$0xff] }
 0x3ba   : > { %2859 = vmatpush.msrb.mxu2 %v2253_v41  ;;  %2795 = vmatmul.f32.vlgmr.msra.gmra.mxu3 %v4927_v29  ;;  %v2979_v41 = vld [vmem:[#allocation9 + $0x978] sm:$0xff] }
 0x3bb   : > { %2878 = vmatpush.msrb.mxu3 %v2313_v0  ;;  %v2661_v61 = vpop.f32.mrf.mxu1  ;;  %v2976_v0 = vld [vmem:[#allocation9 + $0x960] sm:$0xff] }
 0x3bc   : > { %2860 = vmatpush.msrb.mxu2 %v2250_v5 }
 0x3bd   : > { %2879 = vmatpush.msrb.mxu3 %v2310_v54  ;;  %2818 = vmatmul.f32.vlgmr.msrb.gmra.mxu0 %v4933_v28 }
 0x3be   : > { %2861 = vmatpush.msrb.mxu2 %v2247_v6  ;;  %2954 = vmatpush.msrb.mxu0 %v4896_v32 }
 0x3bf   : > { %2880 = vmatpush.msrb.mxu3 %v2307_v39  ;;  %v2995_v39 = vld [vmem:[#allocation9 + $0x9f8] sm:$0xff] }
 0x3c0   : > { %2862 = vmatpush.msrb.mxu2 %v2244_v23  ;;  %2955 = vmatpush.msrb.mxu0 %v4901_v9  ;;  %v2970_v23 = vld [vmem:[#allocation9 + $0x930] sm:$0xff] }
 0x3c1   : > { %2881 = vmatpush.msrb.mxu3 %v2304_v30  ;;  %2841 = vmatmul.f32.vlgmr.msra.gmra.mxu1 %v4923_v48  ;;  %v3042_v30 = vld [vmem:[#allocation9 + $0xb70] sm:$0xff] }
 0x3c2   : > { %2863 = vmatpush.msrb.mxu2 %v2241_v50  ;;  %2798 = vmatmul.f32.gmra.mxu3 %v2165_v19  ;;  %v2992_v50 = vld [vmem:[#allocation9 + $0x9e0] sm:$0xff] }
 0x3c3   : > { %2882 = vmatpush.msrb.mxu3 %v2301_v34  ;;  %2864 = vmatmul.f32.vlgmr.msrb.gmra.mxu2 %v4927_v29  ;;  %v3000_v29 = vld [vmem:[#allocation9 + $0xa20] sm:$0xff]  ;;  %v2967_v34 = vld [vmem:[#allocation9 + $0x918] sm:$0xff] }
 0x3c4   : > { %v2497_v11 = vpop.f32.mrf.mxu2  ;;  %3108 = vmatpush.msra.mxu1 %v3009_v45  ;;  %3131 = vmatpush.msra.mxu2 %v3057_v2  ;;  %v3096_v45 = vld [vmem:[#allocation9 + $0xd20] sm:$0xff]  ;;  %v3090_v2 = vld [vmem:[#allocation9 + $0xcf0] sm:$0xff] }
 0x3c5   : > { %2883 = vmatpush.msrb.mxu3 %v2298_v46  ;;  %2821 = vmatmul.f32.gmra.mxu0 %v2188_v35  ;;  %v3039_v46 = vld [vmem:[#allocation9 + $0xb58] sm:$0xff] }
 0x3c6   : > { %3109 = vmatpush.msra.mxu1 %v3006_v59  ;;  %3132 = vmatpush.msra.mxu2 %v3054_v25  ;;  %v3027_v59 = vld [vmem:[#allocation9 + $0xaf8] sm:$0xff] }
 0x3c7   : > { %2884 = vmatpush.msrb.mxu3 %v2295_v7  ;;  %v3105_v7 = vld [vmem:[#allocation9 + $0xd68] sm:$0xff]  ;;  %v2971_v25 = vld [vmem:[#allocation9 + $0x938] sm:$0xff] }
 0x3c8   : > { %3110 = vmatpush.msra.mxu1 %v3003_v24  ;;  %v3049_v24 = vld [vmem:[#allocation9 + $0xba8] sm:$0xff] }
 0x3c9   : > { %2885 = vmatpush.msrb.mxu3 %v2292_v58  ;;  %2844 = vmatmul.f32.gmra.mxu1 %v4929_v14  ;;  %v3051_v14 = vld [vmem:[#allocation9 + $0xbb8] sm:$0xff] }
 0x3ca   : > { %v2520_v32 = vpop.f32.mrf.mxu3  ;;  %3111 = vmatpush.msra.mxu1 %v3000_v29  ;;  %3133 = vmatpush.msra.mxu2 %v3051_v14  ;;  %v3087_v29 = vld [vmem:[#allocation9 + $0xcd8] sm:$0xff]  ;;  %v3040_v14 = vld [vmem:[#allocation9 + $0xb60] sm:$0xff] }
 0x3cb   : > { %2886 = vmatpush.msrb.mxu3 %v2289_v53  ;;  %2867 = vmatmul.f32.gmra.mxu2 %v2165_v19  ;;  %v2521_v15 = vadd.f32 %v2520_v32, %v2497_v11  ;;  %v2989_v53 = vld [vmem:[#allocation9 + $0x9c8] sm:$0xff]  ;;  %v2964_v11 = vld [vmem:[#allocation9 + $0x900] sm:$0xff] }
 0x3cc   : > { %2887 = vmatmul.f32.vlgmr.msrb.gmra.mxu3 %v4933_v28  ;;  %v2500_v33 = vpop.f32.mrf.mxu2  ;;  %3112 = vmatpush.msra.mxu1 %v2997_v16  ;;  %v2991_v28 = vld [vmem:[#allocation9 + $0x9d8] sm:$0xff]  ;;  %v3036_v32 = vld [vmem:[#allocation9 + $0xb40] sm:$0xff]  ;;  %v3018_v16 = vld [vmem:[#allocation9 + $0xab0] sm:$0xff] }
 0x3cd   : > { %4071 = vmatmul.msk.f32.vlgmr.msra.gmra.mxu0 %vm522_vm1, %v4660_v38  ;;  %3134 = vmatpush.msra.mxu2 %v3048_v40  ;;  %v2965_v40 = vld [vmem:[#allocation9 + $0x908] sm:$0xff] }
 0x3ce   : > { %3177 = vmatpush.msra.mxu0 %v3010_v20  ;;  %3113 = vmatpush.msra.mxu1 %v2994_v42  ;;  %v3024_v20 = vld [vmem:[#allocation9 + $0xae0] sm:$0xff]  ;;  %v3015_v42 = vld [vmem:[#allocation9 + $0xa98] sm:$0xff] }
 0x3cf   : > { %3135 = vmatpush.msra.mxu2 %v3045_v44  ;;  %3154 = vmatpush.msra.mxu3 %v3105_v7  ;;  %v3037_v44 = vld [vmem:[#allocation9 + $0xb48] sm:$0xff]  ;;  %v3066_v7 = vld [vmem:[#allocation9 + $0xc30] sm:$0xff] }
 0x3d0   : > { %3178 = vmatpush.msra.mxu0 %v3007_v12  ;;  %3114 = vmatpush.msra.mxu1 %v2991_v28  ;;  %v2974_v12 = vld [vmem:[#allocation9 + $0x950] sm:$0xff]  ;;  %v3012_v28 = vld [vmem:[#allocation9 + $0xa80] sm:$0xff] }
 0x3d1   : > { %v2543_v9 = vpop.f32.mrf.mxu0  ;;  %4073 = vmatmul.msk.f32.vlgmr.msrb.gmra.mxu1 %vm522_vm1, %v4660_v38  ;;  %3136 = vmatpush.msra.mxu2 %v3042_v30  ;;  %v3100_v30 = vld [vmem:[#allocation9 + $0xd40] sm:$0xff] }
 0x3d2   : > { %v4951_v13 = vadd.f32 %v2543_v9, %v2521_v15  ;;  %v2523_v17 = vpop.f32.mrf.mxu3  ;;  %3179 = vmatpush.msra.mxu0 %v3004_v63  ;;  %3115 = vmatpush.msra.mxu1 %v2988_v1  ;;  %v3102_v9 = vld [vmem:[#allocation9 + $0xd50] sm:$0xff]  ;;  %v3043_v63 = vld [vmem:[#allocation9 + $0xb78] sm:$0xff] }
 0x3d3   : > { %v2524_v57 = vadd.f32 %v2523_v17, %v2500_v33  ;;  %3137 = vmatpush.msra.mxu2 %v3039_v46  ;;  %3155 = vmatpush.msra.mxu3 %v3102_v9  ;;  %v2986_v33 = vld [vmem:[#allocation9 + $0x9b0] sm:$0xff]  ;;  %v3044_v9 = vld [vmem:[#allocation9 + $0xb80] sm:$0xff] }
 0x3d4   : > { %2890 = vmatmul.f32.gmra.mxu3 %v2188_v35  ;;  %3180 = vmatpush.msra.mxu0 %v3001_v36  ;;  %v2973_v35 = vld [vmem:[#allocation9 + $0x948] sm:$0xff]  ;;  %v3058_v17 = vld [vmem:[#allocation9 + $0xbf0] sm:$0xff]  ;;  %v3084_v36 = vld [vmem:[#allocation9 + $0xcc0] sm:$0xff] }
 0x3d5   : > { %4072 = vmatmul.msk.f32.gmra.mxu0 %vm522_vm1, %v4669_v43  ;;  %3116 = vmatpush.msra.mxu1 %v2985_v26  ;;  %v3034_v1 = vld [vmem:[#allocation9 + $0xb30] sm:$0xff]  ;;  %v3075_v26 = vld [vmem:[#allocation9 + $0xc78] sm:$0xff] }
 0x3d6   : > { %3181 = vmatpush.msra.mxu0 %v2998_v31  ;;  %3138 = vmatpush.msra.mxu2 %v3036_v32  ;;  %v3081_v31 = vld [vmem:[#allocation9 + $0xca8] sm:$0xff]  ;;  %v3094_v32 = vld [vmem:[#allocation9 + $0xd10] sm:$0xff] }
 0x3d7   : > { %3117 = vmatpush.msra.mxu1 %v2982_v8  ;;  %v3056_v8 = vld [vmem:[#allocation9 + $0xbe0] sm:$0xff] }
 0x3d8   : > { %3182 = vmatpush.msra.mxu0 %v2995_v39  ;;  %v3072_v39 = vld [vmem:[#allocation9 + $0xc60] sm:$0xff] }
 0x3d9   : > { %v2546_v52 = vpop.f32.mrf.mxu0  ;;  %4074 = vmatmul.msk.f32.gmra.mxu1 %vm522_vm1, %v4669_v43 }
 0x3da   : > { %v4957_v55 = vadd.f32 %v2546_v52, %v2524_v57  ;;  %3118 = vmatpush.msra.mxu1 %v2979_v41  ;;  %3183 = vmatpush.msra.mxu0 %v2992_v50  ;;  %v3033_v57 = vld [vmem:[#allocation9 + $0xb28] sm:$0xff]  ;;  %v3099_v52 = vld [vmem:[#allocation9 + $0xd38] sm:$0xff] }
 0x3db   : > { %3139 = vmatpush.msra.mxu2 %v3033_v57  ;;  %3156 = vmatpush.msra.mxu3 %v3099_v52  ;;  %v3031_v41 = vld [vmem:[#allocation9 + $0xb18] sm:$0xff]  ;;  %v3069_v50 = vld [vmem:[#allocation9 + $0xc48] sm:$0xff] }
 0x3dc   : > { %3119 = vmatpush.msra.mxu1 %v2976_v0  ;;  %3184 = vmatpush.msra.mxu0 %v2989_v53  ;;  %v3053_v0 = vld [vmem:[#allocation9 + $0xbc8] sm:$0xff]  ;;  %v3022_v53 = vld [vmem:[#allocation9 + $0xad0] sm:$0xff]  ;;  %v3063_v57 = vld [vmem:[#allocation9 + $0xc18] sm:$0xff] }
 0x3dd   : > { %4075 = vmatmul.msk.f32.vlgmr.msrb.gmra.mxu0 %vm522_vm1, %v4660_v38  ;;  %3157 = vmatpush.msra.mxu3 %v3096_v45  ;;  %v3019_v52 = vld [vmem:[#allocation9 + $0xab8] sm:$0xff]  ;;  %v3038_v45 = vld [vmem:[#allocation9 + $0xb50] sm:$0xff] }
 0x3de   : > { %3120 = vmatpush.msra.mxu1 %v2973_v35  ;;  %3185 = vmatpush.msra.mxu0 %v2986_v33  ;;  %v3103_v35 = vld [vmem:[#allocation9 + $0xd58] sm:$0xff] }
 0x3e0   : > { %3121 = vmatpush.msra.mxu1 %v2970_v23  ;;  %v3025_v23 = vld [vmem:[#allocation9 + $0xae8] sm:$0xff] }
 0x3e2   : > { %3122 = vmatpush.msra.mxu1 %v2967_v34  ;;  %v3097_v34 = vld [vmem:[#allocation9 + $0xd28] sm:$0xff] }
 0x3e4   : > { %3123 = vmatpush.msra.mxu1 %v2964_v11 }
 0x3e5   : > { %v2589_v56 = vpop.f32.mrf.mxu2  ;;  %4076 = vmatmul.msk.f32.gmra.mxu0 %vm522_vm1, %v4669_v43 }
 0x3e6   : > { %v2590_v21 = vadd.f32 %v2589_v56, %v2566_v51  ;;  %3200 = vmatpush.msrb.mxu1 %v3058_v17  ;;  %v2983_v51 = vld [vmem:[#allocation9 + $0x998] sm:$0xff] }
 0x3e7   : > { %v3055_v56 = vld [vmem:[#allocation9 + $0xbd8] sm:$0xff]  ;;  %3186 = vmatpush.msra.mxu0 %v2983_v51 }
 0x3e8   : > { %3201 = vmatpush.msrb.mxu1 %v3055_v56 }
 0x3eb   : > { %v2612_v22 = vpop.f32.mrf.mxu3 }
 0x3ec   : > { %v4965_v48 = vadd.f32 %v2612_v22, %v2590_v21  ;;  %v3052_v21 = vld [vmem:[#allocation9 + $0xbc0] sm:$0xff]  ;;  %v3030_v22 = vld [vmem:[#allocation9 + $0xb10] sm:$0xff] }
 0x3ed   : > { %v2592_v49 = vpop.f32.mrf.mxu2  ;;  %3202 = vmatpush.msrb.mxu1 %v3052_v21  ;;  %3140 = vmatpush.msra.mxu2 %v3030_v22  ;;  %v3091_v21 = vld [vmem:[#allocation9 + $0xcf8] sm:$0xff]  ;;  %v3060_v22 = vld [vmem:[#allocation9 + $0xc00] sm:$0xff] }
 0x3ee   : > { %v2593_v37 = vadd.f32 %v2592_v49, %v2569_v60  ;;  %v2980_v60 = vld [vmem:[#allocation9 + $0x980] sm:$0xff]  ;;  %v3093_v49 = vld [vmem:[#allocation9 + $0xd08] sm:$0xff] }
 0x3ef   : > { %3187 = vmatpush.msra.mxu0 %v2980_v60  ;;  %3203 = vmatpush.msrb.mxu1 %v3049_v24  ;;  %v3041_v60 = vld [vmem:[#allocation9 + $0xb68] sm:$0xff] }
 0x3f0   : > { %3141 = vmatpush.msra.mxu2 %v3027_v59  ;;  %3158 = vmatpush.msra.mxu3 %v3093_v49  ;;  %v3013_v59 = vld [vmem:[#allocation9 + $0xa88] sm:$0xff] }
 0x3f1   : > { %v3085_v24 = vld [vmem:[#allocation9 + $0xcc8] sm:$0xff] }
 0x3f2   : > { %v2635_v27 = vpop.f32.mrf.mxu0  ;;  %3142 = vmatpush.msra.mxu2 %v3024_v20  ;;  %3159 = vmatpush.msra.mxu3 %v3090_v2  ;;  %v3008_v2 = vld [vmem:[#allocation9 + $0xa60] sm:$0xff] }
 0x3f3   : > { %v2615_v3 = vpop.f32.mrf.mxu3  ;;  %v2659_v5 = vadd.f32 %v2658_v4, %v2635_v27  ;;  %v2977_v4 = vld [vmem:[#allocation9 + $0x968] sm:$0xff] }
 0x3f4   : > { %v4967_v47 = vadd.f32 %v2615_v3, %v2593_v37  ;;  %3188 = vmatpush.msra.mxu0 %v2977_v4  ;;  %v3046_v37 = vld [vmem:[#allocation9 + $0xb90] sm:$0xff]  ;;  %v3021_v27 = vld [vmem:[#allocation9 + $0xac8] sm:$0xff]  ;;  %v2968_v3 = vld [vmem:[#allocation9 + $0x920] sm:$0xff]  ;;  %3160 = vmatpush.msra.mxu3 %v3087_v29 }
 0x3f5   : > { %3204 = vmatpush.msrb.mxu1 %v3046_v37  ;;  %3143 = vmatpush.msra.mxu2 %v3021_v27  ;;  %v3088_v4 = vld [vmem:[#allocation9 + $0xce0] sm:$0xff]  ;;  %v3082_v27 = vld [vmem:[#allocation9 + $0xcb0] sm:$0xff]  ;;  %v3005_v29 = vld [vmem:[#allocation9 + $0xa48] sm:$0xff] }
 0x3f6   : > { %3189 = vmatpush.msra.mxu0 %v2974_v12  ;;  %3161 = vmatpush.msra.mxu3 %v3084_v36  ;;  %v3035_v12 = vld [vmem:[#allocation9 + $0xb38] sm:$0xff] }
 0x3f7   : > { %3205 = vmatpush.msrb.mxu1 %v3043_v63  ;;  %3144 = vmatpush.msra.mxu2 %v3018_v16  ;;  %v3032_v63 = vld [vmem:[#allocation9 + $0xb20] sm:$0xff] }
 0x3f8   : > { %3190 = vmatpush.msra.mxu0 %v2971_v25  ;;  %3162 = vmatpush.msra.mxu3 %v3081_v31 }
 0x3f9   : > { %3206 = vmatpush.msrb.mxu1 %v3040_v14  ;;  %3145 = vmatpush.msra.mxu2 %v3015_v42  ;;  %v3029_v14 = vld [vmem:[#allocation9 + $0xb08] sm:$0xff]  ;;  %v3002_v42 = vld [vmem:[#allocation9 + $0xa30] sm:$0xff] }
 0x3fa   : > { %v2638_v62 = vpop.f32.mrf.mxu0  ;;  %3191 = vmatpush.msra.mxu0 %v2968_v3 }
 0x3fb   : > { %v2662_v19 = vadd.f32 %v2661_v61, %v2638_v62  ;;  %3207 = vmatpush.msrb.mxu1 %v3037_v44  ;;  %v3078_v61 = vld [vmem:[#allocation9 + $0xc90] sm:$0xff]  ;;  %v3059_v62 = vld [vmem:[#allocation9 + $0xbf8] sm:$0xff]  ;;  %3146 = vmatpush.msra.mxu2 %v3012_v28 }
 0x3fc   : > { %3192 = vmatpush.msra.mxu0 %v2965_v40  ;;  %3163 = vmatpush.msra.mxu3 %v3078_v61  ;;  %v3079_v40 = vld [vmem:[#allocation9 + $0xc98] sm:$0xff]  ;;  %v3026_v44 = vld [vmem:[#allocation9 + $0xaf0] sm:$0xff] }
 0x3fd   : > { %3208 = vmatpush.msrb.mxu1 %v3034_v1  ;;  %v2999_v61 = vld [vmem:[#allocation9 + $0xa18] sm:$0xff] }
 0x3fe   : > { %3269 = vmatpush.msrb.mxu0 %v3059_v62  ;;  %3164 = vmatpush.msra.mxu3 %v3075_v26  ;;  %v3073_v62 = vld [vmem:[#allocation9 + $0xc68] sm:$0xff]  ;;  %v3023_v26 = vld [vmem:[#allocation9 + $0xad8] sm:$0xff] }
 0x3ff   : > { %3209 = vmatpush.msrb.mxu1 %v3031_v41  ;;  %v2993_v41 = vld [vmem:[#allocation9 + $0x9e8] sm:$0xff] }
 0x400   : > { %3270 = vmatpush.msrb.mxu0 %v3056_v8  ;;  %3165 = vmatpush.msra.mxu3 %v3072_v39  ;;  %v3070_v8 = vld [vmem:[#allocation9 + $0xc50] sm:$0xff]  ;;  %v3017_v39 = vld [vmem:[#allocation9 + $0xaa8] sm:$0xff] }
 0x402   : > { %3271 = vmatpush.msrb.mxu0 %v3053_v0  ;;  %3166 = vmatpush.msra.mxu3 %v3069_v50  ;;  %v2987_v50 = vld [vmem:[#allocation9 + $0x9b8] sm:$0xff] }
 0x404   : > { %3167 = vmatpush.msra.mxu3 %v3066_v7  ;;  %v3061_v7 = vld [vmem:[#allocation9 + $0xc08] sm:$0xff] }
 0x405   : > { %v2681_v54 = vpop.f32.mrf.mxu2 }
 0x406   : > { %v4969_v6 = vadd.f32 %v2681_v54, %v2659_v5  ;;  %v3028_v5 = vld [vmem:[#allocation9 + $0xb00] sm:$0xff]  ;;  %v3050_v54 = vld [vmem:[#allocation9 + $0xbb0] sm:$0xff]  ;;  %3168 = vmatpush.msra.mxu3 %v3063_v57 }
 0x407   : > { %3210 = vmatpush.msrb.mxu1 %v3028_v5  ;;  %3272 = vmatpush.msrb.mxu0 %v3050_v54  ;;  %v2990_v54 = vld [vmem:[#allocation9 + $0x9d0] sm:$0xff] }
 0x408   : > { %3169 = vmatpush.msra.mxu3 %v3060_v22  ;;  %v2969_v22 = vld [vmem:[#allocation9 + $0x928] sm:$0xff] }
 0x409   : > { %3211 = vmatpush.msrb.mxu1 %v3025_v23 }
 0x40b   : > { %3212 = vmatpush.msrb.mxu1 %v3022_v53 }
 0x40d   : > { %v2684_v58 = vpop.f32.mrf.mxu2  ;;  %3213 = vmatpush.msrb.mxu1 %v3019_v52 }
 0x40e   : > { %v4971_v15 = vadd.f32 %v2684_v58, %v2662_v19  ;;  %v3106_v19 = vld [vmem:[#allocation9 + $0xd70] sm:$0xff]  ;;  %v3047_v58 = vld [vmem:[#allocation9 + $0xb98] sm:$0xff] }
 0x40f   : > { %3223 = vmatpush.msrb.mxu2 %v3106_v19  ;;  %3273 = vmatpush.msrb.mxu0 %v3047_v58  ;;  %v2996_v19 = vld [vmem:[#allocation9 + $0xa00] sm:$0xff] }
 0x410   : > { %v2984_v58 = vld [vmem:[#allocation9 + $0x9a0] sm:$0xff] }
 0x411   : > { %3224 = vmatpush.msrb.mxu2 %v3103_v35  ;;  %3274 = vmatpush.msrb.mxu0 %v3044_v9  ;;  %v3067_v35 = vld [vmem:[#allocation9 + $0xc38] sm:$0xff] }
 0x413   : > { %3225 = vmatpush.msrb.mxu2 %v3100_v30  ;;  %3275 = vmatpush.msrb.mxu0 %v3041_v60  ;;  %v3064_v30 = vld [vmem:[#allocation9 + $0xc20] sm:$0xff] }
 0x415   : > { %3226 = vmatpush.msrb.mxu2 %v3097_v34  ;;  %3276 = vmatpush.msrb.mxu0 %v3038_v45  ;;  %v3014_v34 = vld [vmem:[#allocation9 + $0xa90] sm:$0xff]  ;;  %v3107_v45 = vld [vmem:[#allocation9 + $0xd78] sm:$0xff] }
 0x417   : > { %3227 = vmatpush.msrb.mxu2 %v3094_v32  ;;  %3277 = vmatpush.msrb.mxu0 %v3035_v12  ;;  %v2981_v32 = vld [vmem:[#allocation9 + $0x988] sm:$0xff] }
 0x419   : > { %3228 = vmatpush.msrb.mxu2 %v3091_v21  ;;  %3278 = vmatpush.msrb.mxu0 %v3032_v63  ;;  %v3092_v63 = vld [vmem:[#allocation9 + $0xd00] sm:$0xff] }
 0x41b   : > { %3229 = vmatpush.msrb.mxu2 %v3088_v4  ;;  %3279 = vmatpush.msrb.mxu0 %v3029_v14 }
 0x41d   : > { %3230 = vmatpush.msrb.mxu2 %v3085_v24  ;;  %3280 = vmatpush.msrb.mxu0 %v3026_v44  ;;  %v3101_v24 = vld [vmem:[#allocation9 + $0xd48] sm:$0xff] }
 0x41e   : > { %v3077_v44 = vld [vmem:[#allocation9 + $0xc88] sm:$0xff] }
 0x41f   : > { %3231 = vmatpush.msrb.mxu2 %v3082_v27  ;;  %3281 = vmatpush.msrb.mxu0 %v3023_v26  ;;  %v5008_v27 = vld [vmem:[%s4998_s26] sm:$0xff] }
 0x420   : > { %v3445_v26 = vld [vmem:[#allocation12 + $0x2b0] sm:$0xff] }
 0x421   : > { %3232 = vmatpush.msrb.mxu2 %v3079_v40 }
 0x427   : > { %v2704_v46 = vpop.f32.mrf.mxu3 }
 0x428   : > { %v2705_v11 = vadd.f32 %v2704_v46, %v4951_v13  ;;  %v3016_v13 = vld [vmem:[#allocation9 + $0xaa0] sm:$0xff] }
 0x429   : > { %v2773_v17 = vpop.f32.mrf.mxu2  ;;  %3214 = vmatpush.msrb.mxu1 %v3016_v13  ;;  %v2972_v13 = vld [vmem:[#allocation9 + $0x940] sm:$0xff] }
 0x42a   : > { %v2727_v33 = vpop.f32.mrf.mxu0  ;;  %v4975_v56 = vadd.f32 %v2773_v17, %v4965_v48  ;;  %v3011_v48 = vld [vmem:[#allocation9 + $0xa78] sm:$0xff]  ;;  %v2978_v17 = vld [vmem:[#allocation9 + $0x970] sm:$0xff] }
 0x42b   : > { %v2728_v51 = vadd.f32 %v2727_v33, %v2705_v11  ;;  %3246 = vmatpush.msrb.mxu3 %v3011_v48  ;;  %3215 = vmatpush.msrb.mxu1 %v3013_v59  ;;  %v2966_v59 = vld [vmem:[#allocation9 + $0x910] sm:$0xff] }
 0x42d   : > { %3247 = vmatpush.msrb.mxu3 %v3008_v2  ;;  %v5005_v2 = vld [vmem:[%s4998_s26 + $0x8] sm:$0xff] }
 0x42e   : > { %v2750_v49 = vpop.f32.mrf.mxu1 }
 0x42f   : > { %v4977_v20 = vadd.f32 %v2750_v49, %v2728_v51  ;;  %v2707_v37 = vpop.f32.mrf.mxu3  ;;  %3248 = vmatpush.msrb.mxu3 %v3005_v29  ;;  %v2975_v51 = vld [vmem:[#allocation9 + $0x958] sm:$0xff] }
 0x430   : > { %v2708_v25 = vadd.f32 %v2707_v37, %v4957_v55  ;;  %v3076_v55 = vld [vmem:[#allocation9 + $0xc80] sm:$0xff]  ;;  %v3098_v37 = vld [vmem:[#allocation9 + $0xd30] sm:$0xff]  ;;  %v3095_v29 = vld [vmem:[#allocation9 + $0xd18] sm:$0xff] }
 0x431   : > { %3249 = vmatpush.msrb.mxu3 %v3002_v42  ;;  %3233 = vmatpush.msrb.mxu2 %v3076_v55  ;;  %v3080_v42 = vld [vmem:[#allocation9 + $0xca0] sm:$0xff]  ;;  %v3074_v55 = vld [vmem:[#allocation9 + $0xc70] sm:$0xff] }
 0x432   : > { %v2730_v3 = vpop.f32.mrf.mxu0 }
 0x433   : > { %v2731_v16 = vadd.f32 %v2730_v3, %v2708_v25  ;;  %3250 = vmatpush.msrb.mxu3 %v2999_v61  ;;  %3234 = vmatpush.msrb.mxu2 %v3073_v62  ;;  %v3089_v3 = vld [vmem:[#allocation9 + $0xce8] sm:$0xff] }
 0x434   : > { %v3448_v61 = vld [vmem:[#allocation12 + $0x2c8] sm:$0xff] }
 0x435   : > { %3251 = vmatpush.msrb.mxu3 %v2996_v19  ;;  %3235 = vmatpush.msrb.mxu2 %v3070_v8  ;;  %v3071_v19 = vld [vmem:[#allocation9 + $0xc58] sm:$0xff]  ;;  %v3068_v8 = vld [vmem:[#allocation9 + $0xc40] sm:$0xff] }
 0x436   : > { %v2776_v36 = vpop.f32.mrf.mxu2  ;;  %v2753_v28 = vpop.f32.mrf.mxu1 }
 0x437   : > { %v2777_v31 = vadd.f32 %v2776_v36, %v4967_v47  ;;  %v4981_v1 = vadd.f32 %v2753_v28, %v2731_v16  ;;  %v3020_v47 = vld [vmem:[#allocation9 + $0xac0] sm:$0xff]  ;;  %3252 = vmatpush.msrb.mxu3 %v2993_v41  ;;  %3236 = vmatpush.msrb.mxu2 %v3067_v35  ;;  %v3086_v16 = vld [vmem:[#allocation9 + $0xcd0] sm:$0xff]  ;;  %v3083_v36 = vld [vmem:[#allocation9 + $0xcb8] sm:$0xff] }
 0x438   : > { %3282 = vmatpush.msrb.mxu0 %v3020_v47  ;;  %v3451_v28 = vld [vmem:[#allocation12 + $0x2e0] sm:$0xff]  ;;  %v3442_v41 = vld [vmem:[#allocation12 + $0x298] sm:$0xff]  ;;  %v3436_v35 = vld [vmem:[#allocation12 + $0x268] sm:$0xff] }
 0x439   : > { %3253 = vmatpush.msrb.mxu3 %v2990_v54  ;;  %3237 = vmatpush.msrb.mxu2 %v3064_v30  ;;  %v3065_v47 = vld [vmem:[#allocation9 + $0xc28] sm:$0xff]  ;;  %v3433_v54 = vld [vmem:[#allocation12 + $0x250] sm:$0xff] }
 0x43a   : > { %v2819_v5 = vpop.f32.mrf.mxu0  ;;  %3283 = vmatpush.msrb.mxu0 %v3017_v39  ;;  %v3430_v39 = vld [vmem:[#allocation12 + $0x238] sm:$0xff]  ;;  %v3424_v30 = vld [vmem:[#allocation12 + $0x208] sm:$0xff] }
 0x43b   : > { %3254 = vmatpush.msrb.mxu3 %v2987_v50  ;;  %3238 = vmatpush.msrb.mxu2 %v3061_v7  ;;  %v3421_v50 = vld [vmem:[#allocation12 + $0x1f0] sm:$0xff]  ;;  %v3415_v7 = vld [vmem:[#allocation12 + $0x1c0] sm:$0xff] }
 0x43c   : > { %3284 = vmatpush.msrb.mxu0 %v3014_v34  ;;  %v3418_v34 = vld [vmem:[#allocation12 + $0x1d8] sm:$0xff] }
 0x43d   : > { %v2796_v0 = vpop.f32.mrf.mxu3  ;;  %3255 = vmatpush.msrb.mxu3 %v2984_v58  ;;  %v3453_v58 = vld [vmem:[#allocation12 + $0x2f0] sm:$0xff] }
 0x43e   : > { %v2797_v23 = vadd.f32 %v2796_v0, %v4975_v56  ;;  %v2842_v53 = vpop.f32.mrf.mxu1  ;;  %v3439_v0 = vld [vmem:[#allocation12 + $0x280] sm:$0xff] }
 0x43f   : > { %v2843_v11 = vadd.f32 %v2842_v53, %v4969_v6  ;;  %3256 = vmatpush.msrb.mxu3 %v2981_v32  ;;  %v3452_v53 = vld [vmem:[#allocation12 + $0x2e8] sm:$0xff] }
 0x440   : > { %v4984_v46 = vadd.f32 %v2819_v5, %v2797_v23  ;;  %v3062_v5 = vld [vmem:[#allocation9 + $0xc10] sm:$0xff]  ;;  %v3427_v23 = vld [vmem:[#allocation12 + $0x220] sm:$0xff] }
 0x441   : > { %3257 = vmatpush.msrb.mxu3 %v2978_v17  ;;  %v3412_v32 = vld [vmem:[#allocation12 + $0x1a8] sm:$0xff]  ;;  %v3409_v17 = vld [vmem:[#allocation12 + $0x190] sm:$0xff] }
 0x442   : > { %v2822_v33 = vpop.f32.mrf.mxu0 }
 0x443   : > { %3258 = vmatpush.msrb.mxu3 %v2975_v51  ;;  %v3440_v51 = vld [vmem:[#allocation12 + $0x288] sm:$0xff] }
 0x445   : > { %v2799_v9 = vpop.f32.mrf.mxu3  ;;  %3259 = vmatpush.msrb.mxu3 %v2972_v13  ;;  %v3437_v13 = vld [vmem:[#allocation12 + $0x270] sm:$0xff] }
 0x446   : > { %v2800_v57 = vadd.f32 %v2799_v9, %v2777_v31  ;;  %v2865_v52 = vpop.f32.mrf.mxu2  ;;  %v2845_v21 = vpop.f32.mrf.mxu1  ;;  %v3454_v31 = vld [vmem:[#allocation12 + $0x2f8] sm:$0xff]  ;;  %v3447_v9 = vld [vmem:[#allocation12 + $0x2c0] sm:$0xff] }
 0x447   : > { %v2866_v56 = vadd.f32 %v2865_v52, %v2843_v11  ;;  %v4990_v6 = vadd.f32 %v2845_v21, %v4971_v15  ;;  %3260 = vmatpush.msrb.mxu3 %v2969_v22  ;;  %v3104_v15 = vld [vmem:[#allocation9 + $0xd60] sm:$0xff] }
 0x448   : > { %v4987_v60 = vadd.f32 %v2822_v33, %v2800_v57  ;;  %v3450_v11 = vld [vmem:[#allocation12 + $0x2d8] sm:$0xff]  ;;  %v3444_v57 = vld [vmem:[#allocation12 + $0x2a8] sm:$0xff]  ;;  %v3443_v52 = vld [vmem:[#allocation12 + $0x2a0] sm:$0xff] }
 0x449   : > { %3261 = vmatpush.msrb.mxu3 %v2966_v59  ;;  %v3446_v33 = vld [vmem:[#allocation12 + $0x2b8] sm:$0xff]  ;;  %v3435_v21 = vld [vmem:[#allocation12 + $0x260] sm:$0xff] }
 0x44a   : > { %v4992_v49 = vpop.f32.mrf.mxu0  ;;  %v3434_v22 = vld [vmem:[#allocation12 + $0x258] sm:$0xff]  ;;  %v3431_v59 = vld [vmem:[#allocation12 + $0x240] sm:$0xff] }
 0x44b   : > { %3124 = vmatmul.f32.vlgmr.msra.gmra.mxu1 %v4992_v49  ;;  %3193 = vmatmul.f32.vlgmr.msra.gmra.mxu0 %v4992_v49 }
 0x44c   : > { %3292 = vmatpush.msra.mxu1 %v3107_v45  ;;  %3478 = vmatpush.msra.mxu0 %v3453_v58  ;;  %v3432_v45 = vld [vmem:[#allocation12 + $0x248] sm:$0xff] }
 0x44d   : > { %v3383_v58 = vld [vmem:[#allocation12 + $0xc8] sm:$0xff] }
 0x44e   : > { %v2934_v12 = vpop.f32.mrf.mxu1  ;;  %3293 = vmatpush.msra.mxu1 %v3104_v15  ;;  %3479 = vmatpush.msra.mxu0 %v3450_v11  ;;  %v3428_v15 = vld [vmem:[#allocation12 + $0x228] sm:$0xff] }
 0x44f   : > { %v2888_v4 = vpop.f32.mrf.mxu3  ;;  %3147 = vmatmul.f32.vlgmr.msra.gmra.mxu2 %v2934_v12  ;;  %v3379_v11 = vld [vmem:[#allocation12 + $0xa8] sm:$0xff] }
 0x450   : > { %v5002_v48 = vadd.f32 %v2888_v4, %v2866_v56  ;;  %3294 = vmatpush.msra.mxu1 %v3101_v24  ;;  %3349 = vmatpush.msra.mxu2 %v5005_v2  ;;  %v3438_v56 = vld [vmem:[#allocation12 + $0x278] sm:$0xff]  ;;  %v3425_v24 = vld [vmem:[#allocation12 + $0x210] sm:$0xff] }
 0x451   : > { %3480 = vmatpush.msra.mxu0 %v3447_v9  ;;  %v3426_v4 = vld [vmem:[#allocation12 + $0x218] sm:$0xff]  ;;  %v3378_v9 = vld [vmem:[#allocation12 + $0xa0] sm:$0xff] }
 0x452   : > { %v5011_v25 = vpop.f32.mrf.mxu0  ;;  %3295 = vmatpush.msra.mxu1 %v3098_v37  ;;  %3350 = vmatpush.msra.mxu2 %v5008_v27  ;;  %v3422_v37 = vld [vmem:[#allocation12 + $0x1f8] sm:$0xff] }
 0x453   : > { %3127 = vmatmul.f32.gmra.mxu1 %v5011_v25  ;;  %3196 = vmatmul.f32.gmra.mxu0 %v5011_v25 }
 0x454   : > { %3296 = vmatpush.msra.mxu1 %v3095_v29  ;;  %3481 = vmatpush.msra.mxu0 %v3444_v57  ;;  %v3420_v29 = vld [vmem:[#allocation12 + $0x1e8] sm:$0xff]  ;;  %v5035_v57 = vpop.f32.mrf.mxu2 }
 0x456   : > { %v2937_v14 = vpop.f32.mrf.mxu1  ;;  %3297 = vmatpush.msra.mxu1 %v3092_v63  ;;  %v3417_v63 = vld [vmem:[#allocation12 + $0x1d0] sm:$0xff] }
 0x457   : > { %3150 = vmatmul.f32.gmra.mxu2 %v2937_v14 }
 0x458   : > { %3298 = vmatpush.msra.mxu1 %v3089_v3  ;;  %v3416_v3 = vld [vmem:[#allocation12 + $0x1c8] sm:$0xff] }
 0x45a   : > { %v2957_v40 = vpop.f32.mrf.mxu0  ;;  %3299 = vmatpush.msra.mxu1 %v3086_v16  ;;  %v3413_v16 = vld [vmem:[#allocation12 + $0x1b0] sm:$0xff] }
 0x45b   : > { %3170 = vmatmul.f32.vlgmr.msra.gmra.mxu3 %v2957_v40  ;;  %3216 = vmatmul.f32.vlgmr.msrb.gmra.mxu1 %v2934_v12 }
 0x45c   : > { %3285 = vmatmul.f32.vlgmr.msrb.gmra.mxu0 %v2934_v12  ;;  %3300 = vmatpush.msra.mxu1 %v3083_v36  ;;  %v3423_v12 = vld [vmem:[#allocation12 + $0x200] sm:$0xff]  ;;  %v3410_v36 = vld [vmem:[#allocation12 + $0x198] sm:$0xff] }
 0x45d   : > { %3455 = vmatpush.msra.mxu3 %v3452_v53  ;;  %v3381_v53 = vld [vmem:[#allocation12 + $0xb8] sm:$0xff] }
 0x45e   : > { %3301 = vmatpush.msra.mxu1 %v3080_v42  ;;  %v3405_v42 = vld [vmem:[#allocation12 + $0x178] sm:$0xff] }
 0x45f   : > { %3239 = vmatmul.f32.vlgmr.msrb.gmra.mxu2 %v2957_v40 }
 0x460   : > { %3501 = vmatpush.msrb.mxu2 %v3454_v31  ;;  %3302 = vmatpush.msra.mxu1 %v3077_v44  ;;  %v3403_v31 = vld [vmem:[#allocation12 + $0x168] sm:$0xff]  ;;  %v3404_v44 = vld [vmem:[#allocation12 + $0x170] sm:$0xff] }
 0x462   : > { %v2960_v62 = vpop.f32.mrf.mxu0  ;;  %3502 = vmatpush.msrb.mxu2 %v3451_v28  ;;  %3303 = vmatpush.msra.mxu1 %v3074_v55  ;;  %v3402_v28 = vld [vmem:[#allocation12 + $0x160] sm:$0xff]  ;;  %v3400_v55 = vld [vmem:[#allocation12 + $0x150] sm:$0xff] }
 0x463   : > { %3173 = vmatmul.f32.gmra.mxu3 %v2960_v62  ;;  %3219 = vmatmul.f32.gmra.mxu1 %v2937_v14 }
 0x464   : > { %3288 = vmatmul.f32.gmra.mxu0 %v2937_v14  ;;  %3503 = vmatpush.msrb.mxu2 %v3448_v61  ;;  %v3414_v14 = vld [vmem:[#allocation12 + $0x1b8] sm:$0xff] }
 0x465   : > { %3304 = vmatpush.msra.mxu1 %v3071_v19  ;;  %v3401_v61 = vld [vmem:[#allocation12 + $0x158] sm:$0xff] }
 0x466   : > { %3504 = vmatpush.msrb.mxu2 %v3445_v26  ;;  %v3397_v19 = vld [vmem:[#allocation12 + $0x138] sm:$0xff]  ;;  %v3398_v26 = vld [vmem:[#allocation12 + $0x140] sm:$0xff] }
 0x467   : > { %3242 = vmatmul.f32.gmra.mxu2 %v2960_v62  ;;  %3305 = vmatpush.msra.mxu1 %v3068_v8  ;;  %v3396_v8 = vld [vmem:[#allocation12 + $0x130] sm:$0xff] }
 0x468   : > { %3505 = vmatpush.msrb.mxu2 %v3442_v41  ;;  %v3394_v41 = vld [vmem:[#allocation12 + $0x120] sm:$0xff] }
 0x469   : > { %3306 = vmatpush.msra.mxu1 %v3065_v47  ;;  %v3395_v47 = vld [vmem:[#allocation12 + $0x128] sm:$0xff] }
 0x46a   : > { %3506 = vmatpush.msrb.mxu2 %v3439_v0  ;;  %v3393_v0 = vld [vmem:[#allocation12 + $0x118] sm:$0xff] }
 0x46b   : > { %3262 = vmatmul.f32.vlgmr.msrb.gmra.mxu3 %v4992_v49  ;;  %3307 = vmatpush.msra.mxu1 %v3062_v5  ;;  %v3429_v49 = vld [vmem:[#allocation12 + $0x230] sm:$0xff]  ;;  %v3391_v5 = vld [vmem:[#allocation12 + $0x108] sm:$0xff] }
 0x46c   : > { %3308 = vmatmul.f32.vlgmr.msra.gmra.mxu1 %v2957_v40  ;;  %3507 = vmatpush.msrb.mxu2 %v3436_v35  ;;  %v3407_v40 = vld [vmem:[#allocation12 + $0x180] sm:$0xff]  ;;  %v3392_v35 = vld [vmem:[#allocation12 + $0x110] sm:$0xff] }
 0x46d   : > { %3524 = vmatpush.msrb.mxu1 %v3403_v31  ;;  %v3661_v31 = vld [vmem:[#allocation12 + $0x460] sm:$0xff] }
 0x46e   : > { %3508 = vmatpush.msrb.mxu2 %v3433_v54  ;;  %v3388_v54 = vld [vmem:[#allocation12 + $0xf0] sm:$0xff] }
 0x46f   : > { %4077 = vmatmul.msk.f32.vlgmr.msra.gmra.mxu2 %vm522_vm1, %v4638_v10  ;;  %v3449_v10 = vld [vmem:[#allocation12 + $0x2d0] sm:$0xff]  ;;  %3525 = vmatpush.msrb.mxu1 %v3400_v55  ;;  %v3657_v55 = vld [vmem:[#allocation12 + $0x440] sm:$0xff] }
 0x470   : > { %3509 = vmatpush.msrb.mxu2 %v3430_v39  ;;  %3456 = vmatpush.msra.mxu3 %v3449_v10  ;;  %v3389_v39 = vld [vmem:[#allocation12 + $0xf8] sm:$0xff]  ;;  %v3380_v10 = vld [vmem:[#allocation12 + $0xb0] sm:$0xff] }
 0x471   : > { %3526 = vmatpush.msrb.mxu1 %v3397_v19 }
 0x472   : > { %3510 = vmatpush.msrb.mxu2 %v3427_v23  ;;  %3457 = vmatpush.msra.mxu3 %v3446_v33  ;;  %v3387_v23 = vld [vmem:[#allocation12 + $0xe8] sm:$0xff]  ;;  %v3376_v33 = vld [vmem:[#allocation12 + $0x90] sm:$0xff] }
 0x473   : > { %3265 = vmatmul.f32.gmra.mxu3 %v5011_v25  ;;  %v3419_v25 = vld [vmem:[#allocation12 + $0x1e0] sm:$0xff]  ;;  %3527 = vmatpush.msrb.mxu1 %v3394_v41  ;;  %v3655_v41 = vld [vmem:[#allocation12 + $0x430] sm:$0xff] }
 0x474   : > { %3311 = vmatmul.f32.gmra.mxu1 %v2960_v62  ;;  %3511 = vmatpush.msrb.mxu2 %v3424_v30  ;;  %v3399_v62 = vld [vmem:[#allocation12 + $0x148] sm:$0xff]  ;;  %v3385_v30 = vld [vmem:[#allocation12 + $0xd8] sm:$0xff] }
 0x475   : > { %3458 = vmatpush.msra.mxu3 %v3443_v52  ;;  %3528 = vmatpush.msrb.mxu1 %v3391_v5  ;;  %v3375_v52 = vld [vmem:[#allocation12 + $0x88] sm:$0xff] }
 0x476   : > { %3512 = vmatpush.msrb.mxu2 %v3421_v50  ;;  %v3386_v50 = vld [vmem:[#allocation12 + $0xe0] sm:$0xff]  ;;  %v3650_v5 = vld [vmem:[#allocation12 + $0x408] sm:$0xff] }
 0x477   : > { %4078 = vmatmul.msk.f32.gmra.mxu2 %vm522_vm1, %v4646_v18  ;;  %v3441_v18 = vld [vmem:[#allocation12 + $0x290] sm:$0xff]  ;;  %3459 = vmatpush.msra.mxu3 %v3440_v51  ;;  %v3374_v51 = vld [vmem:[#allocation12 + $0x80] sm:$0xff] }
 0x478   : > { %3513 = vmatpush.msrb.mxu2 %v3418_v34  ;;  %3482 = vmatpush.msra.mxu0 %v3441_v18  ;;  %v3384_v34 = vld [vmem:[#allocation12 + $0xd0] sm:$0xff]  ;;  %v3373_v18 = vld [vmem:[#allocation12 + $0x78] sm:$0xff] }
 0x479   : > { %3460 = vmatpush.msra.mxu3 %v3437_v13  ;;  %3529 = vmatpush.msrb.mxu1 %v3388_v54  ;;  %v3370_v13 = vld [vmem:[#allocation12 + $0x60] sm:$0xff] }
 0x47a   : > { %3514 = vmatpush.msrb.mxu2 %v3415_v7  ;;  %3483 = vmatpush.msra.mxu0 %v3438_v56  ;;  %v3382_v7 = vld [vmem:[#allocation12 + $0xc0] sm:$0xff]  ;;  %v3372_v56 = vld [vmem:[#allocation12 + $0x70] sm:$0xff] }
 0x47b   : > { %3461 = vmatpush.msra.mxu3 %v3434_v22  ;;  %3530 = vmatpush.msrb.mxu1 %v3385_v30  ;;  %v3369_v22 = vld [vmem:[#allocation12 + $0x58] sm:$0xff] }
 0x47c   : > { %3515 = vmatpush.msrb.mxu2 %v3412_v32  ;;  %3484 = vmatpush.msra.mxu0 %v3435_v21  ;;  %v3371_v21 = vld [vmem:[#allocation12 + $0x68] sm:$0xff] }
 0x47d   : > { %3462 = vmatpush.msra.mxu3 %v3431_v59  ;;  %3531 = vmatpush.msrb.mxu1 %v3382_v7  ;;  %v3368_v59 = vld [vmem:[#allocation12 + $0x50] sm:$0xff] }
 0x47e   : > { %3516 = vmatpush.msrb.mxu2 %v3409_v17  ;;  %3485 = vmatpush.msra.mxu0 %v3432_v45  ;;  %v3377_v17 = vld [vmem:[#allocation12 + $0x98] sm:$0xff]  ;;  %v3367_v45 = vld [vmem:[#allocation12 + $0x48] sm:$0xff] }
 0x47f   : > { %3517 = vmatmul.f32.vlgmr.msrb.gmra.mxu2 %v5008_v27  ;;  %3463 = vmatpush.msra.mxu3 %v3428_v15  ;;  %v3364_v15 = vld [vmem:[#allocation12 + $0x30] sm:$0xff] }
 0x480   : > { %3607 = vmatpush.msra.mxu2 %v5005_v2  ;;  %3486 = vmatpush.msra.mxu0 %v3429_v49  ;;  %v3366_v49 = vld [vmem:[#allocation12 + $0x40] sm:$0xff] }
 0x481   : > { %3464 = vmatpush.msra.mxu3 %v3425_v24  ;;  %3532 = vmatpush.msrb.mxu1 %v3379_v11 }
 0x482   : > { %3608 = vmatpush.msra.mxu2 %v5008_v27  ;;  %3487 = vmatpush.msra.mxu0 %v3426_v4  ;;  %v3365_v4 = vld [vmem:[#allocation12 + $0x38] sm:$0xff] }
 0x483   : > { %3465 = vmatpush.msra.mxu3 %v3422_v37  ;;  %3533 = vmatpush.msrb.mxu1 %v3376_v33  ;;  %v3363_v37 = vld [vmem:[#allocation12 + $0x28] sm:$0xff] }
 0x484   : > { %3488 = vmatpush.msra.mxu0 %v3423_v12 }
 0x485   : > { %3466 = vmatpush.msra.mxu3 %v3419_v25  ;;  %3534 = vmatpush.msrb.mxu1 %v3373_v18  ;;  %v3362_v25 = vld [vmem:[#allocation12 + $0x20] sm:$0xff] }
 0x486   : > { %3489 = vmatpush.msra.mxu0 %v3420_v29  ;;  %v3361_v29 = vld [vmem:[#allocation12 + $0x18] sm:$0xff] }
 0x487   : > { %3520 = vmatmul.f32.gmra.mxu2 %v5005_v2  ;;  %3467 = vmatpush.msra.mxu3 %v3416_v3  ;;  %v3358_v3 = vld [vmem:[#allocation12] sm:$0xff] }
 0x488   : > { %3490 = vmatpush.msra.mxu0 %v3417_v63  ;;  %3535 = vmatpush.msrb.mxu1 %v3370_v13  ;;  %v3360_v63 = vld [vmem:[#allocation12 + $0x10] sm:$0xff] }
 0x489   : > { %3468 = vmatpush.msra.mxu3 %v3413_v16  ;;  %v5039_v16 = vpop.f32.mrf.mxu3 }
 0x48a   : > { %3491 = vmatpush.msra.mxu0 %v3414_v14  ;;  %3536 = vmatpush.msrb.mxu1 %v3367_v45  ;;  %v3359_v14 = vld [vmem:[#allocation12 + $0x8] sm:$0xff]  ;;  %v3636_v45 = vld [vmem:[#allocation12 + $0x398] sm:$0xff] }
 0x48b   : > { %3469 = vmatpush.msra.mxu3 %v3410_v36  ;;  %v3663_v36 = vld [vmem:[#allocation12 + $0x470] sm:$0xff] }
 0x48c   : > { %3537 = vmatpush.msrb.mxu1 %v3364_v15  ;;  %3688 = vmatpush.msrb.mxu2 %v3663_v36  ;;  %v3632_v15 = vld [vmem:[#allocation12 + $0x378] sm:$0xff]  ;;  %v3623_v36 = vld [vmem:[#allocation12 + $0x330] sm:$0xff] }
 0x48d   : > { %3470 = vmatpush.msra.mxu3 %v3407_v40  ;;  %v3659_v40 = vld [vmem:[#allocation12 + $0x450] sm:$0xff] }
 0x48e   : > { %3471 = vmatmul.f32.vlgmr.msra.gmra.mxu3 %v5008_v27  ;;  %3538 = vmatpush.msrb.mxu1 %v3361_v29  ;;  %v3629_v29 = vld [vmem:[#allocation12 + $0x360] sm:$0xff] }
 0x48f   : > { %4079 = vmatmul.msk.f32.vlgmr.msra.gmra.mxu2 %vm522_vm1, %v4660_v38  ;;  %v3411_v38 = vld [vmem:[#allocation12 + $0x1a0] sm:$0xff]  ;;  %3547 = vmatpush.msrb.mxu3 %v3404_v44 }
 0x490   : > { %3492 = vmatpush.msra.mxu0 %v3411_v38  ;;  %3539 = vmatpush.msrb.mxu1 %v3358_v3  ;;  %v3662_v38 = vld [vmem:[#allocation12 + $0x468] sm:$0xff] }
 0x491   : > { %3548 = vmatpush.msrb.mxu3 %v3401_v61  ;;  %v3658_v61 = vld [vmem:[#allocation12 + $0x448] sm:$0xff] }
 0x492   : > { %3665 = vmatpush.msra.mxu1 %v3662_v38  ;;  %v3628_v38 = vld [vmem:[#allocation12 + $0x358] sm:$0xff] }
 0x493   : > { %3549 = vmatpush.msrb.mxu3 %v3398_v26  ;;  %v3653_v26 = vld [vmem:[#allocation12 + $0x420] sm:$0xff] }
 0x494   : > { %3666 = vmatpush.msra.mxu1 %v3659_v40 }
 0x495   : > { %3550 = vmatpush.msrb.mxu3 %v3395_v47 }
 0x496   : > { %3474 = vmatmul.f32.gmra.mxu3 %v5005_v2 }
 0x497   : > { %4080 = vmatmul.msk.f32.gmra.mxu2 %vm522_vm1, %v4669_v43  ;;  %v3408_v43 = vld [vmem:[#allocation12 + $0x188] sm:$0xff]  ;;  %3551 = vmatpush.msrb.mxu3 %v3392_v35  ;;  %v3651_v35 = vld [vmem:[#allocation12 + $0x410] sm:$0xff] }
 0x498   : > { %3493 = vmatpush.msra.mxu0 %v3408_v43  ;;  %v3664_v43 = vld [vmem:[#allocation12 + $0x478] sm:$0xff] }
 0x499   : > { %3494 = vmatmul.f32.vlgmr.msra.gmra.mxu0 %v5008_v27  ;;  %v3390_v27 = vld [vmem:[#allocation12 + $0x100] sm:$0xff]  ;;  %3552 = vmatpush.msrb.mxu3 %v3389_v39  ;;  %v3647_v39 = vld [vmem:[#allocation12 + $0x3f0] sm:$0xff] }
 0x49a   : > { %3570 = vmatpush.msrb.mxu0 %v3405_v42  ;;  %v3660_v42 = vld [vmem:[#allocation12 + $0x458] sm:$0xff] }
 0x49b   : > { %3553 = vmatpush.msrb.mxu3 %v3386_v50  ;;  %3689 = vmatpush.msrb.mxu2 %v3660_v42  ;;  %v3625_v42 = vld [vmem:[#allocation12 + $0x340] sm:$0xff] }
 0x49c   : > { %3571 = vmatpush.msrb.mxu0 %v3402_v28  ;;  %v3656_v28 = vld [vmem:[#allocation12 + $0x438] sm:$0xff] }
 0x49d   : > { %3554 = vmatpush.msrb.mxu3 %v3383_v58  ;;  %3667 = vmatpush.msra.mxu1 %v3656_v28  ;;  %v3645_v58 = vld [vmem:[#allocation12 + $0x3e0] sm:$0xff] }
 0x49e   : > { %3572 = vmatpush.msrb.mxu0 %v3399_v62  ;;  %3690 = vmatpush.msrb.mxu2 %v3657_v55  ;;  %v3617_v28 = vld [vmem:[#allocation12 + $0x300] sm:$0xff]  ;;  %v3618_v55 = vld [vmem:[#allocation12 + $0x308] sm:$0xff] }
 0x49f   : > { %3555 = vmatpush.msrb.mxu3 %v3380_v10  ;;  %3668 = vmatpush.msra.mxu1 %v3653_v26  ;;  %v3641_v10 = vld [vmem:[#allocation12 + $0x3c0] sm:$0xff] }
 0x4a0   : > { %3573 = vmatpush.msrb.mxu0 %v3396_v8  ;;  %v3654_v8 = vld [vmem:[#allocation12 + $0x428] sm:$0xff] }
 0x4a1   : > { %3497 = vmatmul.f32.gmra.mxu0 %v5005_v2  ;;  %3556 = vmatpush.msrb.mxu3 %v3377_v17  ;;  %v3648_v2 = vld [vmem:[#allocation12 + $0x3f8] sm:$0xff] }
 0x4a2   : > { %3574 = vmatpush.msrb.mxu0 %v3393_v0  ;;  %3691 = vmatpush.msrb.mxu2 %v3654_v8 }
 0x4a3   : > { %3557 = vmatpush.msrb.mxu3 %v3374_v51  ;;  %3669 = vmatpush.msra.mxu1 %v3650_v5  ;;  %v3639_v51 = vld [vmem:[#allocation12 + $0x3b0] sm:$0xff] }
 0x4a4   : > { %3575 = vmatpush.msrb.mxu0 %v3390_v27  ;;  %v3652_v27 = vld [vmem:[#allocation12 + $0x418] sm:$0xff]  ;;  %3692 = vmatpush.msrb.mxu2 %v3651_v35 }
 0x4a5   : > { %3558 = vmatpush.msrb.mxu3 %v3371_v21  ;;  %3670 = vmatpush.msra.mxu1 %v3647_v39  ;;  %v3635_v21 = vld [vmem:[#allocation12 + $0x390] sm:$0xff] }
 0x4a6   : > { %3576 = vmatpush.msrb.mxu0 %v3387_v23  ;;  %v3649_v23 = vld [vmem:[#allocation12 + $0x400] sm:$0xff]  ;;  %3693 = vmatpush.msrb.mxu2 %v3648_v2 }
 0x4a7   : > { %3559 = vmatpush.msrb.mxu3 %v3368_v59  ;;  %v3637_v59 = vld [vmem:[#allocation12 + $0x3a0] sm:$0xff] }
 0x4a8   : > { %3577 = vmatpush.msrb.mxu0 %v3384_v34  ;;  %v3644_v34 = vld [vmem:[#allocation12 + $0x3d8] sm:$0xff]  ;;  %3694 = vmatpush.msrb.mxu2 %v3645_v58 }
 0x4a9   : > { %3560 = vmatpush.msrb.mxu3 %v3365_v4  ;;  %3671 = vmatpush.msra.mxu1 %v3644_v34  ;;  %v5066_v34 = vld [vmem:[#allocation10] sm:$0x7] }
 0x4aa   : > { %3578 = vmatpush.msrb.mxu0 %v3381_v53  ;;  %v3646_v53 = vld [vmem:[#allocation12 + $0x3e8] sm:$0xff]  ;;  %v3323_v58 = vperm.slane %v5066_v34, 0 }
 0x4ab   : > { %3561 = vmatpush.msrb.mxu3 %v3362_v25  ;;  %3672 = vmatpush.msra.mxu1 %v3641_v10  ;;  %v3630_v25 = vld [vmem:[#allocation12 + $0x368] sm:$0xff] }
 0x4ac   : > { %3579 = vmatpush.msrb.mxu0 %v3378_v9  ;;  %v3643_v9 = vld [vmem:[#allocation12 + $0x3d0] sm:$0xff] }
 0x4ad   : > { %3562 = vmatpush.msrb.mxu3 %v3359_v14  ;;  %v3627_v14 = vld [vmem:[#allocation12 + $0x350] sm:$0xff] }
 0x4ae   : > { %3580 = vmatpush.msrb.mxu0 %v3375_v52 }
 0x4af   : > { %3711 = vmatpush.msra.mxu3 %v3664_v43  ;;  %v3624_v43 = vld [vmem:[#allocation12 + $0x338] sm:$0xff] }
 0x4b0   : > { %3581 = vmatpush.msrb.mxu0 %v3372_v56  ;;  %v3640_v56 = vld [vmem:[#allocation12 + $0x3b8] sm:$0xff] }
 0x4b1   : > { %3712 = vmatpush.msra.mxu3 %v3661_v31  ;;  %v3620_v31 = vld [vmem:[#allocation12 + $0x318] sm:$0xff] }
 0x4b2   : > { %3582 = vmatpush.msrb.mxu0 %v3369_v22 }
 0x4b3   : > { %3713 = vmatpush.msra.mxu3 %v3658_v61  ;;  %v3619_v61 = vld [vmem:[#allocation12 + $0x310] sm:$0xff] }
 0x4b4   : > { %3583 = vmatpush.msrb.mxu0 %v3366_v49 }
 0x4b5   : > { %3714 = vmatpush.msra.mxu3 %v3655_v41 }
 0x4b6   : > { %3584 = vmatpush.msrb.mxu0 %v3363_v37 }
 0x4b7   : > { %3715 = vmatpush.msra.mxu3 %v3652_v27 }
 0x4b8   : > { %3585 = vmatpush.msrb.mxu0 %v3360_v63  ;;  %v3631_v63 = vld [vmem:[#allocation12 + $0x370] sm:$0xff] }
 0x4b9   : > { %3716 = vmatpush.msra.mxu3 %v3649_v23 }
 0x4bb   : > { %3717 = vmatpush.msra.mxu3 %v3646_v53 }
 0x4bd   : > { %3718 = vmatpush.msra.mxu3 %v3643_v9 }
 0x4bf   : > { %3719 = vmatpush.msra.mxu3 %v3640_v56 }
 0x4c1   : > { %3720 = vmatpush.msra.mxu3 %v3637_v59 }
 0x4c8   : > { %v5033_v32 = vpop.f32.mrf.mxu1  ;;  %v3194_v47 = vpop.f32.mrf.mxu0 }
 0x4d0   : > { %v5037_v24 = vpop.f32.mrf.mxu1  ;;  %v3197_v22 = vpop.f32.mrf.mxu0 }
 0x4d2   : > { %v3148_v12 = vpop.f32.mrf.mxu2 }
 0x4d3   : > { %v3149_v19 = vadd.f32 %v3148_v12, %v5033_v32  ;;  %v3642_v32 = vld [vmem:[#allocation12 + $0x3c8] sm:$0xff] }
 0x4d4   : > { %3695 = vmatpush.msrb.mxu2 %v3642_v32  ;;  %v3634_v12 = vld [vmem:[#allocation12 + $0x388] sm:$0xff] }
 0x4d5   : > { %3721 = vmatpush.msra.mxu3 %v3634_v12 }
 0x4d6   : > { %3696 = vmatpush.msrb.mxu2 %v3639_v51 }
 0x4d7   : > { %3722 = vmatpush.msra.mxu3 %v3631_v63 }
 0x4d8   : > { %v3217_v62 = vpop.f32.mrf.mxu1  ;;  %3697 = vmatpush.msrb.mxu2 %v3636_v45 }
 0x4d9   : > { %v3218_v30 = vadd.f32 %v3217_v62, %v3194_v47  ;;  %3723 = vmatpush.msra.mxu3 %v3628_v38  ;;  %v3286_v39 = vpop.f32.mrf.mxu0 }
 0x4da   : > { %v3151_v44 = vpop.f32.mrf.mxu2 }
 0x4db   : > { %v3152_v33 = vadd.f32 %v3151_v44, %v5037_v24  ;;  %v3633_v24 = vld [vmem:[#allocation12 + $0x380] sm:$0xff]  ;;  %v3622_v44 = vld [vmem:[#allocation12 + $0x328] sm:$0xff]  ;;  %3724 = vmatpush.msra.mxu3 %v3625_v42 }
 0x4dc   : > { %3698 = vmatpush.msrb.mxu2 %v3633_v24 }
 0x4dd   : > { %3725 = vmatpush.msra.mxu3 %v3622_v44 }
 0x4de   : > { %v3171_v0 = vpop.f32.mrf.mxu3  ;;  %3699 = vmatpush.msrb.mxu2 %v3630_v25 }
 0x4df   : > { %v3172_v54 = vadd.f32 %v3171_v0, %v3149_v19  ;;  %3726 = vmatpush.msra.mxu3 %v3619_v61 }
 0x4e0   : > { %v3220_v52 = vpop.f32.mrf.mxu1  ;;  %3700 = vmatpush.msrb.mxu2 %v3627_v14 }
 0x4e1   : > { %v5044_v50 = vadd.f32 %v3172_v54, %v4977_v20  ;;  %v3638_v20 = vld [vmem:[#allocation12 + $0x3a8] sm:$0xff]  ;;  %v3221_v49 = vadd.f32 %v3220_v52, %v3197_v22 }
 0x4e2   : > { %v3240_v7 = vpop.f32.mrf.mxu2  ;;  %3673 = vmatpush.msra.mxu1 %v3638_v20  ;;  %3701 = vmatpush.msrb.mxu2 %v3624_v43 }
 0x4e3   : > { %v3241_v11 = vadd.f32 %v3240_v7, %v3218_v30  ;;  %v3289_v30 = vpop.f32.mrf.mxu0  ;;  %v5068_v7 = vld [vmem:[#allocation13] sm:$0x7]  ;;  %v3329_v20 = vadd.f32 %v3323_v58, %v5044_v50 }
 0x4e4   : > { %3674 = vmatpush.msra.mxu1 %v3635_v21 }
 0x4e5   : > { %v5048_v17 = vadd.f32 %v3241_v11, %v4984_v46  ;;  %v3742_v11 = vperm.slane %v5068_v7, 0 }
 0x4e6   : > { %v3174_v18 = vpop.f32.mrf.mxu3  ;;  %3675 = vmatpush.msra.mxu1 %v3632_v15 }
 0x4e7   : > { %v3175_v13 = vadd.f32 %v3174_v18, %v3152_v33  ;;  %v3324_v18 = vperm.slane %v5066_v34, 1 }
 0x4e8   : > { %3676 = vmatpush.msra.mxu1 %v3629_v29 }
 0x4e9   : > { %v5051_v46 = vadd.f32 %v3175_v13, %v4981_v1  ;;  %v3626_v1 = vld [vmem:[#allocation12 + $0x348] sm:$0xff]  ;;  %v5060_v0 = vpop.f32.mrf.mxu1  ;;  %v3743_v13 = vperm.slane %v5068_v7, 1  ;;  %v3330_v15 = vadd.f32 %v3324_v18, %v5048_v17 }
 0x4ea   : > { %v3243_v4 = vpop.f32.mrf.mxu2  ;;  %3677 = vmatpush.msra.mxu1 %v3626_v1 }
 0x4eb   : > { %v3244_v37 = vadd.f32 %v3243_v4, %v3221_v49  ;;  %v3332_v50 = vadd.f32 %v3323_v58, %v5051_v46 }
 0x4ec   : > { %3678 = vmatpush.msra.mxu1 %v3623_v36 }
 0x4ed   : > { %v5054_v3 = vadd.f32 %v3244_v37, %v4987_v60  ;;  %v3621_v60 = vld [vmem:[#allocation12 + $0x320] sm:$0xff] }
 0x4ee   : > { %3679 = vmatpush.msra.mxu1 %v3620_v31  ;;  %3702 = vmatpush.msrb.mxu2 %v3621_v60  ;;  %v3263_v47 = vpop.f32.mrf.mxu3 }
 0x4ef   : > { %v3333_v17 = vadd.f32 %v3324_v18, %v5054_v3 }
 0x4f0   : > { %3680 = vmatpush.msra.mxu1 %v3617_v28  ;;  %3703 = vmatpush.msrb.mxu2 %v3618_v55 }
 0x4f1   : > { %v5064_v35 = vpop.f32.mrf.mxu1 }
 0x4f2   : > { %v3352_v40 = vpop.f32.mrf.mxu2 }
 0x4f3   : > { %3586 = vmatmul.f32.vlgmr.msrb.gmra.mxu0 %v3352_v40  ;;  %3540 = vmatmul.f32.vlgmr.msrb.gmra.mxu1 %v3352_v40 }
 0x4f4   : > { %3563 = vmatmul.f32.vlgmr.msrb.gmra.mxu3 %v3352_v40 }
 0x4f6   : > { %v5062_v5 = vpop.f32.mrf.mxu3 }
 0x4f7   : > { %v3290_v58 = vadd.f32 %v3289_v30, %v5062_v5 }
 0x4f9   : > { %v3313_v5 = vadd.f32 %v5064_v35, %v3290_v58 }
 0x4fa   : > { %v3355_v62 = vpop.f32.mrf.mxu2 }
 0x4fb   : > { %3589 = vmatmul.f32.gmra.mxu0 %v3355_v62  ;;  %3543 = vmatmul.f32.gmra.mxu1 %v3355_v62 }
 0x4fc   : > { %3566 = vmatmul.f32.gmra.mxu3 %v3355_v62 }
 0x502   : > { %v5056_v19 = vpop.f32.mrf.mxu2 }
 0x50a   : > { %v5058_v26 = vpop.f32.mrf.mxu2 }
 0x511   : > { %v3472_v27 = vpop.f32.mrf.mxu3 }
 0x512   : > { %v3610_v8 = vpop.f32.mrf.mxu2 }
 0x513   : > { %3681 = vmatmul.f32.vlgmr.msra.gmra.mxu1 %v3610_v8  ;;  %3704 = vmatmul.f32.vlgmr.msrb.gmra.mxu2 %v3610_v8 }
 0x514   : > { %3727 = vmatmul.f32.vlgmr.msra.gmra.mxu3 %v3610_v8 }
 0x516   : > { %v3495_v33 = vpop.f32.mrf.mxu0 }
 0x519   : > { %v3475_v2 = vpop.f32.mrf.mxu3 }
 0x51a   : > { %v3613_v41 = vpop.f32.mrf.mxu2 }
 0x51b   : > { %3684 = vmatmul.f32.gmra.mxu1 %v3613_v41  ;;  %3707 = vmatmul.f32.gmra.mxu2 %v3613_v41 }
 0x51c   : > { %3730 = vmatmul.f32.gmra.mxu3 %v3613_v41  ;;  %v3287_v41 = vadd.f32 %v3286_v39, %v3263_v47  ;;  %v2869_v47 = vadd.f32 %v5035_v57, %v4990_v6  ;;  %v3325_v39 = vperm.slane %v5066_v34, 2 }
 0x51e   : > { %v3498_v25 = vpop.f32.mrf.mxu0 }
 0x570   : > { %v3541_v54 = vpop.f32.mrf.mxu1 }
 0x571   : > { %v3542_v53 = vadd.f32 %v3541_v54, %v3472_v27  ;;  %v3587_v54 = vpop.f32.mrf.mxu0 }
 0x577   : > { %v3564_v10 = vpop.f32.mrf.mxu3 }
 0x578   : > { %v3544_v23 = vpop.f32.mrf.mxu1  ;;  %v3565_v51 = vadd.f32 %v3564_v10, %v3495_v33 }
 0x579   : > { %v3545_v22 = vadd.f32 %v3544_v23, %v3475_v2  ;;  %v3310_v23 = vadd.f32 %v5060_v0, %v3287_v41 }
 0x57b   : > { %v3317_v0 = vadd.f32 %v3310_v23, %v5002_v48 }
 0x57f   : > { %v3567_v12 = vpop.f32.mrf.mxu3 }
 0x580   : > { %v3568_v63 = vadd.f32 %v3567_v12, %v3498_v25 }
 0x590   : > { %v3682_v32 = vpop.f32.mrf.mxu1 }
 0x591   : > { %v3734_v9 = vadd.f32 %v3682_v32, %v3542_v53 }
 0x593   : > { %v3748_v52 = vadd.f32 %v3742_v11, %v3734_v9 }
 0x595   : > { %v3754_v56 = vadd.f32 %v3748_v52, %v3329_v20  ;;  %v3588_v52 = vadd.f32 %v3587_v54, %v5056_v19 }
 0x596   : > { %v3705_v21 = vpop.f32.mrf.mxu2 }
 0x597   : > { %v4081_v45 = vmul.f32 -1.442695, %v3754_v56  ;;  %v3735_v59 = vadd.f32 %v3705_v21, %v3565_v51  ;;  %v3744_v56 = vperm.slane %v5068_v7, 2  ;;  %v2892_v21 = vadd.f32 %v5039_v16, %v2869_v47 }
 0x598   : > { %v3685_v49 = vpop.f32.mrf.mxu1  ;;  %v3331_v7 = vadd.f32 %v3325_v39, %v3317_v0 }
 0x599   : > { %4182 = vpow2.f32 %v4081_v45  ;;  %v3749_v4 = vadd.f32 %v3743_v13, %v3735_v59  ;;  %v3737_v24 = vadd.f32 %v3685_v49, %v3545_v22  ;;  %v3590_v45 = vpop.f32.mrf.mxu0 }
 0x59b   : > { %v3794_v37 = vadd.f32 %v3749_v4, %v3330_v15  ;;  %v3751_v29 = vadd.f32 %v3742_v11, %v3737_v24  ;;  %v3728_v11 = vpop.f32.mrf.mxu3  ;;  %v3320_v4 = vadd.f32 %v3313_v5, %v2892_v21 }
 0x59c   : > { %v3736_v34 = vadd.f32 %v3728_v11, %v3588_v52 }
 0x59d   : > { %v4083_v1 = vmul.f32 -1.442695, %v3794_v37  ;;  %v3755_v14 = vadd.f32 %v3751_v29, %v3332_v50 }
 0x59e   : > { %v3708_v38 = vpop.f32.mrf.mxu2  ;;  %v3750_v50 = vadd.f32 %v3744_v56, %v3736_v34 }
 0x59f   : > { %v4183_v36 = vpop.eup %4182  ;;  %4184 = vpow2.f32 %v4083_v1  ;;  %v4082_v43 = vmul.f32 -1.442695, %v3755_v14  ;;  %v3738_v40 = vadd.f32 %v3708_v38, %v3568_v63  ;;  %v3591_v1 = vadd.f32 %v3590_v45, %v5058_v26 }
 0x5a0   : > { %v5077_v42 = vadd.f32 1.0, %v4183_v36 }
 0x5a1   : > { %4186 = vpow2.f32 %v4082_v43  ;;  %v3752_v31 = vadd.f32 %v3743_v13, %v3738_v40 }
 0x5a2   : > { %4188 = vrcp.f32 %v5077_v42  ;;  %v3775_v48 = vand.u32 2147483648, %v5077_v42  ;;  %vm3769_vm9 = vweird.f32 %v5077_v42  ;;  %v3773_v19 = vand.u32 2147483647, %v5077_v42 }
 0x5a3   : > { %v3795_v46 = vadd.f32 %v3752_v31, %v3333_v17  ;;  %v3731_v25 = vpop.f32.mrf.mxu3 }
 0x5a4   : > { %v3776_v37 = vor.u32 1.1754944e-38, %v3775_v48  ;;  %vm3774_vm13 = vcmp.eq.f32.partialorder %v3773_v19, 8.507059e+37 }
 0x5a5   : > { %v4185_v60 = vpop.eup %4184  ;;  %v4084_v44 = vmul.f32 -1.442695, %v3795_v46 }
 0x5a6   : > { %v3802_v28 = vadd.f32 1.0, %v4185_v60 }
 0x5a7   : > { %v4187_v55 = vpop.eup %4186  ;;  %4190 = vpow2.f32 %v4084_v44 }
 0x5a8   : > { %v5081_v61 = vpop.eup %4188  ;;  %4192 = vrcp.f32 %v3802_v28  ;;  %v5085_v8 = vadd.f32 1.0, %v4187_v55  ;;  %v3815_v30 = vand.u32 2147483648, %v3802_v28  ;;  %v3813_v51 = vand.u32 2147483647, %v3802_v28 }
 0x5a9   : > { %v3765_v62 = vmul.f32 %v5081_v61, %v5077_v42  ;;  %vm3770_vm7 = vweird.f32 %v5081_v61  ;;  %vm3809_vm8 = vweird.f32 %v3802_v28  ;;  %v3739_v42 = vadd.f32 %v3731_v25, %v3591_v1 }
 0x5aa   : > { %4194 = vrcp.f32 %v5085_v8  ;;  %v3816_v22 = vor.u32 1.1754944e-38, %v3815_v30  ;;  %vm5111_vm11 = vmor %vm3769_vm9, %vm3770_vm7  ;;  %vm3814_vm12 = vcmp.eq.f32.partialorder %v3813_v51, 8.507059e+37  ;;  %v3790_v31 = vand.u32 2147483648, %v5085_v8 }
 0x5ab   : > { %v3766_v3 = vsub.f32 1.0, %v3765_v62  ;;  %vm3784_vm2 = vweird.f32 %v5085_v8  ;;  %v3788_v44 = vand.u32 2147483647, %v5085_v8  ;;  %v3334_v55 = vadd.f32 %v3325_v39, %v3320_v4 }
 0x5ac   : > { %v3753_v23 = vadd.f32 %v3744_v56, %v3739_v42 }
 0x5ad   : > { %v4191_v27 = vpop.eup %4190  ;;  %v3767_v32 = vmul.f32 %v5081_v61, %v3766_v3  ;;  %v4198_v3 = vld [vmem:[%s4998_s26] sm:$0xff] }
 0x5ae   : > { %v4193_v2 = vpop.eup %4192  ;;  %v5090_v53 = vadd.f32 1.0, %v4191_v27 }
 0x5af   : > { %v3805_v10 = vmul.f32 %v4193_v2, %v3802_v28  ;;  %vm3810_vm6 = vweird.f32 %v4193_v2  ;;  %v3768_v6 = vadd.f32 %v5081_v61, %v3767_v32 }
 0x5b0   : > { %4196 = vrcp.f32 %v5090_v53  ;;  %v5094_v9 = vpop.eup %4194  ;;  %vm3811_vm10 = vmor %vm3809_vm8, %vm3810_vm6  ;;  %v3828_v14 = vand.u32 2147483647, %v5090_v53  ;;  %v3830_v38 = vand.u32 2147483648, %v5090_v53  ;;  %vm3824_vm1 = vweird.f32 %v5090_v53 }
 0x5b1   : > { %v3806_v33 = vsub.f32 1.0, %v3805_v10  ;;  %v3780_v20 = vmul.f32 %v5094_v9, %v5085_v8  ;;  %v3772_v16 = vsel %vm5111_vm11, %v5081_v61, %v3768_v6  ;;  %vm3785_vm15 = vweird.f32 %v5094_v9 }
 0x5b2   : > { %v3777_v36 = vsel %vm3774_vm13, %v3776_v37, %v3772_v16  ;;  %v3831_v28 = vor.u32 1.1754944e-38, %v3830_v38  ;;  %vm3786_vm4 = vmor %vm3784_vm2, %vm3785_vm15  ;;  %vm3829_vm5 = vcmp.eq.f32.partialorder %v3828_v14, 8.507059e+37  ;;  %v3791_v8 = vor.u32 1.1754944e-38, %v3790_v31 }
 0x5b3   : > { %v3807_v18 = vmul.f32 %v4193_v2, %v3806_v33  ;;  %v3781_v57 = vsub.f32 1.0, %v3780_v20  ;;  %v3844_v60 = vsub.f32 1.0, %v3777_v36  ;;  %v3848_v27 = vmul.f32 %v4198_v3, %v3777_v36 }
 0x5b4   : > { %vm3789_vm6 = vcmp.eq.f32.partialorder %v3788_v44, 8.507059e+37 }
 0x5b5   : > { %v3808_v35 = vadd.f32 %v4193_v2, %v3807_v18  ;;  %v3782_v12 = vmul.f32 %v5094_v9, %v3781_v57 }
 0x5b6   : > { %v4197_v13 = vpop.eup %4196 }
 0x5b7   : > { %v3812_v49 = vsel %vm3811_vm10, %v4193_v2, %v3808_v35  ;;  %v3820_v15 = vmul.f32 %v4197_v13, %v5090_v53  ;;  %vm3825_vm14 = vweird.f32 %v4197_v13  ;;  %v3783_v17 = vadd.f32 %v5094_v9, %v3782_v12 }
 0x5b8   : > { %v3817_v24 = vsel %vm3814_vm12, %v3816_v22, %v3812_v49  ;;  %vm3826_vm3 = vmor %vm3824_vm1, %vm3825_vm14 }
 0x5b9   : > { %v3834_v29 = vmul.f32 %v3817_v24, %v3331_v7  ;;  %v3821_v63 = vsub.f32 1.0, %v3820_v15  ;;  %v3787_v54 = vsel %vm3786_vm4, %v5094_v9, %v3783_v17  ;;  %v4199_v9 = vld [vmem:[%s4998_s26 + $0x8] sm:$0xff] }
 0x5ba   : > { %v3792_v11 = vsel %vm3789_vm6, %v3791_v8, %v3787_v54 }
 0x5bb   : > { %v3836_v43 = vadd.f32 %v3834_v29, %v3750_v50  ;;  %v3822_v40 = vmul.f32 %v4197_v13, %v3821_v63  ;;  %v3845_v47 = vsub.f32 1.0, %v3792_v11  ;;  %v3849_v0 = vmul.f32 %v4199_v9, %v3792_v11 }
 0x5bd   : > { %vm3838_vm0 = vcmp.ge.f32.partialorder %v3836_v43, 0.0  ;;  %v3840_v46 = vmul.f32 0.2, %v3836_v43  ;;  %v3823_v26 = vadd.f32 %v4197_v13, %v3822_v40 }
 0x5bf   : > { %v3842_v61 = vsel %vm3838_vm0, %v3836_v43, %v3840_v46  ;;  %v3827_v62 = vsel %vm3826_vm3, %v4197_v13, %v3823_v26 }
 0x5c0   : > { %v3846_v41 = vmul.f32 %v3844_v60, %v3842_v61  ;;  %v3832_v2 = vsel %vm3829_vm5, %v3831_v28, %v3827_v62 }
 0x5c1   : > { %v3835_v58 = vmul.f32 %v3832_v2, %v3334_v55 }
 0x5c2   : > { %v3850_v53 = vadd.f32 %v3848_v27, %v3846_v41 }
 0x5c3   : > { %v3837_v10 = vadd.f32 %v3835_v58, %v3753_v23 }
 0x5c4   : > { %3852 = vst [vmem:[%s504_s14] sm:$0xff] %v3850_v53 }
 0x5c5   : > { %vm3839_vm7 = vcmp.ge.f32.partialorder %v3837_v10, 0.0  ;;  %v3841_v32 = vmul.f32 0.2, %v3837_v10 }
 0x5c7   : > { %v3843_v39 = vsel %vm3839_vm7, %v3837_v10, %v3841_v32 }
 0x5c8   : > { %v3847_v33 = vmul.f32 %v3845_v47, %v3843_v39 }
 0x5ca   : > { %v3851_v5 = vadd.f32 %v3849_v0, %v3847_v33 }
 0x5cc   : > { %3853 = vst [vmem:[%s504_s14 + $0x8] sm:$0xff] %v3851_v5 }
 0x5cd PF: > { %s25_s13 = sadd.s32 1, %s4466_s13  }
 0x5ce   : > { %p22_p7 = scmp.ge.s32.totalorder %s25_s13, 4  }
 0x5d0   :  { %24 = sbr.rel (!%p22_p7) target bundleno = 5 (0x5), region = 134 }
 0x5d5   :  { %3875 = vsyncpa [#allocation3], 1 }
 0x5d6   :  { %3877 = vsyncpa [#allocation3 + $0x1], 1 }
 0x5d7   :  { %3878 = vsyncpa [#allocation5], 1 }
 0x5d8   :  { %3879 = vsyncpa [#allocation8], 1 }
 0x5d9   :  { %3880 = vsyncpa [#allocation11], 1 }
 0x5da   :  { %3881 = vsyncpa [#allocation14], 1 }

</bundles_post_ra>
